<compile_context>
chip_gen: v7x
topology: tpu7x:2x2x1
jax: 0.10.0
libtpu: 0.0.40
codegen_flags: <defaults>
</compile_context>

<pallas_src>
import functools

import numpy as np
import jax
import jax.numpy as jnp
from jax import lax
from jax.experimental import pallas as pl
from jax.experimental.pallas import tpu as pltpu


def _make_kernel(*, H, W, C, PH, PW, R, scale, D, sampling_ratio=2):
    PP = PH * PW
    HW = H * W
    RPP = R * PP
    SR = sampling_ratio
    scale = float(scale)

    def kernel(tb_ref,                                    # scalar-prefetch (index_maps only)
               feat_ref, hh_ref, ww_ref, bexp_ref, broi_ref,
               w1_ref, b1_ref, w2_ref, b2_ref,
               wb_ref, bb_ref, g1_ref, be1_ref, g2_ref, be2_ref,
               out_ref, pooled_scr):
        del tb_ref

        # ---- ROI-Align bilinear weights, all R ROIs of the tile at once --------
        # bexp rows are p-major within the tile (row = p*R + r); columns are
        # [x1, y1, x2, y2, ph, pw, 0, 0] expanded on the host (ROI-invariant ph/pw
        # and the per-ROI box repeated PP times), so no in-kernel gathers/reshapes.
        bx = bexp_ref[...]                                # (R*PP, 8) f32
        x1 = bx[:, 0:1]
        y1 = bx[:, 1:2]
        x2 = bx[:, 2:3]
        y2 = bx[:, 3:4]
        phn = bx[:, 4:5]
        pwn = bx[:, 5:6]

        roi_sw = x1 * scale - 0.5
        roi_sh = y1 * scale - 0.5
        bin_w = (x2 * scale - 0.5 - roi_sw) * (1.0 / PW)
        bin_h = (y2 * scale - 0.5 - roi_sh) * (1.0 / PH)

        hh = hh_ref[...]                                  # (1, HW) pixel row index (exact ints)
        ww = ww_ref[...]                                  # (1, HW) pixel col index

        # separable hat-function sums: sum_{iy,ix} v_y v_x wy wx = (sum v_y wy)(sum v_x wx)
        wy = jnp.zeros((RPP, HW), jnp.float32)
        wx = jnp.zeros((RPP, HW), jnp.float32)
        for s in range(SR):
            off = (s + 0.5) / SR
            y = roi_sh + (phn + off) * bin_h              # (R*PP, 1)
            x = roi_sw + (pwn + off) * bin_w
            vy = ((y >= -1.0) & (y <= float(H))).astype(jnp.float32)
            vx = ((x >= -1.0) & (x <= float(W))).astype(jnp.float32)
            yc = jnp.clip(y, 0.0, float(H - 1))
            xc = jnp.clip(x, 0.0, float(W - 1))
            wy = wy + vy * jnp.maximum(1.0 - jnp.abs(yc - hh), 0.0)
            wx = wx + vx * jnp.maximum(1.0 - jnp.abs(xc - ww), 0.0)
        wmat = (wy * wx) * (1.0 / (SR * SR))              # (R*PP, HW), lane-dense

        # ---- pooling: one MXU matmul for the whole tile (bf16 in, f32 acc) ------
        feat = feat_ref[0]                                # (HW, C) bf16 (this tile's batch)
        pooled = jnp.dot(wmat.astype(jnp.bfloat16), feat,
                         preferred_element_type=jnp.float32)   # (R*PP, C)

        # regroup the p-major rows into per-ROI fc rows (R, PP*C) via a tiny
        # static-slice scatter into VMEM scratch (avoids an awkward value reshape).
        for p in range(PP):
            pooled_scr[:, p * C:(p + 1) * C] = pooled[p * R:(p + 1) * R, :]
        pooled_flat = pooled_scr[...]                     # (R, PP*C)

        # ---- fc: Linear(C*PP, D) -> ReLU -> Linear(D, D) (W1 host-permuted) -----
        h1 = jnp.dot(pooled_flat.astype(jnp.bfloat16), w1_ref[...],
                     preferred_element_type=jnp.float32) + b1_ref[...]
        h1 = jnp.maximum(h1, 0.0)
        h2 = jnp.dot(h1, w2_ref[...],
                     preferred_element_type=jnp.float32) + b2_ref[...]

        # ---- bbox branch: Linear(4, D) on the feature-map-normalized boxes ------
        br = broi_ref[...]                                # (R, 4) f32
        bf = (bb_ref[...]
              + (br[:, 0:1] * (scale / W)) * wb_ref[0:1, :]
              + (br[:, 1:2] * (scale / H)) * wb_ref[1:2, :]
              + (br[:, 2:3] * (scale / W)) * wb_ref[2:3, :]
              + (br[:, 3:4] * (scale / H)) * wb_ref[3:4, :])   # (R, D)

        def _ln(v, g, be, eps=1e-5):
            m = jnp.mean(v, axis=-1, keepdims=True)
            var = jnp.mean((v - m) ** 2, axis=-1, keepdims=True)
            return (v - m) * lax.rsqrt(var + eps) * g + be

        bf = _ln(bf, g1_ref[...], be1_ref[...])               # bbox_ln
        out_ref[...] = _ln(h2 + bf, g2_ref[...], be2_ref[...]).astype(out_ref.dtype)

    return kernel


def roi_pos_feat_extractor(feats, lines_box, img_sizes, params, *,
                           scale, pool_size, output_dim, roi_tile=8):
    """JAX/Pallas equivalent of RoiPosFeatExtraxtor.forward."""
    del img_sizes                      # forward() never uses the values
    B, C, H, W = feats.shape
    PH, PW = pool_size
    PP = PH * PW
    HW = H * W
    D = output_dim
    R = roi_tile

    counts = [int(b.shape[0]) for b in lines_box]
    if sum(counts) == 0:
        return []                      # matches the PyTorch early-return

    # ---- host-side: pad each batch's ROIs to a multiple of R so every tile of R
    # ROIs shares a single feature map (grouped-by-batch, per the review) --------
    padded_boxes, tile_batch, out_offsets = [], [], []
    off = 0
    for k, n in enumerate(counts):
        out_offsets.append(off)
        if n == 0:
            continue
        m = ((n + R - 1) // R) * R
        b = jnp.asarray(lines_box[k], jnp.float32)
        if m > n:
            b = jnp.concatenate([b, jnp.zeros((m - n, 4), jnp.float32)], axis=0)
        padded_boxes.append(b)
        tile_batch += [k] * (m // R)
        off += m
    N_pad = off
    T = N_pad // R
    boxes_pad = jnp.concatenate(padded_boxes, axis=0)                 # (N_pad, 4)
    tile_batch = jnp.asarray(tile_batch, jnp.int32)                   # (T,)

    # row-expanded box metadata: rows ordered (tile, p-major, roi-within-tile)
    boxes_tiles = boxes_pad.reshape(T, R, 4)
    rep = jnp.broadcast_to(boxes_tiles[:, None, :, :], (T, PP, R, 4)).reshape(T * PP * R, 4)
    ph_vals = (jnp.arange(PP, dtype=jnp.int32) // PW).astype(jnp.float32)
    pw_vals = (jnp.arange(PP, dtype=jnp.int32) % PW).astype(jnp.float32)
    ph_col = jnp.broadcast_to(ph_vals[None, :, None], (T, PP, R)).reshape(T * PP * R, 1)
    pw_col = jnp.broadcast_to(pw_vals[None, :, None], (T, PP, R)).reshape(T * PP * R, 1)
    box_expand = jnp.concatenate(
        [rep, ph_col, pw_col, jnp.zeros((T * PP * R, 2), jnp.float32)], axis=1)   # (N_pad*PP, 8)

    # ROI-invariant pixel index planes (exact integer arithmetic, hoisted to host)
    hw = jnp.arange(HW, dtype=jnp.int32)
    hh_plane = (hw // W).astype(jnp.float32)[None, :]                 # (1, HW)
    ww_plane = (hw % W).astype(jnp.float32)[None, :]                  # (1, HW)

    # features as (B, HW, C) bf16 — halves DMA, MXU-native pooling operand
    feats_t = feats.reshape(B, C, HW).transpose(0, 2, 1).astype(jnp.bfloat16)

    # fc.0 weight permuted once on the host to (p*C + c) row order (bf16 for MXU)
    w1p = params["w1"].reshape(C, PP, D).transpose(1, 0, 2).reshape(PP * C, D).astype(jnp.bfloat16)
    w2 = params["w2"].astype(jnp.float32)

    kernel = _make_kernel(H=H, W=W, C=C, PH=PH, PW=PW, R=R, scale=scale, D=D)

    grid_spec = pltpu.PrefetchScalarGridSpec(
        num_scalar_prefetch=1,
        grid=(T,),
        in_specs=[
            pl.BlockSpec((1, HW, C), lambda i, tb: (tb[i], 0, 0)),    # this tile's feature map
            pl.BlockSpec((1, HW), lambda i, tb: (0, 0)),              # pixel-row index plane
            pl.BlockSpec((1, HW), lambda i, tb: (0, 0)),              # pixel-col index plane
            pl.BlockSpec((R * PP, 8), lambda i, tb: (i, 0)),          # expanded box/bin metadata
            pl.BlockSpec((R, 4), lambda i, tb: (i, 0)),               # per-ROI boxes (bbox branch)
            pl.BlockSpec((PP * C, D), lambda i, tb: (0, 0)),          # fc.0 weight (permuted, bf16)
            pl.BlockSpec((1, D), lambda i, tb: (0, 0)),               # fc.0 bias
            pl.BlockSpec((D, D), lambda i, tb: (0, 0)),               # fc.2 weight
            pl.BlockSpec((1, D), lambda i, tb: (0, 0)),               # fc.2 bias
            pl.BlockSpec((4, D), lambda i, tb: (0, 0)),               # bbox_tranform weight
            pl.BlockSpec((1, D), lambda i, tb: (0, 0)),               # bbox_tranform bias
            pl.BlockSpec((1, D), lambda i, tb: (0, 0)),               # bbox_ln gamma
            pl.BlockSpec((1, D), lambda i, tb: (0, 0)),               # bbox_ln beta
            pl.BlockSpec((1, D), lambda i, tb: (0, 0)),               # add_ln gamma
            pl.BlockSpec((1, D), lambda i, tb: (0, 0)),               # add_ln beta
        ],
        out_specs=pl.BlockSpec((R, D), lambda i, tb: (i, 0)),
        scratch_shapes=[pltpu.VMEM((R, PP * C), jnp.float32)],
    )

    out = pl.pallas_call(
        kernel,
        out_shape=jax.ShapeDtypeStruct((N_pad, D), jnp.float32),
        grid_spec=grid_spec,
        compiler_params=pltpu.CompilerParams(
            dimension_semantics=("parallel",),
            vmem_limit_bytes=64 * 1024 * 1024),
    )(tile_batch, feats_t, hh_plane, ww_plane, box_expand, boxes_pad,
      w1p, params["b1"], w2, params["b2"],
      params["wb"], params["bb"], params["g1"], params["be1"],
      params["g2"], params["be2"])

    # split back per batch (torch.split semantics, empties preserved)
    result = []
    for k, n in enumerate(counts):
        result.append(out[out_offsets[k]:out_offsets[k] + n])
    return result


# ----------------------------- pure-JAX reference -----------------------------
def _ref_forward(feats, bidx, boxes, params, *, scale, pool_size):
    B, C, H, W = feats.shape
    PH, PW = pool_size
    SR = 2

    def one(b, box):
        fmap = feats[b]
        x1, y1, x2, y2 = box[0], box[1], box[2], box[3]
        sw = x1 * scale - 0.5
        sh = y1 * scale - 0.5
        bw = ((x2 * scale - 0.5) - sw) / PW
        bh = ((y2 * scale - 0.5) - sh) / PH
        bins = []
        for ph in range(PH):
            for pw in range(PW):
                acc = jnp.zeros((C,), jnp.float32)
                for iy in range(SR):
                    for ix in range(SR):
                        y = sh + ph * bh + (iy + 0.5) * bh / SR
                        x = sw + pw * bw + (ix + 0.5) * bw / SR
                        valid = ((y >= -1.0) & (y <= H) & (x >= -1.0)
                                 & (x <= W)).astype(jnp.float32)
                        yc = jnp.clip(y, 0.0, H - 1.0)
                        xc = jnp.clip(x, 0.0, W - 1.0)
                        y0 = jnp.floor(yc)
                        x0 = jnp.floor(xc)
                        y1h = jnp.minimum(y0 + 1.0, H - 1.0)
                        x1h = jnp.minimum(x0 + 1.0, W - 1.0)
                        ly = yc - y0
                        lx = xc - x0

                        def g(yy, xx):
                            return fmap[:, yy.astype(jnp.int32), xx.astype(jnp.int32)]

                        v = ((1 - ly) * (1 - lx) * g(y0, x0)
                             + (1 - ly) * lx * g(y0, x1h)
                             + ly * (1 - lx) * g(y1h, x0)
                             + ly * lx * g(y1h, x1h))
                        acc = acc + valid * v
                bins.append(acc / (SR * SR))
        return jnp.stack(bins, axis=1).reshape(C * PH * PW)

    flat = jax.vmap(one)(bidx, boxes)
    h = jnp.maximum(flat @ params["w1"] + params["b1"], 0.0)
    h = h @ params["w2"] + params["b2"]
    nb = boxes * (scale / jnp.array([W, H, W, H], jnp.float32))
    bf = nb @ params["wb"] + params["bb"]

    def ln(v, g, be):
        m = v.mean(-1, keepdims=True)
        var = ((v - m) ** 2).mean(-1, keepdims=True)
        return (v - m) / jnp.sqrt(var + 1e-5) * g + be

    return ln(h + ln(bf, params["g1"], params["be1"]), params["g2"], params["be2"])


if __name__ == "__main__":
    B, C, H, W = 2, 4, 16, 16
    pool_size = (4, 4)
    scale = 0.25          # feature stride 4  ->  image is ~64x64
    output_dim = 128
    CPP = C * pool_size[0] * pool_size[1]
    D = output_dim

    key = jax.random.PRNGKey(0)
    keys = jax.random.split(key, 16)

    feats = jax.random.normal(keys[0], (B, C, H, W), jnp.float32)

    def rand_boxes(k, n):
        k1, k2 = jax.random.split(k)
        xy = jax.random.uniform(k1, (n, 2), minval=0.0, maxval=40.0)
        wh = jax.random.uniform(k2, (n, 2), minval=4.0, maxval=22.0)
        return jnp.concatenate([xy, xy + wh], axis=1).astype(jnp.float32)

    # include boxes that extend past the image border to exercise clip/valid paths
    boxes0 = jnp.concatenate([rand_boxes(keys[1], 2),
                              jnp.array([[-6.0, -4.0, 21.0, 17.0]], jnp.float32)], axis=0)
    boxes1 = jnp.concatenate([rand_boxes(keys[2], 4),
                              jnp.array([[40.0, 45.0, 70.0, 75.0]], jnp.float32)], axis=0)
    lines_box = [boxes0, boxes1]
    img_sizes = [(64, 64), (64, 64)]

    # deterministic synthetic parameters (shapes from the module's __init__)
    params = {
        "w1": jax.random.normal(keys[3], (CPP, D), jnp.float32) * 0.05,
        "b1": jax.random.normal(keys[4], (1, D), jnp.float32) * 0.02,
        "w2": jax.random.normal(keys[5], (D, D), jnp.float32) * 0.05,
        "b2": jax.random.normal(keys[6], (1, D), jnp.float32) * 0.02,
        "wb": jax.random.normal(keys[7], (4, D), jnp.float32) * 0.5,
        "bb": jax.random.normal(keys[8], (1, D), jnp.float32) * 0.02,
        "g1": 1.0 + 0.1 * jax.random.normal(keys[9], (1, D), jnp.float32),
        "be1": 0.1 * jax.random.normal(keys[10], (1, D), jnp.float32),
        "g2": 1.0 + 0.1 * jax.random.normal(keys[11], (1, D), jnp.float32),
        "be2": 0.1 * jax.random.normal(keys[12], (1, D), jnp.float32),
    }

    outs = roi_pos_feat_extractor(feats, lines_box, img_sizes, params,
                                  scale=scale, pool_size=pool_size,
                                  output_dim=output_dim)
    outs = [jax.block_until_ready(o) for o in outs]

    # verify against a gather-based pure-JAX (f32) reference
    bidx = jnp.concatenate([jnp.full((b.shape[0],), k, jnp.int32)
                            for k, b in enumerate(lines_box)])
    boxes = jnp.concatenate(lines_box, axis=0)
    ref = jax.jit(functools.partial(_ref_forward, scale=scale,
                                    pool_size=pool_size))(feats, bidx, boxes, params)
    got = jnp.concatenate(outs, axis=0)
    assert got.shape == ref.shape
    # bf16 MXU operands (features / sampling weights / fc.0 weight) vs f32 reference
    np.testing.assert_allclose(np.asarray(got), np.asarray(ref), atol=2e-2, rtol=2e-2)

    print("KERNEL_OK")
</pallas_src>

<mosaic_0001>
module attributes {stable_mosaic.version = 11 : i64} {
  func.func @kernel(%arg0: i32, %arg1: memref<2xi32, #tpu.memory_space<smem>>, %arg2: memref<1x256x4xbf16, #tpu.memory_space<vmem>>, %arg3: memref<1x256xf32, #tpu.memory_space<vmem>>, %arg4: memref<1x256xf32, #tpu.memory_space<vmem>>, %arg5: memref<128x8xf32, #tpu.memory_space<vmem>>, %arg6: memref<8x4xf32, #tpu.memory_space<vmem>>, %arg7: memref<64x128xbf16, #tpu.memory_space<vmem>>, %arg8: memref<1x128xf32, #tpu.memory_space<vmem>>, %arg9: memref<128x128xf32, #tpu.memory_space<vmem>>, %arg10: memref<1x128xf32, #tpu.memory_space<vmem>>, %arg11: memref<4x128xf32, #tpu.memory_space<vmem>>, %arg12: memref<1x128xf32, #tpu.memory_space<vmem>>, %arg13: memref<1x128xf32, #tpu.memory_space<vmem>>, %arg14: memref<1x128xf32, #tpu.memory_space<vmem>>, %arg15: memref<1x128xf32, #tpu.memory_space<vmem>>, %arg16: memref<1x128xf32, #tpu.memory_space<vmem>>, %arg17: memref<8x128xf32, #tpu.memory_space<vmem>>, %arg18: memref<8x64xf32, #tpu.memory_space<vmem>>) attributes {dimension_semantics = [#tpu.dimension_semantics<parallel>], iteration_bounds = array<i64: 2>, scalar_prefetch = 1 : i64, scratch_operands = 1 : i64, tpu.core_type = #tpu.core_type<tc>, window_params = [{transform_indices = @transform_0, window_bounds = array<i64: 1, 256, 4>}, {pipeline_mode = #tpu.pipeline_mode<synchronous>, transform_indices = @transform_1, window_bounds = array<i64: 1, 256>}, {pipeline_mode = #tpu.pipeline_mode<synchronous>, transform_indices = @transform_2, window_bounds = array<i64: 1, 256>}, {transform_indices = @transform_3, window_bounds = array<i64: 128, 8>}, {transform_indices = @transform_4, window_bounds = array<i64: 8, 4>}, {pipeline_mode = #tpu.pipeline_mode<synchronous>, transform_indices = @transform_5, window_bounds = array<i64: 64, 128>}, {pipeline_mode = #tpu.pipeline_mode<synchronous>, transform_indices = @transform_6, window_bounds = array<i64: 1, 128>}, {pipeline_mode = #tpu.pipeline_mode<synchronous>, transform_indices = @transform_7, window_bounds = array<i64: 128, 128>}, {pipeline_mode = #tpu.pipeline_mode<synchronous>, transform_indices = @transform_8, window_bounds = array<i64: 1, 128>}, {pipeline_mode = #tpu.pipeline_mode<synchronous>, transform_indices = @transform_9, window_bounds = array<i64: 4, 128>}, {pipeline_mode = #tpu.pipeline_mode<synchronous>, transform_indices = @transform_10, window_bounds = array<i64: 1, 128>}, {pipeline_mode = #tpu.pipeline_mode<synchronous>, transform_indices = @transform_11, window_bounds = array<i64: 1, 128>}, {pipeline_mode = #tpu.pipeline_mode<synchronous>, transform_indices = @transform_12, window_bounds = array<i64: 1, 128>}, {pipeline_mode = #tpu.pipeline_mode<synchronous>, transform_indices = @transform_13, window_bounds = array<i64: 1, 128>}, {pipeline_mode = #tpu.pipeline_mode<synchronous>, transform_indices = @transform_14, window_bounds = array<i64: 1, 128>}, {transform_indices = @transform_15, window_bounds = array<i64: 8, 128>}]} {
    %c0 = arith.constant 0 : index
    %c0_0 = arith.constant 0 : index
    %0 = vector.load %arg5[%c0, %c0_0] : memref<128x8xf32, #tpu.memory_space<vmem>>, vector<128x8xf32>
    %1 = vector.extract_strided_slice %0 {offsets = [0, 0], sizes = [128, 1], strides = [1, 1]} : vector<128x8xf32> to vector<128x1xf32>
    %2 = vector.extract_strided_slice %0 {offsets = [0, 1], sizes = [128, 1], strides = [1, 1]} : vector<128x8xf32> to vector<128x1xf32>
    %3 = vector.extract_strided_slice %0 {offsets = [0, 2], sizes = [128, 1], strides = [1, 1]} : vector<128x8xf32> to vector<128x1xf32>
    %4 = vector.extract_strided_slice %0 {offsets = [0, 3], sizes = [128, 1], strides = [1, 1]} : vector<128x8xf32> to vector<128x1xf32>
    %5 = vector.extract_strided_slice %0 {offsets = [0, 4], sizes = [128, 1], strides = [1, 1]} : vector<128x8xf32> to vector<128x1xf32>
    %6 = vector.extract_strided_slice %0 {offsets = [0, 5], sizes = [128, 1], strides = [1, 1]} : vector<128x8xf32> to vector<128x1xf32>
    %cst = arith.constant 2.500000e-01 : f32
    %7 = vector.broadcast %cst : f32 to vector<128x1xf32>
    %8 = arith.mulf %1, %7 : vector<128x1xf32>
    %cst_1 = arith.constant 5.000000e-01 : f32
    %9 = vector.broadcast %cst_1 : f32 to vector<128x1xf32>
    %10 = arith.subf %8, %9 : vector<128x1xf32>
    %cst_2 = arith.constant 2.500000e-01 : f32
    %11 = vector.broadcast %cst_2 : f32 to vector<128x1xf32>
    %12 = arith.mulf %2, %11 : vector<128x1xf32>
    %cst_3 = arith.constant 5.000000e-01 : f32
    %13 = vector.broadcast %cst_3 : f32 to vector<128x1xf32>
    %14 = arith.subf %12, %13 : vector<128x1xf32>
    %cst_4 = arith.constant 2.500000e-01 : f32
    %15 = vector.broadcast %cst_4 : f32 to vector<128x1xf32>
    %16 = arith.mulf %3, %15 : vector<128x1xf32>
    %cst_5 = arith.constant 5.000000e-01 : f32
    %17 = vector.broadcast %cst_5 : f32 to vector<128x1xf32>
    %18 = arith.subf %16, %17 : vector<128x1xf32>
    %19 = arith.subf %18, %10 : vector<128x1xf32>
    %cst_6 = arith.constant 2.500000e-01 : f32
    %20 = vector.broadcast %cst_6 : f32 to vector<128x1xf32>
    %21 = arith.mulf %19, %20 : vector<128x1xf32>
    %cst_7 = arith.constant 2.500000e-01 : f32
    %22 = vector.broadcast %cst_7 : f32 to vector<128x1xf32>
    %23 = arith.mulf %4, %22 : vector<128x1xf32>
    %cst_8 = arith.constant 5.000000e-01 : f32
    %24 = vector.broadcast %cst_8 : f32 to vector<128x1xf32>
    %25 = arith.subf %23, %24 : vector<128x1xf32>
    %26 = arith.subf %25, %14 : vector<128x1xf32>
    %cst_9 = arith.constant 2.500000e-01 : f32
    %27 = vector.broadcast %cst_9 : f32 to vector<128x1xf32>
    %28 = arith.mulf %26, %27 : vector<128x1xf32>
    %c0_10 = arith.constant 0 : index
    %c0_11 = arith.constant 0 : index
    %29 = vector.load %arg3[%c0_10, %c0_11] : memref<1x256xf32, #tpu.memory_space<vmem>>, vector<1x256xf32>
    %c0_12 = arith.constant 0 : index
    %c0_13 = arith.constant 0 : index
    %30 = vector.load %arg4[%c0_12, %c0_13] : memref<1x256xf32, #tpu.memory_space<vmem>>, vector<1x256xf32>
    %cst_14 = arith.constant 0.000000e+00 : f32
    %31 = vector.broadcast %cst_14 : f32 to vector<128x256xf32>
    %cst_15 = arith.constant 0.000000e+00 : f32
    %32 = vector.broadcast %cst_15 : f32 to vector<128x256xf32>
    %cst_16 = arith.constant 2.500000e-01 : f32
    %33 = vector.broadcast %cst_16 : f32 to vector<128x1xf32>
    %34 = arith.addf %5, %33 : vector<128x1xf32>
    %35 = arith.mulf %34, %28 : vector<128x1xf32>
    %36 = arith.addf %14, %35 : vector<128x1xf32>
    %cst_17 = arith.constant 2.500000e-01 : f32
    %37 = vector.broadcast %cst_17 : f32 to vector<128x1xf32>
    %38 = arith.addf %6, %37 : vector<128x1xf32>
    %39 = arith.mulf %38, %21 : vector<128x1xf32>
    %40 = arith.addf %10, %39 : vector<128x1xf32>
    %cst_18 = arith.constant -1.000000e+00 : f32
    %41 = vector.broadcast %cst_18 : f32 to vector<128x1xf32>
    %42 = arith.cmpf oge, %36, %41 : vector<128x1xf32>
    %cst_19 = arith.constant 1.600000e+01 : f32
    %43 = vector.broadcast %cst_19 : f32 to vector<128x1xf32>
    %44 = arith.cmpf ole, %36, %43 : vector<128x1xf32>
    %45 = arith.andi %42, %44 : vector<128x1xi1>
    %46 = arith.extui %45 : vector<128x1xi1> to vector<128x1xi32>
    %47 = arith.sitofp %46 : vector<128x1xi32> to vector<128x1xf32>
    %cst_20 = arith.constant -1.000000e+00 : f32
    %48 = vector.broadcast %cst_20 : f32 to vector<128x1xf32>
    %49 = arith.cmpf oge, %40, %48 : vector<128x1xf32>
    %cst_21 = arith.constant 1.600000e+01 : f32
    %50 = vector.broadcast %cst_21 : f32 to vector<128x1xf32>
    %51 = arith.cmpf ole, %40, %50 : vector<128x1xf32>
    %52 = arith.andi %49, %51 : vector<128x1xi1>
    %53 = arith.extui %52 : vector<128x1xi1> to vector<128x1xi32>
    %54 = arith.sitofp %53 : vector<128x1xi32> to vector<128x1xf32>
    %cst_22 = arith.constant 0.000000e+00 : f32
    %cst_23 = arith.constant 1.500000e+01 : f32
    %55 = vector.broadcast %cst_22 : f32 to vector<128x1xf32>
    %56 = arith.maximumf %55, %36 : vector<128x1xf32>
    %57 = vector.broadcast %cst_23 : f32 to vector<128x1xf32>
    %58 = arith.minimumf %57, %56 : vector<128x1xf32>
    %cst_24 = arith.constant 0.000000e+00 : f32
    %cst_25 = arith.constant 1.500000e+01 : f32
    %59 = vector.broadcast %cst_24 : f32 to vector<128x1xf32>
    %60 = arith.maximumf %59, %40 : vector<128x1xf32>
    %61 = vector.broadcast %cst_25 : f32 to vector<128x1xf32>
    %62 = arith.minimumf %61, %60 : vector<128x1xf32>
    %63 = vector.broadcast %58 : vector<128x1xf32> to vector<128x256xf32>
    %64 = vector.broadcast %29 : vector<1x256xf32> to vector<128x256xf32>
    %65 = arith.subf %63, %64 : vector<128x256xf32>
    %66 = math.absf %65 : vector<128x256xf32>
    %cst_26 = arith.constant 1.000000e+00 : f32
    %67 = vector.broadcast %cst_26 : f32 to vector<128x256xf32>
    %68 = arith.subf %67, %66 : vector<128x256xf32>
    %cst_27 = arith.constant 0.000000e+00 : f32
    %69 = vector.broadcast %cst_27 : f32 to vector<128x256xf32>
    %70 = arith.maximumf %68, %69 : vector<128x256xf32>
    %71 = vector.broadcast %47 : vector<128x1xf32> to vector<128x256xf32>
    %72 = arith.mulf %71, %70 : vector<128x256xf32>
    %73 = arith.addf %31, %72 : vector<128x256xf32>
    %74 = vector.broadcast %62 : vector<128x1xf32> to vector<128x256xf32>
    %75 = vector.broadcast %30 : vector<1x256xf32> to vector<128x256xf32>
    %76 = arith.subf %74, %75 : vector<128x256xf32>
    %77 = math.absf %76 : vector<128x256xf32>
    %cst_28 = arith.constant 1.000000e+00 : f32
    %78 = vector.broadcast %cst_28 : f32 to vector<128x256xf32>
    %79 = arith.subf %78, %77 : vector<128x256xf32>
    %cst_29 = arith.constant 0.000000e+00 : f32
    %80 = vector.broadcast %cst_29 : f32 to vector<128x256xf32>
    %81 = arith.maximumf %79, %80 : vector<128x256xf32>
    %82 = vector.broadcast %54 : vector<128x1xf32> to vector<128x256xf32>
    %83 = arith.mulf %82, %81 : vector<128x256xf32>
    %84 = arith.addf %32, %83 : vector<128x256xf32>
    %cst_30 = arith.constant 7.500000e-01 : f32
    %85 = vector.broadcast %cst_30 : f32 to vector<128x1xf32>
    %86 = arith.addf %5, %85 : vector<128x1xf32>
    %87 = arith.mulf %86, %28 : vector<128x1xf32>
    %88 = arith.addf %14, %87 : vector<128x1xf32>
    %cst_31 = arith.constant 7.500000e-01 : f32
    %89 = vector.broadcast %cst_31 : f32 to vector<128x1xf32>
    %90 = arith.addf %6, %89 : vector<128x1xf32>
    %91 = arith.mulf %90, %21 : vector<128x1xf32>
    %92 = arith.addf %10, %91 : vector<128x1xf32>
    %cst_32 = arith.constant -1.000000e+00 : f32
    %93 = vector.broadcast %cst_32 : f32 to vector<128x1xf32>
    %94 = arith.cmpf oge, %88, %93 : vector<128x1xf32>
    %cst_33 = arith.constant 1.600000e+01 : f32
    %95 = vector.broadcast %cst_33 : f32 to vector<128x1xf32>
    %96 = arith.cmpf ole, %88, %95 : vector<128x1xf32>
    %97 = arith.andi %94, %96 : vector<128x1xi1>
    %98 = arith.extui %97 : vector<128x1xi1> to vector<128x1xi32>
    %99 = arith.sitofp %98 : vector<128x1xi32> to vector<128x1xf32>
    %cst_34 = arith.constant -1.000000e+00 : f32
    %100 = vector.broadcast %cst_34 : f32 to vector<128x1xf32>
    %101 = arith.cmpf oge, %92, %100 : vector<128x1xf32>
    %cst_35 = arith.constant 1.600000e+01 : f32
    %102 = vector.broadcast %cst_35 : f32 to vector<128x1xf32>
    %103 = arith.cmpf ole, %92, %102 : vector<128x1xf32>
    %104 = arith.andi %101, %103 : vector<128x1xi1>
    %105 = arith.extui %104 : vector<128x1xi1> to vector<128x1xi32>
    %106 = arith.sitofp %105 : vector<128x1xi32> to vector<128x1xf32>
    %cst_36 = arith.constant 0.000000e+00 : f32
    %cst_37 = arith.constant 1.500000e+01 : f32
    %107 = vector.broadcast %cst_36 : f32 to vector<128x1xf32>
    %108 = arith.maximumf %107, %88 : vector<128x1xf32>
    %109 = vector.broadcast %cst_37 : f32 to vector<128x1xf32>
    %110 = arith.minimumf %109, %108 : vector<128x1xf32>
    %cst_38 = arith.constant 0.000000e+00 : f32
    %cst_39 = arith.constant 1.500000e+01 : f32
    %111 = vector.broadcast %cst_38 : f32 to vector<128x1xf32>
    %112 = arith.maximumf %111, %92 : vector<128x1xf32>
    %113 = vector.broadcast %cst_39 : f32 to vector<128x1xf32>
    %114 = arith.minimumf %113, %112 : vector<128x1xf32>
    %115 = vector.broadcast %110 : vector<128x1xf32> to vector<128x256xf32>
    %116 = vector.broadcast %29 : vector<1x256xf32> to vector<128x256xf32>
    %117 = arith.subf %115, %116 : vector<128x256xf32>
    %118 = math.absf %117 : vector<128x256xf32>
    %cst_40 = arith.constant 1.000000e+00 : f32
    %119 = vector.broadcast %cst_40 : f32 to vector<128x256xf32>
    %120 = arith.subf %119, %118 : vector<128x256xf32>
    %cst_41 = arith.constant 0.000000e+00 : f32
    %121 = vector.broadcast %cst_41 : f32 to vector<128x256xf32>
    %122 = arith.maximumf %120, %121 : vector<128x256xf32>
    %123 = vector.broadcast %99 : vector<128x1xf32> to vector<128x256xf32>
    %124 = arith.mulf %123, %122 : vector<128x256xf32>
    %125 = arith.addf %73, %124 : vector<128x256xf32>
    %126 = vector.broadcast %114 : vector<128x1xf32> to vector<128x256xf32>
    %127 = vector.broadcast %30 : vector<1x256xf32> to vector<128x256xf32>
    %128 = arith.subf %126, %127 : vector<128x256xf32>
    %129 = math.absf %128 : vector<128x256xf32>
    %cst_42 = arith.constant 1.000000e+00 : f32
    %130 = vector.broadcast %cst_42 : f32 to vector<128x256xf32>
    %131 = arith.subf %130, %129 : vector<128x256xf32>
    %cst_43 = arith.constant 0.000000e+00 : f32
    %132 = vector.broadcast %cst_43 : f32 to vector<128x256xf32>
    %133 = arith.maximumf %131, %132 : vector<128x256xf32>
    %134 = vector.broadcast %106 : vector<128x1xf32> to vector<128x256xf32>
    %135 = arith.mulf %134, %133 : vector<128x256xf32>
    %136 = arith.addf %84, %135 : vector<128x256xf32>
    %137 = arith.mulf %125, %136 : vector<128x256xf32>
    %cst_44 = arith.constant 2.500000e-01 : f32
    %138 = vector.broadcast %cst_44 : f32 to vector<128x256xf32>
    %139 = arith.mulf %137, %138 : vector<128x256xf32>
    %c0_45 = arith.constant 0 : index
    %c0_46 = arith.constant 0 : index
    %c0_47 = arith.constant 0 : index
    %140 = vector.load %arg2[%c0_45, %c0_46, %c0_47] : memref<1x256x4xbf16, #tpu.memory_space<vmem>>, vector<1x256x4xbf16>
    %141 = vector.shape_cast %140 : vector<1x256x4xbf16> to vector<256x4xbf16>
    %142 = arith.truncf %139 : vector<128x256xf32> to vector<128x256xbf16>
    %cst_48 = arith.constant dense<0.000000e+00> : vector<128x4xf32>
    %143 = tpu.matmul %142, %141, %cst_48 {dimension_numbers = #tpu.dot_dimension_numbers<[1], [0], [0], [1], [0, 0, 1, 1], [], []>} : vector<128x256xbf16>, vector<256x4xbf16>, vector<128x4xf32> -> vector<128x4xf32>
    %144 = vector.extract_strided_slice %143 {offsets = [0, 0], sizes = [8, 4], strides = [1, 1]} : vector<128x4xf32> to vector<8x4xf32>
    %c0_49 = arith.constant 0 : index
    %c0_50 = arith.constant 0 : index
    %145 = vector.load %arg18[%c0_49, %c0_50] : memref<8x64xf32, #tpu.memory_space<vmem>>, vector<8x4xf32>
    tpu.vector_store %arg18[%c0_49, %c0_50], %144 {strides = array<i32>} : memref<8x64xf32, #tpu.memory_space<vmem>>, vector<8x4xf32>,
    %146 = vector.extract_strided_slice %143 {offsets = [8, 0], sizes = [8, 4], strides = [1, 1]} : vector<128x4xf32> to vector<8x4xf32>
    %c0_51 = arith.constant 0 : index
    %c4 = arith.constant 4 : index
    %147 = vector.load %arg18[%c0_51, %c4] : memref<8x64xf32, #tpu.memory_space<vmem>>, vector<8x4xf32>
    tpu.vector_store %arg18[%c0_51, %c4], %146 {strides = array<i32>} : memref<8x64xf32, #tpu.memory_space<vmem>>, vector<8x4xf32>,
    %148 = vector.extract_strided_slice %143 {offsets = [16, 0], sizes = [8, 4], strides = [1, 1]} : vector<128x4xf32> to vector<8x4xf32>
    %c0_52 = arith.constant 0 : index
    %c8 = arith.constant 8 : index
    %149 = vector.load %arg18[%c0_52, %c8] : memref<8x64xf32, #tpu.memory_space<vmem>>, vector<8x4xf32>
    tpu.vector_store %arg18[%c0_52, %c8], %148 {strides = array<i32>} : memref<8x64xf32, #tpu.memory_space<vmem>>, vector<8x4xf32>,
    %150 = vector.extract_strided_slice %143 {offsets = [24, 0], sizes = [8, 4], strides = [1, 1]} : vector<128x4xf32> to vector<8x4xf32>
    %c0_53 = arith.constant 0 : index
    %c12 = arith.constant 12 : index
    %151 = vector.load %arg18[%c0_53, %c12] : memref<8x64xf32, #tpu.memory_space<vmem>>, vector<8x4xf32>
    tpu.vector_store %arg18[%c0_53, %c12], %150 {strides = array<i32>} : memref<8x64xf32, #tpu.memory_space<vmem>>, vector<8x4xf32>,
    %152 = vector.extract_strided_slice %143 {offsets = [32, 0], sizes = [8, 4], strides = [1, 1]} : vector<128x4xf32> to vector<8x4xf32>
    %c0_54 = arith.constant 0 : index
    %c16 = arith.constant 16 : index
    %153 = vector.load %arg18[%c0_54, %c16] : memref<8x64xf32, #tpu.memory_space<vmem>>, vector<8x4xf32>
    tpu.vector_store %arg18[%c0_54, %c16], %152 {strides = array<i32>} : memref<8x64xf32, #tpu.memory_space<vmem>>, vector<8x4xf32>,
    %154 = vector.extract_strided_slice %143 {offsets = [40, 0], sizes = [8, 4], strides = [1, 1]} : vector<128x4xf32> to vector<8x4xf32>
    %c0_55 = arith.constant 0 : index
    %c20 = arith.constant 20 : index
    %155 = vector.load %arg18[%c0_55, %c20] : memref<8x64xf32, #tpu.memory_space<vmem>>, vector<8x4xf32>
    tpu.vector_store %arg18[%c0_55, %c20], %154 {strides = array<i32>} : memref<8x64xf32, #tpu.memory_space<vmem>>, vector<8x4xf32>,
    %156 = vector.extract_strided_slice %143 {offsets = [48, 0], sizes = [8, 4], strides = [1, 1]} : vector<128x4xf32> to vector<8x4xf32>
    %c0_56 = arith.constant 0 : index
    %c24 = arith.constant 24 : index
    %157 = vector.load %arg18[%c0_56, %c24] : memref<8x64xf32, #tpu.memory_space<vmem>>, vector<8x4xf32>
    tpu.vector_store %arg18[%c0_56, %c24], %156 {strides = array<i32>} : memref<8x64xf32, #tpu.memory_space<vmem>>, vector<8x4xf32>,
    %158 = vector.extract_strided_slice %143 {offsets = [56, 0], sizes = [8, 4], strides = [1, 1]} : vector<128x4xf32> to vector<8x4xf32>
    %c0_57 = arith.constant 0 : index
    %c28 = arith.constant 28 : index
    %159 = vector.load %arg18[%c0_57, %c28] : memref<8x64xf32, #tpu.memory_space<vmem>>, vector<8x4xf32>
    tpu.vector_store %arg18[%c0_57, %c28], %158 {strides = array<i32>} : memref<8x64xf32, #tpu.memory_space<vmem>>, vector<8x4xf32>,
    %160 = vector.extract_strided_slice %143 {offsets = [64, 0], sizes = [8, 4], strides = [1, 1]} : vector<128x4xf32> to vector<8x4xf32>
    %c0_58 = arith.constant 0 : index
    %c32 = arith.constant 32 : index
    %161 = vector.load %arg18[%c0_58, %c32] : memref<8x64xf32, #tpu.memory_space<vmem>>, vector<8x4xf32>
    tpu.vector_store %arg18[%c0_58, %c32], %160 {strides = array<i32>} : memref<8x64xf32, #tpu.memory_space<vmem>>, vector<8x4xf32>,
    %162 = vector.extract_strided_slice %143 {offsets = [72, 0], sizes = [8, 4], strides = [1, 1]} : vector<128x4xf32> to vector<8x4xf32>
    %c0_59 = arith.constant 0 : index
    %c36 = arith.constant 36 : index
    %163 = vector.load %arg18[%c0_59, %c36] : memref<8x64xf32, #tpu.memory_space<vmem>>, vector<8x4xf32>
    tpu.vector_store %arg18[%c0_59, %c36], %162 {strides = array<i32>} : memref<8x64xf32, #tpu.memory_space<vmem>>, vector<8x4xf32>,
    %164 = vector.extract_strided_slice %143 {offsets = [80, 0], sizes = [8, 4], strides = [1, 1]} : vector<128x4xf32> to vector<8x4xf32>
    %c0_60 = arith.constant 0 : index
    %c40 = arith.constant 40 : index
    %165 = vector.load %arg18[%c0_60, %c40] : memref<8x64xf32, #tpu.memory_space<vmem>>, vector<8x4xf32>
    tpu.vector_store %arg18[%c0_60, %c40], %164 {strides = array<i32>} : memref<8x64xf32, #tpu.memory_space<vmem>>, vector<8x4xf32>,
    %166 = vector.extract_strided_slice %143 {offsets = [88, 0], sizes = [8, 4], strides = [1, 1]} : vector<128x4xf32> to vector<8x4xf32>
    %c0_61 = arith.constant 0 : index
    %c44 = arith.constant 44 : index
    %167 = vector.load %arg18[%c0_61, %c44] : memref<8x64xf32, #tpu.memory_space<vmem>>, vector<8x4xf32>
    tpu.vector_store %arg18[%c0_61, %c44], %166 {strides = array<i32>} : memref<8x64xf32, #tpu.memory_space<vmem>>, vector<8x4xf32>,
    %168 = vector.extract_strided_slice %143 {offsets = [96, 0], sizes = [8, 4], strides = [1, 1]} : vector<128x4xf32> to vector<8x4xf32>
    %c0_62 = arith.constant 0 : index
    %c48 = arith.constant 48 : index
    %169 = vector.load %arg18[%c0_62, %c48] : memref<8x64xf32, #tpu.memory_space<vmem>>, vector<8x4xf32>
    tpu.vector_store %arg18[%c0_62, %c48], %168 {strides = array<i32>} : memref<8x64xf32, #tpu.memory_space<vmem>>, vector<8x4xf32>,
    %170 = vector.extract_strided_slice %143 {offsets = [104, 0], sizes = [8, 4], strides = [1, 1]} : vector<128x4xf32> to vector<8x4xf32>
    %c0_63 = arith.constant 0 : index
    %c52 = arith.constant 52 : index
    %171 = vector.load %arg18[%c0_63, %c52] : memref<8x64xf32, #tpu.memory_space<vmem>>, vector<8x4xf32>
    tpu.vector_store %arg18[%c0_63, %c52], %170 {strides = array<i32>} : memref<8x64xf32, #tpu.memory_space<vmem>>, vector<8x4xf32>,
    %172 = vector.extract_strided_slice %143 {offsets = [112, 0], sizes = [8, 4], strides = [1, 1]} : vector<128x4xf32> to vector<8x4xf32>
    %c0_64 = arith.constant 0 : index
    %c56 = arith.constant 56 : index
    %173 = vector.load %arg18[%c0_64, %c56] : memref<8x64xf32, #tpu.memory_space<vmem>>, vector<8x4xf32>
    tpu.vector_store %arg18[%c0_64, %c56], %172 {strides = array<i32>} : memref<8x64xf32, #tpu.memory_space<vmem>>, vector<8x4xf32>,
    %174 = vector.extract_strided_slice %143 {offsets = [120, 0], sizes = [8, 4], strides = [1, 1]} : vector<128x4xf32> to vector<8x4xf32>
    %c0_65 = arith.constant 0 : index
    %c60 = arith.constant 60 : index
    %175 = vector.load %arg18[%c0_65, %c60] : memref<8x64xf32, #tpu.memory_space<vmem>>, vector<8x4xf32>
    tpu.vector_store %arg18[%c0_65, %c60], %174 {strides = array<i32>} : memref<8x64xf32, #tpu.memory_space<vmem>>, vector<8x4xf32>,
    %c0_66 = arith.constant 0 : index
    %c0_67 = arith.constant 0 : index
    %176 = vector.load %arg18[%c0_66, %c0_67] : memref<8x64xf32, #tpu.memory_space<vmem>>, vector<8x64xf32>
    %177 = arith.truncf %176 : vector<8x64xf32> to vector<8x64xbf16>
    %c0_68 = arith.constant 0 : index
    %c0_69 = arith.constant 0 : index
    %178 = vector.load %arg7[%c0_68, %c0_69] : memref<64x128xbf16, #tpu.memory_space<vmem>>, vector<64x128xbf16>
    %cst_70 = arith.constant dense<0.000000e+00> : vector<8x128xf32>
    %179 = tpu.matmul %177, %178, %cst_70 {dimension_numbers = #tpu.dot_dimension_numbers<[1], [0], [0], [1], [0, 0, 1, 1], [], []>} : vector<8x64xbf16>, vector<64x128xbf16>, vector<8x128xf32> -> vector<8x128xf32>
    %c0_71 = arith.constant 0 : index
    %c0_72 = arith.constant 0 : index
    %180 = vector.load %arg8[%c0_71, %c0_72] : memref<1x128xf32, #tpu.memory_space<vmem>>, vector<1x128xf32>
    %181 = vector.broadcast %180 : vector<1x128xf32> to vector<8x128xf32>
    %182 = arith.addf %179, %181 : vector<8x128xf32>
    %cst_73 = arith.constant 0.000000e+00 : f32
    %183 = vector.broadcast %cst_73 : f32 to vector<8x128xf32>
    %184 = arith.maximumf %182, %183 : vector<8x128xf32>
    %c0_74 = arith.constant 0 : index
    %c0_75 = arith.constant 0 : index
    %185 = vector.load %arg9[%c0_74, %c0_75] : memref<128x128xf32, #tpu.memory_space<vmem>>, vector<128x128xf32>
    %cst_76 = arith.constant dense<0.000000e+00> : vector<8x128xf32>
    %186 = tpu.matmul %184, %185, %cst_76 {dimension_numbers = #tpu.dot_dimension_numbers<[1], [0], [0], [1], [0, 0, 1, 1], [], []>} : vector<8x128xf32>, vector<128x128xf32>, vector<8x128xf32> -> vector<8x128xf32>
    %c0_77 = arith.constant 0 : index
    %c0_78 = arith.constant 0 : index
    %187 = vector.load %arg10[%c0_77, %c0_78] : memref<1x128xf32, #tpu.memory_space<vmem>>, vector<1x128xf32>
    %188 = vector.broadcast %187 : vector<1x128xf32> to vector<8x128xf32>
    %189 = arith.addf %186, %188 : vector<8x128xf32>
    %c0_79 = arith.constant 0 : index
    %c0_80 = arith.constant 0 : index
    %190 = vector.load %arg6[%c0_79, %c0_80] : memref<8x4xf32, #tpu.memory_space<vmem>>, vector<8x4xf32>
    %c0_81 = arith.constant 0 : index
    %c0_82 = arith.constant 0 : index
    %191 = vector.load %arg12[%c0_81, %c0_82] : memref<1x128xf32, #tpu.memory_space<vmem>>, vector<1x128xf32>
    %192 = vector.extract_strided_slice %190 {offsets = [0, 0], sizes = [8, 1], strides = [1, 1]} : vector<8x4xf32> to vector<8x1xf32>
    %cst_83 = arith.constant 1.562500e-02 : f32
    %193 = vector.broadcast %cst_83 : f32 to vector<8x1xf32>
    %194 = arith.mulf %192, %193 : vector<8x1xf32>
    %c0_84 = arith.constant 0 : index
    %c0_85 = arith.constant 0 : index
    %195 = vector.load %arg11[%c0_84, %c0_85] : memref<4x128xf32, #tpu.memory_space<vmem>>, vector<1x128xf32>
    %196 = vector.broadcast %194 : vector<8x1xf32> to vector<8x128xf32>
    %197 = vector.broadcast %195 : vector<1x128xf32> to vector<8x128xf32>
    %198 = arith.mulf %196, %197 : vector<8x128xf32>
    %199 = vector.broadcast %191 : vector<1x128xf32> to vector<8x128xf32>
    %200 = arith.addf %199, %198 : vector<8x128xf32>
    %201 = vector.extract_strided_slice %190 {offsets = [0, 1], sizes = [8, 1], strides = [1, 1]} : vector<8x4xf32> to vector<8x1xf32>
    %cst_86 = arith.constant 1.562500e-02 : f32
    %202 = vector.broadcast %cst_86 : f32 to vector<8x1xf32>
    %203 = arith.mulf %201, %202 : vector<8x1xf32>
    %c1 = arith.constant 1 : index
    %c0_87 = arith.constant 0 : index
    %204 = vector.load %arg11[%c1, %c0_87] : memref<4x128xf32, #tpu.memory_space<vmem>>, vector<1x128xf32>
    %205 = vector.broadcast %203 : vector<8x1xf32> to vector<8x128xf32>
    %206 = vector.broadcast %204 : vector<1x128xf32> to vector<8x128xf32>
    %207 = arith.mulf %205, %206 : vector<8x128xf32>
    %208 = arith.addf %200, %207 : vector<8x128xf32>
    %209 = vector.extract_strided_slice %190 {offsets = [0, 2], sizes = [8, 1], strides = [1, 1]} : vector<8x4xf32> to vector<8x1xf32>
    %cst_88 = arith.constant 1.562500e-02 : f32
    %210 = vector.broadcast %cst_88 : f32 to vector<8x1xf32>
    %211 = arith.mulf %209, %210 : vector<8x1xf32>
    %c2 = arith.constant 2 : index
    %c0_89 = arith.constant 0 : index
    %212 = vector.load %arg11[%c2, %c0_89] : memref<4x128xf32, #tpu.memory_space<vmem>>, vector<1x128xf32>
    %213 = vector.broadcast %211 : vector<8x1xf32> to vector<8x128xf32>
    %214 = vector.broadcast %212 : vector<1x128xf32> to vector<8x128xf32>
    %215 = arith.mulf %213, %214 : vector<8x128xf32>
    %216 = arith.addf %208, %215 : vector<8x128xf32>
    %217 = vector.extract_strided_slice %190 {offsets = [0, 3], sizes = [8, 1], strides = [1, 1]} : vector<8x4xf32> to vector<8x1xf32>
    %cst_90 = arith.constant 1.562500e-02 : f32
    %218 = vector.broadcast %cst_90 : f32 to vector<8x1xf32>
    %219 = arith.mulf %217, %218 : vector<8x1xf32>
    %c3 = arith.constant 3 : index
    %c0_91 = arith.constant 0 : index
    %220 = vector.load %arg11[%c3, %c0_91] : memref<4x128xf32, #tpu.memory_space<vmem>>, vector<1x128xf32>
    %221 = vector.broadcast %219 : vector<8x1xf32> to vector<8x128xf32>
    %222 = vector.broadcast %220 : vector<1x128xf32> to vector<8x128xf32>
    %223 = arith.mulf %221, %222 : vector<8x128xf32>
    %224 = arith.addf %216, %223 : vector<8x128xf32>
    %c0_92 = arith.constant 0 : index
    %c0_93 = arith.constant 0 : index
    %225 = vector.load %arg13[%c0_92, %c0_93] : memref<1x128xf32, #tpu.memory_space<vmem>>, vector<1x128xf32>
    %c0_94 = arith.constant 0 : index
    %c0_95 = arith.constant 0 : index
    %226 = vector.load %arg14[%c0_94, %c0_95] : memref<1x128xf32, #tpu.memory_space<vmem>>, vector<1x128xf32>
    %cst_96 = arith.constant dense<0.000000e+00> : vector<8xf32>
    %227 = vector.multi_reduction <add>, %224, %cst_96 [1] : vector<8x128xf32> to vector<8xf32>
    %228 = vector.shape_cast %227 : vector<8xf32> to vector<8x1xf32>
    %cst_97 = arith.constant 1.280000e+02 : f32
    %229 = vector.broadcast %cst_97 : f32 to vector<8x1xf32>
    %230 = arith.divf %228, %229 : vector<8x1xf32>
    %231 = vector.broadcast %230 : vector<8x1xf32> to vector<8x128xf32>
    %232 = arith.subf %224, %231 : vector<8x128xf32>
    %233 = arith.mulf %232, %232 : vector<8x128xf32>
    %cst_98 = arith.constant dense<0.000000e+00> : vector<8xf32>
    %234 = vector.multi_reduction <add>, %233, %cst_98 [1] : vector<8x128xf32> to vector<8xf32>
    %235 = vector.shape_cast %234 : vector<8xf32> to vector<8x1xf32>
    %cst_99 = arith.constant 1.280000e+02 : f32
    %236 = vector.broadcast %cst_99 : f32 to vector<8x1xf32>
    %237 = arith.divf %235, %236 : vector<8x1xf32>
    %238 = vector.broadcast %230 : vector<8x1xf32> to vector<8x128xf32>
    %239 = arith.subf %224, %238 : vector<8x128xf32>
    %cst_100 = arith.constant 9.99999974E-6 : f32
    %240 = vector.broadcast %cst_100 : f32 to vector<8x1xf32>
    %241 = arith.addf %237, %240 : vector<8x1xf32>
    %242 = math.rsqrt %241 : vector<8x1xf32>
    %243 = vector.broadcast %242 : vector<8x1xf32> to vector<8x128xf32>
    %244 = arith.mulf %239, %243 : vector<8x128xf32>
    %245 = vector.broadcast %225 : vector<1x128xf32> to vector<8x128xf32>
    %246 = arith.mulf %244, %245 : vector<8x128xf32>
    %247 = vector.broadcast %226 : vector<1x128xf32> to vector<8x128xf32>
    %248 = arith.addf %246, %247 : vector<8x128xf32>
    %249 = arith.addf %189, %248 : vector<8x128xf32>
    %c0_101 = arith.constant 0 : index
    %c0_102 = arith.constant 0 : index
    %250 = vector.load %arg15[%c0_101, %c0_102] : memref<1x128xf32, #tpu.memory_space<vmem>>, vector<1x128xf32>
    %c0_103 = arith.constant 0 : index
    %c0_104 = arith.constant 0 : index
    %251 = vector.load %arg16[%c0_103, %c0_104] : memref<1x128xf32, #tpu.memory_space<vmem>>, vector<1x128xf32>
    %cst_105 = arith.constant dense<0.000000e+00> : vector<8xf32>
    %252 = vector.multi_reduction <add>, %249, %cst_105 [1] : vector<8x128xf32> to vector<8xf32>
    %253 = vector.shape_cast %252 : vector<8xf32> to vector<8x1xf32>
    %cst_106 = arith.constant 1.280000e+02 : f32
    %254 = vector.broadcast %cst_106 : f32 to vector<8x1xf32>
    %255 = arith.divf %253, %254 : vector<8x1xf32>
    %256 = vector.broadcast %255 : vector<8x1xf32> to vector<8x128xf32>
    %257 = arith.subf %249, %256 : vector<8x128xf32>
    %258 = arith.mulf %257, %257 : vector<8x128xf32>
    %cst_107 = arith.constant dense<0.000000e+00> : vector<8xf32>
    %259 = vector.multi_reduction <add>, %258, %cst_107 [1] : vector<8x128xf32> to vector<8xf32>
    %260 = vector.shape_cast %259 : vector<8xf32> to vector<8x1xf32>
    %cst_108 = arith.constant 1.280000e+02 : f32
    %261 = vector.broadcast %cst_108 : f32 to vector<8x1xf32>
    %262 = arith.divf %260, %261 : vector<8x1xf32>
    %263 = vector.broadcast %255 : vector<8x1xf32> to vector<8x128xf32>
    %264 = arith.subf %249, %263 : vector<8x128xf32>
    %cst_109 = arith.constant 9.99999974E-6 : f32
    %265 = vector.broadcast %cst_109 : f32 to vector<8x1xf32>
    %266 = arith.addf %262, %265 : vector<8x1xf32>
    %267 = math.rsqrt %266 : vector<8x1xf32>
    %268 = vector.broadcast %267 : vector<8x1xf32> to vector<8x128xf32>
    %269 = arith.mulf %264, %268 : vector<8x128xf32>
    %270 = vector.broadcast %250 : vector<1x128xf32> to vector<8x128xf32>
    %271 = arith.mulf %269, %270 : vector<8x128xf32>
    %272 = vector.broadcast %251 : vector<1x128xf32> to vector<8x128xf32>
    %273 = arith.addf %271, %272 : vector<8x128xf32>
    %c0_110 = arith.constant 0 : index
    %c0_111 = arith.constant 0 : index
    %274 = vector.load %arg17[%c0_110, %c0_111] : memref<8x128xf32, #tpu.memory_space<vmem>>, vector<8x128xf32>
    tpu.vector_store %arg17[%c0_110, %c0_111], %273 {strides = array<i32>} : memref<8x128xf32, #tpu.memory_space<vmem>>, vector<8x128xf32>,
    return
  }
  func.func @transform_0(%arg0: i32, %arg1: memref<2xi32, #tpu.memory_space<smem>>) -> (i32, i32, i32) {
    %0 = arith.index_cast %arg0 : i32 to index
    %1 = memref.load %arg1[%0] : memref<2xi32, #tpu.memory_space<smem>>
    %c0_i32 = arith.constant 0 : i32
    %c0_i32_0 = arith.constant 0 : i32
    %c0_i32_1 = arith.constant 0 : i32
    return %1, %c0_i32, %c0_i32_0 : i32, i32, i32
  }
  func.func @transform_1(%arg0: i32, %arg1: memref<2xi32, #tpu.memory_space<smem>>) -> (i32, i32) {
    %c0_i32 = arith.constant 0 : i32
    %c0_i32_0 = arith.constant 0 : i32
    %c0_i32_1 = arith.constant 0 : i32
    return %c0_i32, %c0_i32_0 : i32, i32
  }
  func.func @transform_2(%arg0: i32, %arg1: memref<2xi32, #tpu.memory_space<smem>>) -> (i32, i32) {
    %c0_i32 = arith.constant 0 : i32
    %c0_i32_0 = arith.constant 0 : i32
    %c0_i32_1 = arith.constant 0 : i32
    return %c0_i32, %c0_i32_0 : i32, i32
  }
  func.func @transform_3(%arg0: i32, %arg1: memref<2xi32, #tpu.memory_space<smem>>) -> (i32, i32) {
    %c0_i32 = arith.constant 0 : i32
    %c0_i32_0 = arith.constant 0 : i32
    return %arg0, %c0_i32 : i32, i32
  }
  func.func @transform_4(%arg0: i32, %arg1: memref<2xi32, #tpu.memory_space<smem>>) -> (i32, i32) {
    %c0_i32 = arith.constant 0 : i32
    %c0_i32_0 = arith.constant 0 : i32
    return %arg0, %c0_i32 : i32, i32
  }
  func.func @transform_5(%arg0: i32, %arg1: memref<2xi32, #tpu.memory_space<smem>>) -> (i32, i32) {
    %c0_i32 = arith.constant 0 : i32
    %c0_i32_0 = arith.constant 0 : i32
    %c0_i32_1 = arith.constant 0 : i32
    return %c0_i32, %c0_i32_0 : i32, i32
  }
  func.func @transform_6(%arg0: i32, %arg1: memref<2xi32, #tpu.memory_space<smem>>) -> (i32, i32) {
    %c0_i32 = arith.constant 0 : i32
    %c0_i32_0 = arith.constant 0 : i32
    %c0_i32_1 = arith.constant 0 : i32
    return %c0_i32, %c0_i32_0 : i32, i32
  }
  func.func @transform_7(%arg0: i32, %arg1: memref<2xi32, #tpu.memory_space<smem>>) -> (i32, i32) {
    %c0_i32 = arith.constant 0 : i32
    %c0_i32_0 = arith.constant 0 : i32
    %c0_i32_1 = arith.constant 0 : i32
    return %c0_i32, %c0_i32_0 : i32, i32
  }
  func.func @transform_8(%arg0: i32, %arg1: memref<2xi32, #tpu.memory_space<smem>>) -> (i32, i32) {
    %c0_i32 = arith.constant 0 : i32
    %c0_i32_0 = arith.constant 0 : i32
    %c0_i32_1 = arith.constant 0 : i32
    return %c0_i32, %c0_i32_0 : i32, i32
  }
  func.func @transform_9(%arg0: i32, %arg1: memref<2xi32, #tpu.memory_space<smem>>) -> (i32, i32) {
    %c0_i32 = arith.constant 0 : i32
    %c0_i32_0 = arith.constant 0 : i32
    %c0_i32_1 = arith.constant 0 : i32
    return %c0_i32, %c0_i32_0 : i32, i32
  }
  func.func @transform_10(%arg0: i32, %arg1: memref<2xi32, #tpu.memory_space<smem>>) -> (i32, i32) {
    %c0_i32 = arith.constant 0 : i32
    %c0_i32_0 = arith.constant 0 : i32
    %c0_i32_1 = arith.constant 0 : i32
    return %c0_i32, %c0_i32_0 : i32, i32
  }
  func.func @transform_11(%arg0: i32, %arg1: memref<2xi32, #tpu.memory_space<smem>>) -> (i32, i32) {
    %c0_i32 = arith.constant 0 : i32
    %c0_i32_0 = arith.constant 0 : i32
    %c0_i32_1 = arith.constant 0 : i32
    return %c0_i32, %c0_i32_0 : i32, i32
  }
  func.func @transform_12(%arg0: i32, %arg1: memref<2xi32, #tpu.memory_space<smem>>) -> (i32, i32) {
    %c0_i32 = arith.constant 0 : i32
    %c0_i32_0 = arith.constant 0 : i32
    %c0_i32_1 = arith.constant 0 : i32
    return %c0_i32, %c0_i32_0 : i32, i32
  }
  func.func @transform_13(%arg0: i32, %arg1: memref<2xi32, #tpu.memory_space<smem>>) -> (i32, i32) {
    %c0_i32 = arith.constant 0 : i32
    %c0_i32_0 = arith.constant 0 : i32
    %c0_i32_1 = arith.constant 0 : i32
    return %c0_i32, %c0_i32_0 : i32, i32
  }
  func.func @transform_14(%arg0: i32, %arg1: memref<2xi32, #tpu.memory_space<smem>>) -> (i32, i32) {
    %c0_i32 = arith.constant 0 : i32
    %c0_i32_0 = arith.constant 0 : i32
    %c0_i32_1 = arith.constant 0 : i32
    return %c0_i32, %c0_i32_0 : i32, i32
  }
  func.func @transform_15(%arg0: i32, %arg1: memref<2xi32, #tpu.memory_space<smem>>) -> (i32, i32) {
    %c0_i32 = arith.constant 0 : i32
    %c0_i32_0 = arith.constant 0 : i32
    return %arg0, %c0_i32 : i32, i32
  }
}

</mosaic_0001>

<bundles_post_ra>
// kernel: tpu_custom_call.1
= control target key start
LH: loop header
LB: loop body
LE: loop exit
PB: predicated region body
PF: predicated region fallthrough
CT: control target
= control target key end

     0   :  { %s8195_s0 = inlined_call_operand.hbm [shape: s32[2], index: 0, kind: input, shape index: {}]   ;;  %s8196_s1 = inlined_call_operand.hbm [shape: bf16[2,256,4], index: 1, kind: input, shape index: {}]   ;;  %s8197_s2 = inlined_call_operand.hbm [shape: f32[1,256], index: 2, kind: input, shape index: {}]   ;;  %s8198_s3 = inlined_call_operand.hbm [shape: f32[1,256], index: 3, kind: input, shape index: {}]   ;;  %s8199_s4 = inlined_call_operand.hbm [shape: f32[256,8], index: 4, kind: input, shape index: {}]   ;;  %s8200_s5 = inlined_call_operand.hbm [shape: f32[16,4], index: 5, kind: input, shape index: {}]   ;;  %s8201_s6 = inlined_call_operand.hbm [shape: bf16[64,128], index: 6, kind: input, shape index: {}]   ;;  %s8202_s7 = inlined_call_operand.hbm [shape: f32[1,128], index: 7, kind: input, shape index: {}]   ;;  %s8203_s8 = inlined_call_operand.hbm [shape: f32[128,128], index: 8, kind: input, shape index: {}]   ;;  %s8204_s9 = inlined_call_operand.hbm [shape: f32[1,128], index: 9, kind: input, shape index: {}]   ;;  %s8205_s10 = inlined_call_operand.hbm [shape: f32[4,128], index: 10, kind: input, shape index: {}]   ;;  %s8206_s11 = inlined_call_operand.hbm [shape: f32[1,128], index: 11, kind: input, shape index: {}]   ;;  %s8207_s12 = inlined_call_operand.hbm [shape: f32[1,128], index: 12, kind: input, shape index: {}]   ;;  %s8208_s13 = inlined_call_operand.hbm [shape: f32[1,128], index: 13, kind: input, shape index: {}]   ;;  %s8209_s14 = inlined_call_operand.hbm [shape: f32[1,128], index: 14, kind: input, shape index: {}]   ;;  %s8210_s15 = inlined_call_operand.hbm [shape: f32[1,128], index: 15, kind: input, shape index: {}]   ;;  %s8211_s16 = inlined_call_operand.hbm [shape: f32[16,128], index: 16, kind: output, shape index: {}]  }
   0x1   :  { %8278 = sst [smem:[#allocation76_spill]] %s8195_s0 }
   0x2   :  { %8279 = sst [smem:[#allocation77_spill]] %s8196_s1  ;;  %s8295_s23 = sld [smem:[#allocation76_spill]] }
   0x3   :  { %8280 = sst [smem:[#allocation78_spill]] %s8197_s2 }
   0x4   :  { %8281 = sst [smem:[#allocation79_spill]] %s8198_s3 }
   0x5   :  { %8282 = sst [smem:[#allocation80_spill]] %s8199_s4 }
   0x6   :  { %8283 = sst [smem:[#allocation81_spill]] %s8200_s5 }
   0x7   :  { %8284 = sst [smem:[#allocation82_spill]] %s8201_s6 }
   0x8   :  { %8285 = sst [smem:[#allocation83_spill]] %s8202_s7  ;;  %s5030_s1 = scalar_lea.hbm %s8295_s23, 16 }
   0x9   :  { %8286 = sst [smem:[#allocation84_spill]] %s8203_s8  ;;  %p5031_p0 = scmp.ne.s32.totalorder %s8295_s23, %s5030_s1 }
   0xa   :  { %8287 = sst [smem:[#allocation85_spill]] %s8204_s9  ;;  %p5034_p1 = scmp.lt.u32.totalorder %s5030_s1, %s8295_s23 }
   0xb   :  { %8288 = sst [smem:[#allocation86_spill]] %s8205_s10 }
   0xc   :  { %8289 = sst [smem:[#allocation87_spill]] %s8206_s11  ;;  %p5036_p2 = pnand %p5034_p1, %p5031_p0 }
   0xd   :  { %8290 = sst [smem:[#allocation88_spill]] %s8207_s12 }
   0xe   :  { %8291 = sst [smem:[#allocation89_spill]] %s8208_s13 }
   0xf   :  { %8292 = sst [smem:[#allocation90_spill]] %s8209_s14 }
  0x10   :  { %8293 = sst [smem:[#allocation91_spill]] %s8210_s15 }
  0x11   :  { %8294 = sst [smem:[#allocation92_spill]] %s8211_s16 }
  0x12   :  { %5039 = shalt.err (!%p5036_p2)  }
  0x13   :  { %s5588_s28 = smov [#allocation4]  }
  0x14   :  { %22 = dma.hbm_to_smem %s8295_s23, 16, %s5588_s28, [#allocation3] }
  0x15   :  { %5522 = dma.done.wait [#allocation3], 16 }
  0x16   :  { %5523 = vsyncadd [#allocation3], 4294967280 }
  0x17   :  { %24 = sfence }
  0x18   :  { %25 = vsyncpa [#allocation6], 0 }
  0x19   :  { %27 = vsyncpa [#allocation6 + $0x1], 0 }
  0x1a   :  { %28 = vsyncpa [#allocation9], 0 }
  0x1b   :  { %29 = vsyncpa [#allocation12], 0 }
  0x1c   :  { %31 = vsyncpa [#allocation12 + $0x1], 0 }
  0x1d   :  { %32 = vsyncpa [#allocation15], 0 }
  0x1e   :  { %33 = vsyncpa [#allocation18], 0 }
  0x1f   :  { %34 = vsyncpa [#allocation21], 0 }
  0x20   :  { %35 = vsyncpa [#allocation24], 0 }
  0x21   :  { %36 = vsyncpa [#allocation27], 0 }
  0x22   :  { %37 = vsyncpa [#allocation7], 0 }
  0x23   :  { %39 = vsyncpa [#allocation7 + $0x1], 0  ;;  %s5733_s1 = smov 0   ;;  %s5735_s0 = smov 0  }
  0x24   :  { %s5737_s17 = smov 0   ;;  %s5739_s18 = smov 0  }
  0x25   :  { %s5741_s19 = smov 0   ;;  %s5743_s20 = smov 0  }
  0x26   :  { %s5745_s21 = smov 0  }
  0x27 LB: > { %8296 = sst [smem:[#allocation42_spill]] %s5574_s18  ;;  %s5589_s22 = smov [#allocation8]   ;;  %s5586_s21 = sphi %s5745_s21, %s8523_s21   ;;  %s5582_s20 = sphi %s5743_s20, %s8532_s20   ;;  %s5578_s19 = sphi %s5741_s19, %s8531_s19   ;;  %s5574_s18 = sphi %s5739_s18, %s8525_s18   ;;  %s5570_s17 = sphi %s5737_s17, %s8530_s17   ;;  %s5566_s0 = sphi %s5735_s0, %s8529_s0   ;;  %s5562_s1 = sphi %s5733_s1, %s8528_s1  }
  0x28   : > { %8297 = sst [smem:[#allocation43_spill]] %s5578_s19  ;;  %s421_s23 = sshll.u32 %s5589_s22, 4  ;;  %s422_s23 = int_to_ptr.vmem [resolvable:$true] %s421_s23 }
  0x29   : > { %8298 = sst [smem:[#allocation44_spill]] %s5582_s20  ;;  %s5769_s24 = sadd.s32 4294967295, %s5586_s21  }
  0x2a   : > { %p4233_p3 = scmp.ge.s32.totalorder %s5586_s21, 1  ;;  %p8218_p4 = scmp.eq.s32.totalorder %s5769_s24, 0 }
  0x2b   : > { %p408_p5 = scmp.lt.s32.totalorder %s5586_s21, 3  ;;  %s5590_s26 = smov [#allocation14]  }
  0x2c   : > { %s442_s27 = sshll.u32 %s5590_s26, 4  ;;  %s5591_s29 = smov [#allocation17]   ;;  %s5781_s27 = int_to_ptr.vmem [resolvable:$true] %s442_s27 }
  0x2d   : > { %p5774_p6 = pnand %p4233_p3, %p408_p5  ;;  %s466_s30 = sshll.u32 %s5591_s29, 4  ;;  %s5789_s30 = int_to_ptr.vmem [resolvable:$true] %s466_s30 }
  0x2e   : > { %s8302_s2 = sld [smem:[#allocation78_spill]] }
  0x2f   : > { %s8299_s25 = scalar_select %p5774_p6, 1, 0 }
  0x30   : > { %p4605_p8 = pneg %p5774_p6 }
  0x31   : > { %8300 = sst [smem:[#allocation45_spill]] %s8299_s25 }
  0x32   : > { %p5785_p9 = pnand %p4605_p8, %p8218_p4 }
  0x34   : > { %s8301_s28 = scalar_select %p5785_p9, 1, 0 }
  0x35   : > { %s5040_s5 = scalar_lea.hbm %s8302_s2, 32  ;;  %p5799_p11 = pneg %p5785_p9 }
  0x36   : > { %p5041_p10 = scmp.ne.s32.totalorder %s8302_s2, %s5040_s5  ;;  %p5047_p0 = scmp.lt.u32.totalorder %s5040_s5, %s8302_s2 }
  0x38   : > { %p5043_p12 = pnand %p5799_p11, %p5041_p10 }
  0x3a   : > { %p5044_p13 = pneg %p5043_p12 }
  0x3c   : > { %p5049_p1 = pnand %p5047_p0, %p5044_p13 }
  0x3e   : > { %5052 = shalt.err (!%p5049_p1)
}
  0x3f   : > { %s5053_s16 = scalar_lea.vmem %s422_s23, 32  ;;  %p5061_p8 = scmp.lt.s32.totalorder %s422_s23, %s422_s23 }
  0x40   : > { %p5054_p2 = scmp.ne.s32.totalorder %s422_s23, %s5053_s16  ;;  %p5062_p7 = scmp.lt.s32.totalorder %s5053_s16, %s5053_s16 }
  0x42   : > { %p5056_p3 = pnand %p5054_p2, %p5799_p11  ;;  %p5063_p4 = por %p5062_p7, %p5061_p8 }
  0x44   : > { %p5057_p5 = pneg %p5056_p3 }
  0x46   : > { %p5064_p6 = pnand %p5063_p4, %p5057_p5 }
  0x48   : > { %5067 = shalt.err (!%p5064_p6)
}
  0x49   : > { %4608 = dma.hbm_to_vmem [thread:$0]  (!%p5785_p9), %s8302_s2, 32, %s422_s23, [#allocation9]  }
  0x4a   : > { %s8304_s6 = sld [smem:[#allocation82_spill]] }
  0x50   : > { %s5068_s22 = scalar_lea.hbm %s8304_s6, 512 }
  0x51   : > { %p5069_p10 = scmp.ne.s32.totalorder %s8304_s6, %s5068_s22  ;;  %p5075_p4 = scmp.lt.u32.totalorder %s5068_s22, %s8304_s6 }
  0x53   : > { %p5071_p12 = pnand %p5069_p10, %p5799_p11 }
  0x55   : > { %p5072_p7 = pneg %p5071_p12 }
  0x57   : > { %p5077_p6 = pnand %p5075_p4, %p5072_p7 }
  0x59   : > { %5080 = shalt.err (!%p5077_p6)
}
  0x5a   : > { %s5081_s23 = scalar_lea.vmem %s5781_s27, 512  ;;  %p5089_p2 = scmp.lt.s32.totalorder %s5781_s27, %s5781_s27 }
  0x5b   : > { %p5082_p13 = scmp.ne.s32.totalorder %s5781_s27, %s5081_s23  ;;  %p5090_p3 = scmp.lt.s32.totalorder %s5081_s23, %s5081_s23 }
  0x5d   : > { %p5084_p0 = pnand %p5082_p13, %p5799_p11  ;;  %p5091_p5 = por %p5090_p3, %p5089_p2 }
  0x5f   : > { %p5085_p1 = pneg %p5084_p0 }
  0x61   : > { %p5092_p8 = pnand %p5091_p5, %p5085_p1 }
  0x63   : > { %5095 = shalt.err (!%p5092_p8)
}
  0x64   : > { %s8222_s19 = smov 64   ;;  %s8223_s15 = smov 4  }
  0x65   : > { %4614 = dma.hbm_to_vmem [thread:$0]  (!%p5785_p9), %s8304_s6, 512, %s5781_s27, [#allocation15], %s8222_s19, %s8222_s19, %s8223_s15  }
  0x66   : > { %s8305_s8 = sld [smem:[#allocation84_spill]] }
  0x6c   : > { %s5096_s22 = scalar_lea.hbm %s8305_s8, 2048 }
  0x6d   : > { %p5097_p10 = scmp.ne.s32.totalorder %s8305_s8, %s5096_s22  ;;  %p5103_p4 = scmp.lt.u32.totalorder %s5096_s22, %s8305_s8 }
  0x6f   : > { %p5099_p12 = pnand %p5097_p10, %p5799_p11 }
  0x71   : > { %p5100_p7 = pneg %p5099_p12 }
  0x73   : > { %p5105_p6 = pnand %p5103_p4, %p5100_p7 }
  0x75   : > { %5108 = shalt.err (!%p5105_p6)
}
  0x76   : > { %s5109_s27 = scalar_lea.vmem %s5789_s30, 2048  ;;  %p5117_p2 = scmp.lt.s32.totalorder %s5789_s30, %s5789_s30 }
  0x77   : > { %p5110_p13 = scmp.ne.s32.totalorder %s5789_s30, %s5109_s27  ;;  %p5118_p3 = scmp.lt.s32.totalorder %s5109_s27, %s5109_s27 }
  0x79   : > { %p5112_p0 = pnand %p5110_p13, %p5799_p11  ;;  %p5119_p5 = por %p5118_p3, %p5117_p2 }
  0x7b   : > { %p5113_p1 = pneg %p5112_p0 }
  0x7d   : > { %p5120_p8 = pnand %p5119_p5, %p5113_p1 }
  0x7f   : > { %5123 = shalt.err (!%p5120_p8)
}
  0x80   : > { %s8226_s18 = smov 128   ;;  %s8227_s2 = smov 8  }
  0x81   : > { %4620 = dma.hbm_to_vmem [thread:$0]  (!%p5785_p9), %s8305_s8, 2048, %s5789_s30, [#allocation18], %s8226_s18, %s8226_s18, %s8227_s2  }
  0x82   : > { %s5596_s20 = smov [#allocation20]   ;;  %s5597_s29 = smov [#allocation23]  }
  0x83   : > { %s491_s22 = sshll.u32 %s5596_s20, 4  ;;  %s513_s16 = sshll.u32 %s5597_s29, 4  ;;  %s492_s22 = int_to_ptr.vmem [resolvable:$true] %s491_s22  ;;  %s514_s16 = int_to_ptr.vmem [resolvable:$true] %s513_s16 }
  0x84   : > { %s8306_s10 = sld [smem:[#allocation86_spill]] }
  0x8a   : > { %s5124_s19 = scalar_lea.hbm %s8306_s10, 64 }
  0x8b   : > { %p5125_p10 = scmp.ne.s32.totalorder %s8306_s10, %s5124_s19  ;;  %p5131_p4 = scmp.lt.u32.totalorder %s5124_s19, %s8306_s10 }
  0x8d   : > { %p5127_p12 = pnand %p5125_p10, %p5799_p11 }
  0x8f   : > { %p5128_p7 = pneg %p5127_p12 }
  0x91   : > { %p5133_p6 = pnand %p5131_p4, %p5128_p7 }
  0x93   : > { %5136 = shalt.err (!%p5133_p6)
}
  0x94   : > { %s5137_s30 = scalar_lea.vmem %s492_s22, 64  ;;  %p5145_p2 = scmp.lt.s32.totalorder %s492_s22, %s492_s22 }
  0x95   : > { %p5138_p13 = scmp.ne.s32.totalorder %s492_s22, %s5137_s30  ;;  %p5146_p3 = scmp.lt.s32.totalorder %s5137_s30, %s5137_s30 }
  0x97   : > { %p5140_p0 = pnand %p5138_p13, %p5799_p11  ;;  %p5147_p5 = por %p5146_p3, %p5145_p2 }
  0x99   : > { %p5141_p1 = pneg %p5140_p0 }
  0x9b   : > { %p5148_p8 = pnand %p5147_p5, %p5141_p1 }
  0x9d   : > { %5151 = shalt.err (!%p5148_p8)
}
  0x9e   : > { %4626 = dma.hbm_to_vmem [thread:$0]  (!%p5785_p9), %s8306_s10, 64, %s492_s22, [#allocation21]  }
  0x9f   : > { %s8307_s12 = sld [smem:[#allocation88_spill]] }
  0xa5   : > { %s5152_s19 = scalar_lea.hbm %s8307_s12, 16 }
  0xa6   : > { %p5153_p10 = scmp.ne.s32.totalorder %s8307_s12, %s5152_s19  ;;  %p5159_p4 = scmp.lt.u32.totalorder %s5152_s19, %s8307_s12 }
  0xa8   : > { %p5155_p12 = pnand %p5153_p10, %p5799_p11 }
  0xaa   : > { %p5156_p7 = pneg %p5155_p12 }
  0xac   : > { %p5161_p6 = pnand %p5159_p4, %p5156_p7 }
  0xae   : > { %5164 = shalt.err (!%p5161_p6)
}
  0xaf   : > { %s5165_s23 = scalar_lea.vmem %s514_s16, 16  ;;  %s5172_s22 = scalar_lea.vmem %s514_s16, 32 }
  0xb0   : > { %p5166_p13 = scmp.ne.s32.totalorder %s514_s16, %s5165_s23  ;;  %p5173_p2 = scmp.lt.s32.totalorder %s514_s16, %s514_s16 }
  0xb1   : > { %p5174_p3 = scmp.lt.s32.totalorder %s5172_s22, %s5165_s23 }
  0xb2   : > { %p5168_p0 = pnand %p5166_p13, %p5799_p11 }
  0xb3   : > { %p5175_p5 = por %p5174_p3, %p5173_p2 }
  0xb4   : > { %p5169_p1 = pneg %p5168_p0 }
  0xb6   : > { %p5176_p8 = pnand %p5175_p5, %p5169_p1 }
  0xb8   : > { %5179 = shalt.err (!%p5176_p8)
}
  0xb9   : > { %4632 = dma.hbm_to_vmem [thread:$0]  (!%p5785_p9), %s8307_s12, 16, %s514_s16, [#allocation24]  }
  0xba   : > { %s5598_s6 = smov [#allocation26]   ;;  %s8308_s14 = sld [smem:[#allocation90_spill]] }
  0xbb   : > { %s535_s15 = sshll.u32 %s5598_s6, 4  ;;  %s536_s15 = int_to_ptr.vmem [resolvable:$true] %s535_s15 }
  0xc0   : > { %s5180_s19 = scalar_lea.hbm %s8308_s14, 16 }
  0xc1   : > { %p5181_p10 = scmp.ne.s32.totalorder %s8308_s14, %s5180_s19  ;;  %p5187_p4 = scmp.lt.u32.totalorder %s5180_s19, %s8308_s14 }
  0xc3   : > { %p5183_p12 = pnand %p5181_p10, %p5799_p11 }
  0xc5   : > { %p5184_p7 = pneg %p5183_p12 }
  0xc7   : > { %p5189_p6 = pnand %p5187_p4, %p5184_p7 }
  0xc9   : > { %5192 = shalt.err (!%p5189_p6)
}
  0xca   : > { %s5193_s16 = scalar_lea.vmem %s536_s15, 16  ;;  %s5200_s23 = scalar_lea.vmem %s536_s15, 32 }
  0xcb   : > { %p5194_p13 = scmp.ne.s32.totalorder %s536_s15, %s5193_s16  ;;  %p5201_p2 = scmp.lt.s32.totalorder %s536_s15, %s536_s15 }
  0xcc   : > { %p5202_p3 = scmp.lt.s32.totalorder %s5200_s23, %s5193_s16 }
  0xcd   : > { %p5196_p0 = pnand %p5194_p13, %p5799_p11 }
  0xce   : > { %p5203_p5 = por %p5202_p3, %p5201_p2 }
  0xcf   : > { %p5197_p1 = pneg %p5196_p0 }
  0xd1   : > { %p5204_p8 = pnand %p5203_p5, %p5197_p1 }
  0xd3   : > { %5207 = shalt.err (!%p5204_p8)
}
  0xd4   : > { %4638 = dma.hbm_to_vmem [thread:$0]  (!%p5785_p9), %s8308_s14, 16, %s536_s15, [#allocation27]  }
  0xd5   : > { %s4232_s30 = sadd.s32 4294967294, %s5586_s21   ;;  %s5923_s6 = sadd.s32 1, %s5586_s21  }
  0xd6   : > { %8309 = sst [smem:[#allocation46_spill]] %s5923_s6  ;;  %p8230_p10 = scmp.eq.s32.totalorder %s5586_s21, 0 }
  0xd7   : > { %s5926_s11 = sld [smem:[#allocation4 + %s5923_s6]]  ;;  %s119_s13 = ssub.s32 %s5586_s21, %s5923_s6 }
  0xd8   : > { %s122_s19 = sadd.s32 1, %s5570_s17  ;;  %p120_p12 = scmp.eq.s32.totalorder %s119_s13, 0 }
  0xd9   : > { %p129_p7 = scmp.ne.s32.totalorder %s5570_s17, %s5566_s0  ;;  %p135_p4 = scmp.ne.s32.totalorder %s5566_s0, %s5562_s1 }
  0xda   : > { %p395_p6 = scmp.eq.s32.totalorder %s5769_s24, 1  ;;  %p8311_p0 = scmp.eq.s32.totalorder %s5769_s24, 0 }
  0xdb   : > { %s5938_s15 = scalar_select %p120_p12, %s5570_s17, %s122_s19  }
  0xdc   : > { %p131_p13 = por %p129_p7, %p8230_p10  ;;  %p5944_p1 = por %p135_p4, %p8311_p0 }
  0xdd   : > { %8310 = sst [smem:[#allocation47_spill]] %s5938_s15  ;;  %p5948_p2 = por %p395_p6, %p129_p7 }
  0xde   : > { %s8312_s25 = scalar_select %p5944_p1, 1, 0 }
  0xdf   : > { %s8313_s5 = scalar_select %p5948_p2, 1, 0 }
  0xe0   : > { %p401_p3 = scmp.eq.s32.totalorder %s4232_s30, 1  ;;  %p8229_p5 = scmp.lt.s32.totalorder %s5586_s21, 2 }
  0xe1   : > { %s579_s20 = sand.u32 1, %s5586_s21   ;;  %s8228_s16 = sand.u32 1, %s5570_s17  }
  0xe2   : > { %p5954_p8 = por %p401_p3, %p135_p4  ;;  %s4389_s23 = sshll.u32 %s5586_s21, 11 }
  0xe3   : > { %s4250_s22 = sshll.u32 %s8228_s16, 7  ;;  %s8315_s4 = sld [smem:[#allocation80_spill]] }
  0xe4   : > { %s8314_s29 = scalar_select %p5954_p8, 1, 0 }
  0xe5   : > { %p5969_p12 = pnand %p8229_p5, %p131_p13  ;;  %s583_s18 = scalar_lea.vmem [#allocation11], %s4250_s22 }
  0xe6   : > { %s590_s2 = sshll.u32 %s583_s18, 4  ;;  %s5975_s16 = scalar_lea.sflag [#allocation12], %s579_s20  ;;  %s5973_s2 = int_to_ptr.vmem [resolvable:$true] %s590_s2 }
  0xe7   : > { %s8316_s30 = scalar_select %p5969_p12, 1, 0 }
  0xe8   : > { %p8237_p4 = pneg %p5969_p12 }
  0xe9   : > { %s5965_s19 = scalar_lea.hbm %s8315_s4, %s4389_s23  ;;  %s5213_s8 = scalar_lea.hbm %s8315_s4, 4096 }
  0xea   : > { %s5208_s27 = scalar_lea.hbm %s5965_s19, 2048  ;;  %p5214_p13 = scmp.lt.u32.totalorder %s5965_s19, %s8315_s4 }
  0xeb   : > { %p5209_p7 = scmp.ne.s32.totalorder %s5965_s19, %s5208_s27  ;;  %p5215_p3 = scmp.lt.u32.totalorder %s5213_s8, %s5208_s27 }
  0xec   : > { %p5217_p10 = scmp.lt.u32.totalorder %s5208_s27, %s5965_s19 }
  0xed   : > { %p5211_p6 = pnand %p8237_p4, %p5209_p7  ;;  %p5216_p5 = por %p5215_p3, %p5214_p13 }
  0xef   : > { %p5212_p0 = pneg %p5211_p6  ;;  %p5218_p8 = por %p5217_p10, %p5216_p5 }
  0xf1   : > { %p5219_p2 = pnand %p5218_p8, %p5212_p0 }
  0xf3   : > { %5222 = shalt.err (!%p5219_p2)
}
  0xf4   : > { %s5223_s18 = scalar_lea.vmem %s5973_s2, 2048  ;;  %s5599_s20 = smov [#allocation11]  }
  0xf5   : > { %p5224_p7 = scmp.ne.s32.totalorder %s5973_s2, %s5223_s18  ;;  %s5228_s22 = sshll.u32 %s5599_s20, 4  ;;  %s5229_s22 = int_to_ptr.vmem [resolvable:$false] %s5228_s22 }
  0xf6   : > { %s5230_s10 = scalar_lea.vmem %s5229_s22, 4096  ;;  %p5231_p9 = scmp.lt.s32.totalorder %s5973_s2, %s5229_s22 }
  0xf7   : > { %p5226_p6 = pnand %p5224_p7, %p8237_p4  ;;  %p5232_p13 = scmp.lt.s32.totalorder %s5230_s10, %s5223_s18 }
  0xf9   : > { %p5227_p1 = pneg %p5226_p6  ;;  %p5233_p3 = por %p5232_p13, %p5231_p9 }
  0xfb   : > { %p5234_p10 = pnand %p5233_p3, %p5227_p1 }
  0xfd   : > { %5237 = shalt.err (!%p5234_p10)
}
  0xfe   : > { %s8317_s8 = smov 8   ;;  %s8318_s12 = smov 128  }
  0xff   : > { %4650 = dma.hbm_to_vmem [thread:$0]  (!%p5969_p12), %s5965_s19, 2048, %s5973_s2, %s5975_s16, %s8318_s12, %s8318_s12, %s8317_s8  }
 0x100   : > { %s5600_s27 = smov [#allocation10]   ;;  %s5601_s13 = smov [#allocation16]  }
 0x101   : > { %s432_s23 = sshll.u32 %s5600_s27, 4  ;;  %s456_s20 = sshll.u32 %s5601_s13, 4  ;;  %s433_s23 = int_to_ptr.vmem [resolvable:$true] %s432_s23  ;;  %s457_s20 = int_to_ptr.vmem [resolvable:$true] %s456_s20 }
 0x102   : > { %s8319_s3 = sld [smem:[#allocation79_spill]] }
 0x108   : > { %s5238_s10 = scalar_lea.hbm %s8319_s3, 32 }
 0x109   : > { %p5239_p9 = scmp.ne.s32.totalorder %s8319_s3, %s5238_s10  ;;  %p5245_p5 = scmp.lt.u32.totalorder %s5238_s10, %s8319_s3 }
 0x10b   : > { %p5241_p1 = pnand %p5239_p9, %p5799_p11 }
 0x10d   : > { %p5242_p2 = pneg %p5241_p1 }
 0x10f   : > { %p5247_p8 = pnand %p5245_p5, %p5242_p2 }
 0x111   : > { %5250 = shalt.err (!%p5247_p8)
}
 0x112   : > { %s5251_s2 = scalar_lea.vmem %s433_s23, 32  ;;  %p5259_p13 = scmp.lt.s32.totalorder %s433_s23, %s433_s23 }
 0x113   : > { %p5252_p0 = scmp.ne.s32.totalorder %s433_s23, %s5251_s2  ;;  %p5260_p3 = scmp.lt.s32.totalorder %s5251_s2, %s5251_s2 }
 0x115   : > { %p5254_p7 = pnand %p5252_p0, %p5799_p11  ;;  %p5261_p10 = por %p5260_p3, %p5259_p13 }
 0x117   : > { %p5255_p6 = pneg %p5254_p7 }
 0x119   : > { %p5262_p4 = pnand %p5261_p10, %p5255_p6 }
 0x11b   : > { %5265 = shalt.err (!%p5262_p4)
}
 0x11c   : > { %p8320_p9 = scmp.ne.s32.totalorder %s8301_s28, 0  ;;  %s8321_s7 = sld [smem:[#allocation83_spill]] }
 0x11e   : > { %4611 = dma.hbm_to_vmem [thread:$0]  (!%p8320_p9), %s8319_s3, 32, %s433_s23, [#allocation9]  }
 0x122   : > { %s5266_s19 = scalar_lea.hbm %s8321_s7, 16 }
 0x123   : > { %p5267_p1 = scmp.ne.s32.totalorder %s8321_s7, %s5266_s19  ;;  %p5273_p4 = scmp.lt.u32.totalorder %s5266_s19, %s8321_s7 }
 0x125   : > { %p5269_p2 = pnand %p5267_p1, %p5799_p11 }
 0x127   : > { %p5270_p5 = pneg %p5269_p2 }
 0x129   : > { %p5275_p8 = pnand %p5273_p4, %p5270_p5 }
 0x12b   : > { %5278 = shalt.err (!%p5275_p8)
}
 0x12c   : > { %s5279_s22 = scalar_lea.vmem %s457_s20, 16  ;;  %s5286_s23 = scalar_lea.vmem %s457_s20, 32 }
 0x12d   : > { %p5280_p0 = scmp.ne.s32.totalorder %s457_s20, %s5279_s22  ;;  %p5287_p13 = scmp.lt.s32.totalorder %s457_s20, %s457_s20 }
 0x12e   : > { %p5288_p3 = scmp.lt.s32.totalorder %s5286_s23, %s5279_s22 }
 0x12f   : > { %p5282_p7 = pnand %p5280_p0, %p5799_p11 }
 0x130   : > { %p5289_p10 = por %p5288_p3, %p5287_p13 }
 0x131   : > { %p5283_p6 = pneg %p5282_p7 }
 0x133   : > { %p5290_p12 = pnand %p5289_p10, %p5283_p6 }
 0x135   : > { %5293 = shalt.err (!%p5290_p12)
}
 0x136   : > { %4617 = dma.hbm_to_vmem [thread:$0]  (!%p8320_p9), %s8321_s7, 16, %s457_s20, [#allocation15]  }
 0x137   : > { %s5602_s2 = smov [#allocation19]   ;;  %s5603_s14 = smov [#allocation22]  }
 0x138   : > { %s480_s4 = sshll.u32 %s5602_s2, 4  ;;  %s502_s6 = sshll.u32 %s5603_s14, 4  ;;  %s481_s4 = int_to_ptr.vmem [resolvable:$true] %s480_s4  ;;  %s503_s6 = int_to_ptr.vmem [resolvable:$true] %s502_s6 }
 0x139   : > { %s8322_s9 = sld [smem:[#allocation85_spill]] }
 0x13f   : > { %s5294_s8 = scalar_lea.hbm %s8322_s9, 16 }
 0x140   : > { %p5295_p12 = scmp.ne.s32.totalorder %s8322_s9, %s5294_s8  ;;  %p5301_p5 = scmp.lt.u32.totalorder %s5294_s8, %s8322_s9 }
 0x142   : > { %p5297_p1 = pnand %p5295_p12, %p5799_p11 }
 0x144   : > { %p5298_p2 = pneg %p5297_p1 }
 0x146   : > { %p5303_p4 = pnand %p5301_p5, %p5298_p2 }
 0x148   : > { %5306 = shalt.err (!%p5303_p4)
}
 0x149   : > { %s5307_s20 = scalar_lea.vmem %s481_s4, 16  ;;  %s5314_s23 = scalar_lea.vmem %s481_s4, 32 }
 0x14a   : > { %p5308_p8 = scmp.ne.s32.totalorder %s481_s4, %s5307_s20  ;;  %p5315_p6 = scmp.lt.s32.totalorder %s481_s4, %s481_s4 }
 0x14b   : > { %p5316_p13 = scmp.lt.s32.totalorder %s5314_s23, %s5307_s20 }
 0x14c   : > { %p5310_p0 = pnand %p5308_p8, %p5799_p11 }
 0x14d   : > { %p5317_p3 = por %p5316_p13, %p5315_p6 }
 0x14e   : > { %p5311_p7 = pneg %p5310_p0 }
 0x150   : > { %p5318_p10 = pnand %p5317_p3, %p5311_p7 }
 0x152   : > { %5321 = shalt.err (!%p5318_p10)
}
 0x153   : > { %4623 = dma.hbm_to_vmem [thread:$0]  (!%p8320_p9), %s8322_s9, 16, %s481_s4, [#allocation18]  }
 0x154   : > { %s8323_s15 = sld [smem:[#allocation87_spill]] }
 0x15a   : > { %s5322_s19 = scalar_lea.hbm %s8323_s15, 16 }
 0x15b   : > { %p5323_p12 = scmp.ne.s32.totalorder %s8323_s15, %s5322_s19  ;;  %p5329_p5 = scmp.lt.u32.totalorder %s5322_s19, %s8323_s15 }
 0x15d   : > { %p5325_p1 = pnand %p5323_p12, %p5799_p11 }
 0x15f   : > { %p5326_p2 = pneg %p5325_p1 }
 0x161   : > { %p5331_p4 = pnand %p5329_p5, %p5326_p2 }
 0x163   : > { %5334 = shalt.err (!%p5331_p4)
}
 0x164   : > { %s5335_s22 = scalar_lea.vmem %s503_s6, 16  ;;  %s5342_s4 = scalar_lea.vmem %s503_s6, 32 }
 0x165   : > { %p5336_p8 = scmp.ne.s32.totalorder %s503_s6, %s5335_s22  ;;  %p5343_p6 = scmp.lt.s32.totalorder %s503_s6, %s503_s6 }
 0x166   : > { %p5344_p13 = scmp.lt.s32.totalorder %s5342_s4, %s5335_s22 }
 0x167   : > { %p5338_p0 = pnand %p5336_p8, %p5799_p11 }
 0x168   : > { %p5345_p3 = por %p5344_p13, %p5343_p6 }
 0x169   : > { %p5339_p7 = pneg %p5338_p0 }
 0x16b   : > { %p5346_p10 = pnand %p5345_p3, %p5339_p7 }
 0x16d   : > { %5349 = shalt.err (!%p5346_p10)
}
 0x16e   : > { %4629 = dma.hbm_to_vmem [thread:$0]  (!%p8320_p9), %s8323_s15, 16, %s503_s6, [#allocation21]  }
 0x16f   : > { %s5604_s18 = smov [#allocation25]   ;;  %s5605_s2 = smov [#allocation28]  }
 0x170   : > { %s524_s10 = sshll.u32 %s5604_s18, 4  ;;  %s546_s14 = sshll.u32 %s5605_s2, 4  ;;  %s525_s10 = int_to_ptr.vmem [resolvable:$true] %s524_s10  ;;  %s547_s14 = int_to_ptr.vmem [resolvable:$true] %s546_s14 }
 0x171   : > { %s8324_s12 = sld [smem:[#allocation89_spill]] }
 0x177   : > { %s5350_s27 = scalar_lea.hbm %s8324_s12, 16 }
 0x178   : > { %p5351_p12 = scmp.ne.s32.totalorder %s8324_s12, %s5350_s27  ;;  %p5357_p5 = scmp.lt.u32.totalorder %s5350_s27, %s8324_s12 }
 0x17a   : > { %p5353_p1 = pnand %p5351_p12, %p5799_p11 }
 0x17c   : > { %p5354_p2 = pneg %p5353_p1 }
 0x17e   : > { %p5359_p4 = pnand %p5357_p5, %p5354_p2 }
 0x180   : > { %5362 = shalt.err (!%p5359_p4)
}
 0x181   : > { %s5363_s6 = scalar_lea.vmem %s525_s10, 16  ;;  %s5370_s23 = scalar_lea.vmem %s525_s10, 32 }
 0x182   : > { %p5364_p8 = scmp.ne.s32.totalorder %s525_s10, %s5363_s6  ;;  %p5371_p6 = scmp.lt.s32.totalorder %s525_s10, %s525_s10 }
 0x183   : > { %p5372_p13 = scmp.lt.s32.totalorder %s5370_s23, %s5363_s6 }
 0x184   : > { %p5366_p0 = pnand %p5364_p8, %p5799_p11 }
 0x185   : > { %p5373_p3 = por %p5372_p13, %p5371_p6 }
 0x186   : > { %p5367_p7 = pneg %p5366_p0 }
 0x188   : > { %p5374_p10 = pnand %p5373_p3, %p5367_p7 }
 0x18a   : > { %5377 = shalt.err (!%p5374_p10)
}
 0x18b   : > { %4635 = dma.hbm_to_vmem [thread:$0]  (!%p8320_p9), %s8324_s12, 16, %s525_s10, [#allocation24]  }
 0x18c   : > { %s8325_s27 = sld [smem:[#allocation91_spill]] }
 0x192   : > { %s5378_s13 = scalar_lea.hbm %s8325_s27, 16 }
 0x193   : > { %p5379_p12 = scmp.ne.s32.totalorder %s8325_s27, %s5378_s13  ;;  %p5385_p5 = scmp.lt.u32.totalorder %s5378_s13, %s8325_s27 }
 0x195   : > { %p5381_p1 = pnand %p5379_p12, %p5799_p11 }
 0x197   : > { %p5382_p2 = pneg %p5381_p1 }
 0x199   : > { %p5387_p4 = pnand %p5385_p5, %p5382_p2 }
 0x19b   : > { %5390 = shalt.err (!%p5387_p4)
}
 0x19c   : > { %s5391_s23 = scalar_lea.vmem %s547_s14, 16  ;;  %s5398_s10 = scalar_lea.vmem %s547_s14, 32 }
 0x19d   : > { %p5392_p8 = scmp.ne.s32.totalorder %s547_s14, %s5391_s23  ;;  %p5399_p6 = scmp.lt.s32.totalorder %s547_s14, %s547_s14 }
 0x19e   : > { %p5400_p13 = scmp.lt.s32.totalorder %s5398_s10, %s5391_s23 }
 0x19f   : > { %p5394_p0 = pnand %p5392_p8, %p5799_p11 }
 0x1a0   : > { %p5401_p3 = por %p5400_p13, %p5399_p6 }
 0x1a1   : > { %p5395_p7 = pneg %p5394_p0 }
 0x1a3   : > { %p5402_p10 = pnand %p5401_p3, %p5395_p7 }
 0x1a5   : > { %5405 = shalt.err (!%p5402_p10)
}
 0x1a6   : > { %s8326_s19 = sld [smem:[#allocation43_spill]]  ;;  %s8327_s8 = sld [smem:[#allocation44_spill]] }
 0x1a7   : > { %s8328_s13 = sld [smem:[#allocation42_spill]]  ;;  %p8329_p1 = scmp.eq.s32.totalorder %s5586_s21, 0 }
 0x1a8   : > { %4641 = dma.hbm_to_vmem [thread:$0]  (!%p8320_p9), %s8325_s27, 16, %s547_s14, [#allocation27]  }
 0x1a9   : > { %s49_s26 = sld [smem:[#allocation4 + %s5586_s21]]  ;;  %p8331_p5 = scmp.eq.s32.totalorder %s5769_s24, 0 }
 0x1aa   : > { %p8333_p9 = scmp.lt.s32.totalorder %s5586_s21, 2  ;;  %s4254_s3 = sshll.u32 %s5586_s21, 7 }
 0x1ab   : > { %s8338_s9 = sld [smem:[#allocation81_spill]]  ;;  %p8339_p3 = scmp.ne.s32.totalorder %s8316_s30, 0 }
 0x1ac   : > { %p61_p11 = scmp.ne.s32.totalorder %s8327_s8, %s8326_s19  ;;  %s8240_s28 = sand.u32 1, %s8327_s8  }
 0x1ad   : > { %p67_p12 = scmp.ne.s32.totalorder %s8326_s19, %s8328_s13  ;;  %s4247_s4 = sshll.u32 %s8240_s28, 7 }
 0x1ae   : > { %p6122_p2 = por %p8329_p1, %p61_p11  ;;  %s54_s20 = sadd.s32 1, %s8327_s8 }
 0x1af   : > { %p6128_p4 = por %p8331_p5, %p67_p12  ;;  %s51_s6 = ssub.s32 %s49_s26, %s5926_s11 }
 0x1b0   : > { %p6140_p8 = pnand %p8333_p9, %p6122_p2  ;;  %p52_p0 = scmp.eq.s32.totalorder %s51_s6, 0 }
 0x1b1   : > { %s8332_s14 = scalar_select %p6128_p4, 1, 0 }
 0x1b2   : > { %s8334_s23 = scalar_select %p6140_p8, 1, 0 }
 0x1b3   : > { %s561_s10 = scalar_lea.vmem [#allocation5], %s4247_s4  ;;  %p8335_p7 = pmov %p8333_p9 }
 0x1b4   : > { %s6144_s18 = sshll.u32 %s561_s10, 4  ;;  %s8337_s11 = sand.u32 1, %s5570_s17   ;;  %s6182_s18 = int_to_ptr.vmem [resolvable:$true] %s6144_s18 }
 0x1b5   : > { %s4571_s2 = scalar_select %p6122_p2, [#allocation4], [#allocation30] }
 0x1b6   : > { %s6149_s19 = scalar_select %p52_p0, %s8327_s8, %s54_s20  }
 0x1b7   : > { %s4572_s13 = scalar_select %p6122_p2, %s5586_s21, 0 }
 0x1b8   : > { %s8534_s2 = smov (!%p8335_p7, %s4571_s2), [#allocation31]  ;;  %p8336_p6 = pmov %p8335_p7 }
 0x1b9   : > { %s4253_s26 = sshll.u32 %s8337_s11, 3  ;;  %s609_s12 = scalar_lea.hbm %s8338_s9, %s4254_s3 }
 0x1ba   : > { %s8536_s13 = smov (!%p8336_p6, %s4572_s13), 0  ;;  %s604_s6 = scalar_lea.vmem [#allocation13], %s4253_s26 }
 0x1bb   : > { %s6160_s28 = sld [smem:[%s8534_s2 + %s8536_s13]]  ;;  %s611_s4 = sshll.u32 %s604_s6, 4  ;;  %s612_s4 = int_to_ptr.vmem [resolvable:$true] %s611_s4 }
 0x1bc   : > { %s5406_s20 = scalar_lea.hbm %s609_s12, 128  ;;  %p8340_p10 = pneg %p8339_p3 }
 0x1bd   : > { %p5407_p13 = scmp.ne.s32.totalorder %s609_s12, %s5406_s20  ;;  %s5411_s11 = scalar_lea.hbm %s8338_s9, 256 }
 0x1be   : > { %p5412_p1 = scmp.lt.u32.totalorder %s609_s12, %s8338_s9  ;;  %p5413_p2 = scmp.lt.u32.totalorder %s5411_s11, %s5406_s20 }
 0x1bf   : > { %p5409_p11 = pnand %p5407_p13, %p8340_p10  ;;  %p5415_p9 = scmp.lt.u32.totalorder %s5406_s20, %s609_s12 }
 0x1c0   : > { %p5414_p5 = por %p5413_p2, %p5412_p1 }
 0x1c1   : > { %p5410_p12 = pneg %p5409_p11 }
 0x1c2   : > { %p5416_p0 = por %p5415_p9, %p5414_p5 }
 0x1c4   : > { %p5417_p7 = pnand %p5416_p0, %p5410_p12 }
 0x1c6   : > { %5420 = shalt.err (!%p5417_p7)
}
 0x1c7   : > { %s5421_s3 = scalar_lea.vmem %s612_s4, 128  ;;  %p8341_p13 = pmov %p8340_p10 }
 0x1c8   : > { %p5422_p6 = scmp.ne.s32.totalorder %s612_s4, %s5421_s3  ;;  %s5606_s7 = smov [#allocation13]  }
 0x1c9   : > { %s5426_s15 = sshll.u32 %s5606_s7, 4  ;;  %s5427_s15 = int_to_ptr.vmem [resolvable:$false] %s5426_s15 }
 0x1ca   : > { %p5424_p10 = pnand %p5422_p6, %p8341_p13  ;;  %s5428_s26 = scalar_lea.vmem %s5427_s15, 256 }
 0x1cb   : > { %p5429_p4 = scmp.lt.s32.totalorder %s612_s4, %s5427_s15  ;;  %p5430_p8 = scmp.lt.s32.totalorder %s5428_s26, %s5421_s3 }
 0x1cc   : > { %p5425_p11 = pneg %p5424_p10 }
 0x1cd   : > { %p5431_p1 = por %p5430_p8, %p5429_p4 }
 0x1cf   : > { %p5432_p2 = pnand %p5431_p1, %p5425_p11 }
 0x1d1   : > { %5435 = shalt.err (!%p5432_p2)
}
 0x1d2   : > { %4653 = dma.hbm_to_vmem [thread:$0]  (!%p8339_p3), %s609_s12, 128, %s612_s4, %s5975_s16  }
 0x1d3   : > { %s4388_s6 = sshll.u32 %s6160_s28, 11  ;;  %s8342_s22 = sld [smem:[#allocation77_spill]] }
 0x1d4   : > { %s8343_s2 = sand.u32 1, %s8327_s8   ;;  %p8344_p8 = scmp.ne.s32.totalorder %s8334_s23, 0 }
 0x1d5   : > { %s6192_s30 = scalar_lea.sflag [#allocation6], %s8343_s2 }
 0x1d6   : > { %p5438_p12 = pneg %p8344_p8 }
 0x1d9   : > { %s6188_s11 = scalar_lea.hbm %s8342_s22, %s4388_s6  ;;  %s5441_s28 = scalar_lea.hbm %s8342_s22, 4096 }
 0x1da   : > { %s5436_s13 = scalar_lea.hbm %s6188_s11, 2048  ;;  %p5442_p9 = scmp.lt.u32.totalorder %s6188_s11, %s8342_s22 }
 0x1db   : > { %p5437_p4 = scmp.ne.s32.totalorder %s6188_s11, %s5436_s13  ;;  %p5443_p0 = scmp.lt.u32.totalorder %s5441_s28, %s5436_s13 }
 0x1dc   : > { %p5445_p6 = scmp.lt.u32.totalorder %s5436_s13, %s6188_s11 }
 0x1dd   : > { %p5439_p3 = pnand %p5438_p12, %p5437_p4  ;;  %p5444_p7 = por %p5443_p0, %p5442_p9 }
 0x1df   : > { %p5440_p5 = pneg %p5439_p3  ;;  %p5446_p13 = por %p5445_p6, %p5444_p7 }
 0x1e1   : > { %p5447_p10 = pnand %p5446_p13, %p5440_p5 }
 0x1e3   : > { %5450 = shalt.err (!%p5447_p10)
}
 0x1e4   : > { %s5451_s3 = scalar_lea.vmem %s6182_s18, 2048  ;;  %s5607_s7 = smov [#allocation5]  }
 0x1e5   : > { %p5452_p11 = scmp.ne.s32.totalorder %s6182_s18, %s5451_s3  ;;  %s5456_s15 = sshll.u32 %s5607_s7, 4  ;;  %s5457_s15 = int_to_ptr.vmem [resolvable:$false] %s5456_s15 }
 0x1e6   : > { %s5458_s26 = scalar_lea.vmem %s5457_s15, 4096  ;;  %p5459_p4 = scmp.lt.s32.totalorder %s6182_s18, %s5457_s15 }
 0x1e7   : > { %p5454_p1 = pnand %p5452_p11, %p5438_p12  ;;  %p5460_p3 = scmp.lt.s32.totalorder %s5458_s26, %s5451_s3 }
 0x1e9   : > { %p5455_p2 = pneg %p5454_p1  ;;  %p5461_p9 = por %p5460_p3, %p5459_p4 }
 0x1eb   : > { %p5462_p0 = pnand %p5461_p9, %p5455_p2 }
 0x1ed   : > { %5465 = shalt.err (!%p5462_p0)
}
 0x1ee   : > { %s8345_s6 = smov 4   ;;  %s8346_s10 = smov 64  }
 0x1ef   : > { %4647 = dma.hbm_to_vmem [thread:$0]  (!%p8344_p8), %s6188_s11, 2048, %s6182_s18, %s6192_s30, %s8346_s10, %s8346_s10, %s8345_s6  }
 0x1f0   : > { %s8347_s20 = sld [smem:[#allocation45_spill]] }
 0x1f6   : > { %p8348_p12 = scmp.ne.s32.totalorder %s8347_s20, 0 }
 0x1f8   : > { %620 = sbr.rel (%p8348_p12) target bundleno = 2459 (0x99b), region = 80 }
 0x1ff   : > { %s8349_s2 = sld [smem:[#allocation43_spill]]  ;;  %p8350_p5 = scmp.ne.s32.totalorder %s8332_s14, 0 }
 0x205   : > { %s622_s13 = sand.u32 1, %s8349_s2  }
 0x206   : > { %s4256_s16 = sshll.u32 %s622_s13, 7  ;;  %s623_s12 = scalar_lea.sflag [#allocation6], %s622_s13 }
 0x207   : > { %s6226_s28 = scalar_lea.vmem [#allocation5], %s4256_s16 }
 0x208   : > { %5525 = dma.done.wait (%p8350_p5), %s623_s12, 2048  }
 0x209   : > { %5527 = vsyncadd (%p8350_p5), %s623_s12, 4294965248  ;;  %p8351_p7 = scmp.eq.s32.totalorder %s5769_s24, 0 }
 0x20b   : > { %5529 = dma.done.wait (%p8351_p7), [#allocation9], 64   ;;  %p8352_p8 = pmov %p8351_p7 }
 0x20c   : > { %s639_s23 = sand.u32 1, %s5769_s24   ;;  %s6238_s18 = sand.u32 1, %s5566_s0  }
 0x20d   : > { %5531 = vsyncadd (%p8352_p8), [#allocation9], 4294967232  ;;  %s4259_s11 = sshll.u32 %s6238_s18, 7  ;;  %s640_s30 = scalar_lea.sflag [#allocation12], %s639_s23 }
 0x20e   : > { %s6241_s4 = scalar_lea.vmem [#allocation11], %s4259_s11  ;;  %p8353_p6 = scmp.ne.s32.totalorder %s8312_s25, 0 }
 0x210   : > { %5533 = dma.done.wait (%p8353_p6), %s640_s30, 2176  }
 0x211   : > { %5535 = vsyncadd (%p8353_p6), %s640_s30, 4294965120  ;;  %s4260_s14 = sshll.u32 %s6238_s18, 3  ;;  %p8354_p13 = pmov %p8351_p7 }
 0x212   : > { %s6250_s8 = scalar_lea.vmem [#allocation13], %s4260_s14 }
 0x213   : > { %5537 = dma.done.wait (%p8354_p13), [#allocation15], 528   ;;  %p8355_p10 = pmov %p8351_p7 }
 0x214   : > { %p8356_p11 = pmov %p8351_p7 }
 0x215   : > { %5539 = vsyncadd (%p8355_p10), [#allocation15], 4294966768 }
 0x216   : > { %5541 = dma.done.wait (%p8356_p11), [#allocation18], 2064   ;;  %p8357_p1 = pmov %p8351_p7 }
 0x218   : > { %5543 = vsyncadd (%p8357_p1), [#allocation18], 4294965232  ;;  %p8358_p2 = pmov %p8357_p1 }
 0x219   : > { %p8359_p4 = pmov %p8357_p1 }
 0x21a   : > { %5545 = dma.done.wait (%p8358_p2), [#allocation21], 80  }
 0x21b   : > { %5547 = vsyncadd (%p8359_p4), [#allocation21], 4294967216  ;;  %p8360_p3 = pmov %p8357_p1 }
 0x21c   : > { %p8361_p9 = pmov %p8357_p1 }
 0x21d   : > { %5549 = dma.done.wait (%p8360_p3), [#allocation24], 32  }
 0x21e   : > { %5551 = vsyncadd (%p8361_p9), [#allocation24], 4294967264  ;;  %p8362_p0 = pmov %p8357_p1 }
 0x220   : > { %5553 = dma.done.wait (%p8362_p0), [#allocation27], 32   ;;  %p8363_p12 = pmov %p8362_p0 }
 0x221   : > { %v6273_v0 = vld [vmem:[%s6241_s4] sm:$0xff]  ;;  %v6276_v1 = vld [vmem:[%s6241_s4 + $0x8] sm:$0xff]  ;;  %v6279_v2 = vld [vmem:[%s6241_s4 + $0x10] sm:$0xff]  ;;  %s5608_s25 = smov 2   ;;  %s5609_s3 = smov 1  }
 0x222   : > { %5555 = vsyncadd (%p8363_p12), [#allocation27], 4294967264  ;;  %v768_v3 = vmul.f32 0.25, %v6273_v0  ;;  %v769_v4 = vmul.f32 0.25, %v6276_v1  ;;  %v770_v5 = vmul.f32 0.25, %v6279_v2  ;;  %v6285_v6 = vld [vmem:[%s6241_s4 + $0x18] sm:$0xff] }
 0x223   : > { %v6288_v7 = vld [vmem:[%s6241_s4 + $0x28] sm:$0xff]  ;;  %v6291_v8 = vld [vmem:[%s6241_s4 + $0x20] sm:$0xff]  ;;  %v771_v9 = vmul.f32 0.25, %v6285_v6  ;;  %v6295_v10 = vld [vmem:[%s6241_s4 + $0x38] sm:$0xff]  ;;  %s5610_s7 = smov 3   ;;  %s5612_s15 = smov 125  }
 0x224   : > { %v6298_v11 = vld [vmem:[%s6241_s4 + $0x30] sm:$0xff]  ;;  %v6301_v12 = vld [vmem:[%s6241_s4 + $0x48] sm:$0xff]  ;;  %v6303_v13 = vadd.f32 -0.5, %v768_v3  ;;  %v6305_v14 = vadd.f32 -0.5, %v770_v5  ;;  %v773_v15 = vmul.f32 0.25, %v6288_v7  ;;  %v772_v16 = vmul.f32 0.25, %v6291_v8 }
 0x225   : > { %v6310_v17 = vld [vmem:[%s6241_s4 + $0x40] sm:$0xff]  ;;  %v6313_v18 = vld [vmem:[%s6241_s4 + $0x58] sm:$0xff]  ;;  %v775_v19 = vmul.f32 0.25, %v6295_v10  ;;  %v774_v20 = vmul.f32 0.25, %v6298_v11  ;;  %v6318_v21 = vld [vmem:[%s6241_s4 + $0x50] sm:$0xff]  ;;  %v6322_v22 = vadd.f32 -0.5, %v769_v4 }
 0x226   : > { %816 = vrot.lane.b32.xlu0 %v6303_v13, %s5608_s25  ;;  %820 = vrot.lane.b32.xlu1 %v6305_v14, %s5608_s25  ;;  %v6326_v23 = vadd.f32 -0.5, %v771_v9  ;;  %v777_v24 = vmul.f32 0.25, %v6301_v12  ;;  %v776_v25 = vmul.f32 0.25, %v6310_v17  ;;  %v6331_v26 = vld [vmem:[%s6241_s4 + $0x68] sm:$0xff]  ;;  %v6334_v27 = vld [vmem:[%s6241_s4 + $0x60] sm:$0xff]  ;;  %v779_v28 = vmul.f32 0.25, %v6313_v18 }
 0x227   : > { %v778_v29 = vmul.f32 0.25, %v6318_v21  ;;  %v6338_v30 = vadd.f32 -0.5, %v773_v15  ;;  %v6340_v31 = vadd.f32 -0.5, %v772_v16  ;;  %v6342_v32 = vadd.f32 -0.5, %v775_v19  ;;  %v6373_v40 = vld [vmem:[%s6241_s4 + $0x78] sm:$0xff]  ;;  %v6376_v41 = vld [vmem:[%s6241_s4 + $0x70] sm:$0xff] }
 0x228   : > { %v6344_v33 = vadd.f32 -0.5, %v774_v20  ;;  %v781_v34 = vmul.f32 0.25, %v6331_v26  ;;  %v780_v35 = vmul.f32 0.25, %v6334_v27  ;;  %v6352_v36 = vadd.f32 -0.5, %v777_v24  ;;  %s5614_s26 = smov 123   ;;  %s5616_s6 = smov 4  }
 0x229   : > { %v6354_v37 = vadd.f32 -0.5, %v776_v25  ;;  %v6356_v38 = vadd.f32 -0.5, %v779_v28  ;;  %v6358_v39 = vadd.f32 -0.5, %v778_v29  ;;  %v783_v44 = vmul.f32 0.25, %v6373_v40  ;;  %s5617_s10 = smov 8   ;;  %s5618_s20 = smov 12  }
 0x22a   : > { %818 = vrot.lane.b32.xlu0 %v6322_v22, %s5608_s25  ;;  %822 = vrot.lane.b32.xlu1 %v6326_v23, %s5608_s25  ;;  %v6382_v42 = vadd.f32 -0.5, %v781_v34  ;;  %v6384_v43 = vadd.f32 -0.5, %v780_v35  ;;  %v782_v45 = vmul.f32 0.25, %v6376_v41  ;;  %s5619_s2 = smov 16   ;;  %s5620_s13 = smov 20  }
 0x22b   : > { %v6392_v46 = vadd.f32 -0.5, %v783_v44  ;;  %s5621_s16 = smov 24   ;;  %s5622_s12 = smov 28  }
 0x22c   : > { %v6394_v47 = vadd.f32 -0.5, %v782_v45  ;;  %s5624_s23 = smov 36   ;;  %s5625_s11 = smov 40  }
 0x22d   : > { %s5626_s30 = smov 44   ;;  %s5628_s4 = smov 48  }
 0x22e   : > { %826 = vrot.lane.b32.xlu1 %v6338_v30, %s5608_s25  ;;  %824 = vrot.lane.b32.xlu0 %v6340_v31, %s5608_s25  ;;  %p8520_p7 = scmp.ne.s32.totalorder %s8313_s5, 0 }
 0x232   : > { %830 = vrot.lane.b32.xlu1 %v6342_v32, %s5608_s25  ;;  %828 = vrot.lane.b32.xlu0 %v6344_v33, %s5608_s25 }
 0x236   : > { %834 = vrot.lane.b32.xlu1 %v6352_v36, %s5608_s25  ;;  %832 = vrot.lane.b32.xlu0 %v6354_v37, %s5608_s25 }
 0x23a   : > { %838 = vrot.lane.b32.xlu1 %v6356_v38, %s5608_s25  ;;  %836 = vrot.lane.b32.xlu0 %v6358_v39, %s5608_s25 }
 0x23e   : > { %842 = vrot.lane.b32.xlu1 %v6382_v42, %s5608_s25  ;;  %840 = vrot.lane.b32.xlu0 %v6384_v43, %s5608_s25 }
 0x242   : > { %846 = vrot.lane.b32.xlu1 %v6392_v46, %s5608_s25  ;;  %844 = vrot.lane.b32.xlu0 %v6394_v47, %s5608_s25  ;;  %s5629_s25 = smov 52  }
 0x298   : > { %v817_v48 = vpop.permute.xlu0 %816  ;;  %v821_v49 = vpop.permute.xlu1 %820 }
 0x299   : > { %v864_v50 = vsub.f32 %v6303_v13, %v817_v48  ;;  %v866_v54 = vsub.f32 %v6305_v14, %v821_v49 }
 0x29b   : > { %v880_v51 = vmul.f32 0.25, %v864_v50  ;;  %v882_v57 = vmul.f32 0.25, %v866_v54 }
 0x29c   : > { %v819_v52 = vpop.permute.xlu0 %818  ;;  %v823_v55 = vpop.permute.xlu1 %822 }
 0x29d   : > { %v865_v53 = vsub.f32 %v6322_v22, %v819_v52  ;;  %930 = vrot.lane.b32.xlu0 %v880_v51, %s5609_s3  ;;  %v867_v58 = vsub.f32 %v6326_v23, %v823_v55 }
 0x29f   : > { %v881_v56 = vmul.f32 0.25, %v865_v53  ;;  %v883_v60 = vmul.f32 0.25, %v867_v58 }
 0x2a0   : > { %v825_v59 = vpop.permute.xlu0 %824  ;;  %v827_v62 = vpop.permute.xlu1 %826 }
 0x2a1   : > { %1074 = vrot.lane.b32.xlu0 %v880_v51, %s5610_s7  ;;  %932 = vrot.lane.b32.xlu1 %v881_v56, %s5609_s3  ;;  %v868_v61 = vsub.f32 %v6340_v31, %v825_v59  ;;  %v869_v63 = vsub.f32 %v6338_v30, %v827_v62 }
 0x2a3   : > { %v884_v3 = vmul.f32 0.25, %v868_v61  ;;  %v885_v5 = vmul.f32 0.25, %v869_v63 }
 0x2a4   : > { %v829_v4 = vpop.permute.xlu0 %828  ;;  %v831_v15 = vpop.permute.xlu1 %830 }
 0x2a5   : > { %1076 = vrot.lane.b32.xlu1 %v881_v56, %s5610_s7  ;;  %934 = vrot.lane.b32.xlu0 %v882_v57, %s5609_s3  ;;  %v870_v9 = vsub.f32 %v6344_v33, %v829_v4  ;;  %v871_v16 = vsub.f32 %v6342_v32, %v831_v15  ;;  %v898_v4 = vadd.f32 0.25, %v6273_v0  ;;  %v899_v15 = vadd.f32 0.25, %v6276_v1 }
 0x2a7   : > { %v886_v19 = vmul.f32 0.25, %v870_v9  ;;  %v887_v24 = vmul.f32 0.25, %v871_v16  ;;  %v8251_v16 = vmov 1  }
 0x2a8   : > { %v833_v20 = vpop.permute.xlu0 %832  ;;  %v835_v28 = vpop.permute.xlu1 %834  ;;  %4784 = vset.pattern.permute.xlu1 %v8251_v16  ;;  %4880 = vset.pattern.permute.xlu0 %v8251_v16 }
 0x2a9   : > { %1078 = vrot.lane.b32.xlu0 %v882_v57, %s5610_s7  ;;  %936 = vrot.lane.b32.xlu1 %v883_v60, %s5609_s3  ;;  %v872_v25 = vsub.f32 %v6354_v37, %v833_v20  ;;  %v873_v29 = vsub.f32 %v6352_v36, %v835_v28 }
 0x2ab   : > { %v888_v34 = vmul.f32 0.25, %v872_v25  ;;  %v889_v44 = vmul.f32 0.25, %v873_v29 }
 0x2ac   : > { %v837_v35 = vpop.permute.xlu0 %836  ;;  %v839_v48 = vpop.permute.xlu1 %838 }
 0x2ad   : > { %1080 = vrot.lane.b32.xlu1 %v883_v60, %s5610_s7  ;;  %938 = vrot.lane.b32.xlu0 %v884_v3, %s5609_s3  ;;  %v874_v45 = vsub.f32 %v6358_v39, %v837_v35  ;;  %v875_v49 = vsub.f32 %v6356_v38, %v839_v48  ;;  %v2169_v35 = vadd.f32 0.75, %v6276_v1 }
 0x2af   : > { %v890_v50 = vmul.f32 0.25, %v874_v45  ;;  %v891_v52 = vmul.f32 0.25, %v875_v49  ;;  %v900_v45 = vadd.f32 0.25, %v6279_v2 }
 0x2b0   : > { %v841_v51 = vpop.permute.xlu0 %840  ;;  %v843_v54 = vpop.permute.xlu1 %842 }
 0x2b1   : > { %940 = vrot.lane.b32.xlu1 %v885_v5, %s5609_s3  ;;  %1082 = vrot.lane.b32.xlu0 %v884_v3, %s5610_s7  ;;  %v876_v53 = vsub.f32 %v6384_v43, %v841_v51  ;;  %v877_v55 = vsub.f32 %v6382_v42, %v843_v54  ;;  %v8245_v3 = vmov 0.0   ;;  %v901_v51 = vadd.f32 0.25, %v6285_v6 }
 0x2b2   : > { %4476 = vmatprep.subr.bf16.mxu1 %v8245_v3 }
 0x2b3   : > { %v892_v56 = vmul.f32 0.25, %v876_v53  ;;  %v893_v58 = vmul.f32 0.25, %v877_v55  ;;  %v2170_v55 = vadd.f32 0.75, %v6279_v2  ;;  %v903_v2 = vadd.f32 0.25, %v6288_v7 }
 0x2b4   : > { %v845_v57 = vpop.permute.xlu0 %844  ;;  %v847_v60 = vpop.permute.xlu1 %846 }
 0x2b5   : > { %1084 = vrot.lane.b32.xlu1 %v885_v5, %s5610_s7  ;;  %942 = vrot.lane.b32.xlu0 %v886_v19, %s5609_s3  ;;  %v878_v59 = vsub.f32 %v6394_v47, %v845_v57  ;;  %v879_v61 = vsub.f32 %v6392_v46, %v847_v60 }
 0x2b7   : > { %v894_v62 = vmul.f32 0.25, %v878_v59  ;;  %v895_v63 = vmul.f32 0.25, %v879_v61  ;;  %v2171_v59 = vadd.f32 0.75, %v6285_v6 }
 0x2b9   : > { %944 = vrot.lane.b32.xlu1 %v887_v24, %s5609_s3  ;;  %1086 = vrot.lane.b32.xlu0 %v886_v19, %s5610_s7 }
 0x2bd   : > { %1088 = vrot.lane.b32.xlu1 %v887_v24, %s5610_s7  ;;  %946 = vrot.lane.b32.xlu0 %v888_v34, %s5609_s3  ;;  %v2168_v24 = vadd.f32 0.75, %v6273_v0 }
 0x2c1   : > { %948 = vrot.lane.b32.xlu1 %v889_v44, %s5609_s3  ;;  %1090 = vrot.lane.b32.xlu0 %v888_v34, %s5610_s7 }
 0x2c5   : > { %1092 = vrot.lane.b32.xlu1 %v889_v44, %s5610_s7  ;;  %950 = vrot.lane.b32.xlu0 %v890_v50, %s5609_s3 }
 0x2c9   : > { %952 = vrot.lane.b32.xlu1 %v891_v52, %s5609_s3  ;;  %1094 = vrot.lane.b32.xlu0 %v890_v50, %s5610_s7 }
 0x2cd   : > { %1096 = vrot.lane.b32.xlu1 %v891_v52, %s5610_s7  ;;  %954 = vrot.lane.b32.xlu0 %v892_v56, %s5609_s3 }
 0x2d1   : > { %956 = vrot.lane.b32.xlu1 %v893_v58, %s5609_s3  ;;  %1098 = vrot.lane.b32.xlu0 %v892_v56, %s5610_s7 }
 0x2d5   : > { %1100 = vrot.lane.b32.xlu1 %v893_v58, %s5610_s7  ;;  %958 = vrot.lane.b32.xlu0 %v894_v62, %s5609_s3 }
 0x2d9   : > { %960 = vrot.lane.b32.xlu1 %v895_v63, %s5609_s3  ;;  %1102 = vrot.lane.b32.xlu0 %v894_v62, %s5610_s7  ;;  %v902_v62 = vadd.f32 0.25, %v6291_v8  ;;  %s5630_s3 = smov 56  }
 0x2dd   : > { %1104 = vrot.lane.b32.xlu1 %v895_v63, %s5610_s7  ;;  %s5631_s7 = smov 60  }
 0x30f   : > { %v931_v5 = vpop.permute.xlu0 %930 }
 0x310   : > { %v978_v9 = vmul.f32 %v931_v5, %v898_v4  ;;  %v2184_v34 = vmul.f32 %v2168_v24, %v931_v5 }
 0x312   : > { %1010 = vrot.lane.b32.xlu0 %v978_v9, %s5612_s15 }
 0x313   : > { %v933_v19 = vpop.permute.xlu1 %932  ;;  %v1075_v20 = vpop.permute.xlu0 %1074 }
 0x314   : > { %v979_v25 = vmul.f32 %v933_v19, %v899_v15  ;;  %v1122_v28 = vmul.f32 %v1075_v20, %v898_v4  ;;  %v2185_v0 = vmul.f32 %v2169_v35, %v933_v19  ;;  %v2280_v49 = vmul.f32 %v2168_v24, %v1075_v20 }
 0x315   : > { %v2172_v20 = vadd.f32 0.75, %v6291_v8  ;;  %v904_v8 = vadd.f32 0.25, %v6298_v11 }
 0x316   : > { %1012 = vrot.lane.b32.xlu1 %v979_v25, %s5612_s15  ;;  %1154 = vrot.lane.b32.xlu0 %v1122_v28, %s5614_s26 }
 0x317   : > { %v1077_v29 = vpop.permute.xlu1 %1076  ;;  %v935_v48 = vpop.permute.xlu0 %934 }
 0x318   : > { %v1123_v44 = vmul.f32 %v1077_v29, %v899_v15  ;;  %v980_v50 = vmul.f32 %v935_v48, %v900_v45  ;;  %v2281_v53 = vmul.f32 %v2169_v35, %v1077_v29  ;;  %v2186_v58 = vmul.f32 %v2170_v55, %v935_v48 }
 0x319   : > { %v2173_v29 = vadd.f32 0.75, %v6288_v7  ;;  %v905_v48 = vadd.f32 0.25, %v6295_v10 }
 0x31a   : > { %1156 = vrot.lane.b32.xlu1 %v1123_v44, %s5614_s26  ;;  %2216 = vrot.lane.b32.xlu0 %v2184_v34, %s5612_s15 }
 0x31b   : > { %v937_v52 = vpop.permute.xlu1 %936  ;;  %v1079_v1 = vpop.permute.xlu0 %1078 }
 0x31c   : > { %v981_v54 = vmul.f32 %v937_v52, %v901_v51  ;;  %v1124_v56 = vmul.f32 %v1079_v1, %v900_v45  ;;  %v2187_v63 = vmul.f32 %v2171_v59, %v937_v52  ;;  %v2282_v4 = vmul.f32 %v2170_v55, %v1079_v1 }
 0x31d   : > { %v2174_v52 = vadd.f32 0.75, %v6298_v11  ;;  %v2175_v55 = vadd.f32 0.75, %v6295_v10  ;;  %v906_v11 = vadd.f32 0.25, %v6310_v17 }
 0x31e   : > { %2218 = vrot.lane.b32.xlu1 %v2185_v0, %s5612_s15  ;;  %2312 = vrot.lane.b32.xlu0 %v2280_v49, %s5614_s26 }
 0x31f   : > { %v1081_v57 = vpop.permute.xlu1 %1080  ;;  %v939_v61 = vpop.permute.xlu0 %938 }
 0x320   : > { %v1125_v60 = vmul.f32 %v1081_v57, %v901_v51  ;;  %v982_v5 = vmul.f32 %v939_v61, %v902_v62  ;;  %v2283_v6 = vmul.f32 %v2171_v59, %v1081_v57  ;;  %v2188_v28 = vmul.f32 %v2172_v20, %v939_v61 }
 0x322   : > { %2314 = vrot.lane.b32.xlu1 %v2281_v53, %s5614_s26  ;;  %1014 = vrot.lane.b32.xlu0 %v980_v50, %s5612_s15 }
 0x323   : > { %v941_v9 = vpop.permute.xlu1 %940  ;;  %v1083_v15 = vpop.permute.xlu0 %1082 }
 0x324   : > { %v983_v19 = vmul.f32 %v941_v9, %v903_v2  ;;  %v1126_v24 = vmul.f32 %v1083_v15, %v902_v62  ;;  %v2284_v44 = vmul.f32 %v2172_v20, %v1083_v15  ;;  %v2189_v45 = vmul.f32 %v2173_v29, %v941_v9 }
 0x326   : > { %1016 = vrot.lane.b32.xlu1 %v981_v54, %s5612_s15  ;;  %1158 = vrot.lane.b32.xlu0 %v1124_v56, %s5614_s26 }
 0x327   : > { %v1085_v25 = vpop.permute.xlu1 %1084  ;;  %v943_v35 = vpop.permute.xlu0 %942 }
 0x328   : > { %v1127_v34 = vmul.f32 %v1085_v25, %v903_v2  ;;  %v984_v0 = vmul.f32 %v943_v35, %v904_v8  ;;  %v2285_v7 = vmul.f32 %v2173_v29, %v1085_v25  ;;  %v2190_v54 = vmul.f32 %v2174_v52, %v943_v35 }
 0x329   : > { %v2176_v2 = vadd.f32 0.75, %v6310_v17  ;;  %v908_v17 = vadd.f32 0.25, %v6318_v21 }
 0x32a   : > { %1160 = vrot.lane.b32.xlu1 %v1125_v60, %s5614_s26  ;;  %2220 = vrot.lane.b32.xlu0 %v2186_v58, %s5612_s15  ;;  %v907_v60 = vadd.f32 0.25, %v6301_v12 }
 0x32b   : > { %v945_v49 = vpop.permute.xlu1 %944  ;;  %v1087_v50 = vpop.permute.xlu0 %1086 }
 0x32c   : > { %v985_v51 = vmul.f32 %v945_v49, %v905_v48  ;;  %v1128_v53 = vmul.f32 %v1087_v50, %v904_v8  ;;  %v2286_v58 = vmul.f32 %v2174_v52, %v1087_v50  ;;  %v2191_v59 = vmul.f32 %v2175_v55, %v945_v49 }
 0x32d   : > { %v2178_v8 = vadd.f32 0.75, %v6318_v21  ;;  %v2179_v49 = vadd.f32 0.75, %v6313_v18  ;;  %v910_v21 = vadd.f32 0.25, %v6334_v27 }
 0x32e   : > { %2222 = vrot.lane.b32.xlu1 %v2187_v63, %s5612_s15  ;;  %2316 = vrot.lane.b32.xlu0 %v2282_v4, %s5614_s26 }
 0x32f   : > { %v1089_v1 = vpop.permute.xlu1 %1088  ;;  %v947_v57 = vpop.permute.xlu0 %946 }
 0x330   : > { %v1129_v56 = vmul.f32 %v1089_v1, %v905_v48  ;;  %v986_v61 = vmul.f32 %v947_v57, %v906_v11  ;;  %v2287_v10 = vmul.f32 %v2175_v55, %v1089_v1  ;;  %v2192_v15 = vmul.f32 %v2176_v2, %v947_v57 }
 0x331   : > { %v2180_v57 = vadd.f32 0.75, %v6334_v27  ;;  %v912_v27 = vadd.f32 0.25, %v6376_v41 }
 0x332   : > { %2318 = vrot.lane.b32.xlu1 %v2283_v6, %s5614_s26  ;;  %1018 = vrot.lane.b32.xlu0 %v982_v5, %s5612_s15  ;;  %v2177_v6 = vadd.f32 0.75, %v6301_v12 }
 0x333   : > { %v949_v62 = vpop.permute.xlu1 %948  ;;  %v1091_v63 = vpop.permute.xlu0 %1090 }
 0x334   : > { %v987_v4 = vmul.f32 %v949_v62, %v907_v60  ;;  %v1130_v5 = vmul.f32 %v1091_v63, %v906_v11  ;;  %v2193_v25 = vmul.f32 %v2177_v6, %v949_v62 }
 0x336   : > { %1020 = vrot.lane.b32.xlu1 %v983_v19, %s5612_s15  ;;  %1162 = vrot.lane.b32.xlu0 %v1126_v24, %s5614_s26  ;;  %v2288_v24 = vmul.f32 %v2176_v2, %v1091_v63 }
 0x337   : > { %v1093_v9 = vpop.permute.xlu1 %1092  ;;  %v951_v20 = vpop.permute.xlu0 %950 }
 0x338   : > { %v1131_v19 = vmul.f32 %v1093_v9, %v907_v60  ;;  %v988_v29 = vmul.f32 %v951_v20, %v908_v17  ;;  %v2289_v12 = vmul.f32 %v2177_v6, %v1093_v9  ;;  %v2181_v60 = vadd.f32 0.75, %v6331_v26 }
 0x33a   : > { %1164 = vrot.lane.b32.xlu1 %v1127_v34, %s5614_s26  ;;  %2224 = vrot.lane.b32.xlu0 %v2188_v28, %s5612_s15  ;;  %v909_v28 = vadd.f32 0.25, %v6313_v18 }
 0x33b   : > { %v953_v34 = vpop.permute.xlu1 %952  ;;  %v1095_v35 = vpop.permute.xlu0 %1094 }
 0x33c   : > { %v2195_v52 = vmul.f32 %v2179_v49, %v953_v34 }
 0x33e   : > { %2226 = vrot.lane.b32.xlu1 %v2189_v45, %s5612_s15  ;;  %2320 = vrot.lane.b32.xlu0 %v2284_v44, %s5614_s26  ;;  %v989_v44 = vmul.f32 %v953_v34, %v909_v28  ;;  %v1132_v45 = vmul.f32 %v1095_v35, %v908_v17 }
 0x33f   : > { %v1097_v48 = vpop.permute.xlu1 %1096 }
 0x340   : > { %v1133_v50 = vmul.f32 %v1097_v48, %v909_v28  ;;  %v2291_v18 = vmul.f32 %v2179_v49, %v1097_v48 }
 0x342   : > { %2322 = vrot.lane.b32.xlu1 %v2285_v7, %s5614_s26  ;;  %1022 = vrot.lane.b32.xlu0 %v984_v0, %s5612_s15  ;;  %v2194_v0 = vmul.f32 %v2178_v8, %v951_v20  ;;  %v955_v7 = vpop.permute.xlu0 %954 }
 0x343   : > { %v990_v1 = vmul.f32 %v955_v7, %v910_v21 }
 0x346   : > { %1024 = vrot.lane.b32.xlu1 %v985_v51, %s5612_s15  ;;  %1166 = vrot.lane.b32.xlu0 %v1128_v53, %s5614_s26  ;;  %v2290_v51 = vmul.f32 %v2178_v8, %v1095_v35  ;;  %v911_v53 = vadd.f32 0.25, %v6331_v26  ;;  %v1099_v55 = vpop.permute.xlu0 %1098  ;;  %v913_v26 = vadd.f32 0.25, %v6373_v40 }
 0x347   : > { %v2292_v63 = vmul.f32 %v2180_v57, %v1099_v55 }
 0x34a   : > { %1168 = vrot.lane.b32.xlu1 %v1129_v56, %s5614_s26  ;;  %2228 = vrot.lane.b32.xlu0 %v2190_v54, %s5612_s15  ;;  %v957_v54 = vpop.permute.xlu1 %956  ;;  %v959_v62 = vpop.permute.xlu0 %958 }
 0x34b   : > { %v991_v56 = vmul.f32 %v957_v54, %v911_v53  ;;  %v992_v2 = vmul.f32 %v959_v62, %v912_v27 }
 0x34e   : > { %2230 = vrot.lane.b32.xlu1 %v2191_v59, %s5612_s15  ;;  %2324 = vrot.lane.b32.xlu0 %v2286_v58, %s5614_s26  ;;  %v1134_v58 = vmul.f32 %v1099_v55, %v910_v21  ;;  %v1101_v11 = vpop.permute.xlu1 %1100  ;;  %v2196_v59 = vmul.f32 %v2180_v57, %v955_v7 }
 0x34f   : > { %v2293_v9 = vmul.f32 %v2181_v60, %v1101_v11 }
 0x352   : > { %2326 = vrot.lane.b32.xlu1 %v2287_v10, %s5614_s26  ;;  %1026 = vrot.lane.b32.xlu0 %v986_v61, %s5612_s15  ;;  %v1135_v61 = vmul.f32 %v1101_v11, %v911_v53  ;;  %v2197_v10 = vmul.f32 %v2181_v60, %v957_v54 }
 0x356   : > { %1028 = vrot.lane.b32.xlu1 %v987_v4, %s5612_s15  ;;  %1170 = vrot.lane.b32.xlu0 %v1130_v5, %s5614_s26  ;;  %v961_v4 = vpop.permute.xlu1 %960  ;;  %v1103_v5 = vpop.permute.xlu0 %1102 }
 0x357   : > { %v1136_v6 = vmul.f32 %v1103_v5, %v912_v27 }
 0x35a   : > { %1172 = vrot.lane.b32.xlu1 %v1131_v19, %s5614_s26  ;;  %2232 = vrot.lane.b32.xlu0 %v2192_v15, %s5612_s15  ;;  %v2182_v15 = vadd.f32 0.75, %v6376_v41  ;;  %v993_v19 = vmul.f32 %v961_v4, %v913_v26  ;;  %v1105_v20 = vpop.permute.xlu1 %1104 }
 0x35b   : > { %v1137_v28 = vmul.f32 %v1105_v20, %v913_v26 }
 0x35c   : > { %v2198_v17 = vmul.f32 %v2182_v15, %v959_v62  ;;  %v8247_v62 = vmov 0  }
 0x35e   : > { %2234 = vrot.lane.b32.xlu1 %v2193_v25, %s5612_s15  ;;  %2328 = vrot.lane.b32.xlu0 %v2288_v24, %s5614_s26  ;;  %v2183_v25 = vadd.f32 0.75, %v6373_v40 }
 0x360   : > { %v2295_v49 = vmul.f32 %v2183_v25, %v1105_v20 }
 0x362   : > { %2330 = vrot.lane.b32.xlu1 %v2289_v12, %s5614_s26  ;;  %1030 = vrot.lane.b32.xlu0 %v988_v29, %s5612_s15  ;;  %v2199_v12 = vmul.f32 %v2183_v25, %v961_v4 }
 0x366   : > { %1032 = vrot.lane.b32.xlu1 %v989_v44, %s5612_s15  ;;  %1174 = vrot.lane.b32.xlu0 %v1132_v45, %s5614_s26  ;;  %v2294_v44 = vmul.f32 %v2182_v15, %v1103_v5 }
 0x36a   : > { %1176 = vrot.lane.b32.xlu1 %v1133_v50, %s5614_s26  ;;  %2236 = vrot.lane.b32.xlu0 %v2194_v0, %s5612_s15 }
 0x36e   : > { %2238 = vrot.lane.b32.xlu1 %v2195_v52, %s5612_s15  ;;  %2332 = vrot.lane.b32.xlu0 %v2290_v51, %s5614_s26 }
 0x372   : > { %2334 = vrot.lane.b32.xlu1 %v2291_v18, %s5614_s26  ;;  %1034 = vrot.lane.b32.xlu0 %v990_v1, %s5612_s15 }
 0x376   : > { %1036 = vrot.lane.b32.xlu1 %v991_v56, %s5612_s15  ;;  %1178 = vrot.lane.b32.xlu0 %v1134_v58, %s5614_s26 }
 0x37a   : > { %1180 = vrot.lane.b32.xlu1 %v1135_v61, %s5614_s26  ;;  %2240 = vrot.lane.b32.xlu0 %v2196_v59, %s5612_s15 }
 0x37e   : > { %2242 = vrot.lane.b32.xlu1 %v2197_v10, %s5612_s15  ;;  %2336 = vrot.lane.b32.xlu0 %v2292_v63, %s5614_s26 }
 0x382   : > { %2338 = vrot.lane.b32.xlu1 %v2293_v9, %s5614_s26  ;;  %1038 = vrot.lane.b32.xlu0 %v992_v2, %s5612_s15 }
 0x384   : > { %v1011_v24 = vpop.permute.xlu0 %1010 }
 0x385   : > { %v1058_v29 = vadd.f32 %v6303_v13, %v1011_v24 }
 0x386   : > { %1040 = vrot.lane.b32.xlu1 %v993_v19, %s5612_s15  ;;  %1182 = vrot.lane.b32.xlu0 %v1136_v6, %s5614_s26 }
 0x387   : > { %v1378_v8 = vmax.f32 %v1058_v29, 0.0  ;;  %vm1218_vm2 = vcmp.ge.f32.partialorder %v1058_v29, -1.0  ;;  %vm1234_vm3 = vcmp.le.f32.partialorder %v1058_v29, 16.0 }
 0x388   : > { %v1013_v34 = vpop.permute.xlu1 %1012  ;;  %v1155_v41 = vpop.permute.xlu0 %1154  ;;  %vm1250_vm5 = vmand %vm1218_vm2, %vm1234_vm3 }
 0x389   : > { %v6544_v35 = vadd.f32 %v6322_v22, %v1013_v34  ;;  %v6552_v0 = vadd.f32 %v6303_v13, %v1155_v41  ;;  %v1394_v50 = vmin.f32 %v1378_v8, 15.0  ;;  %v4288_v54 = vsel %vm1250_vm5, 1.0, %v8245_v3 }
 0x38a   : > { %1184 = vrot.lane.b32.xlu1 %v1137_v28, %s5614_s26  ;;  %2244 = vrot.lane.b32.xlu0 %v2198_v17, %s5612_s15 }
 0x38b   : > { %vm1219_vm0 = vcmp.ge.f32.partialorder %v6544_v35, -1.0  ;;  %vm1235_vm1 = vcmp.le.f32.partialorder %v6544_v35, 16.0  ;;  %vm1298_vm8 = vcmp.ge.f32.partialorder %v6552_v0, -1.0  ;;  %vm1314_vm9 = vcmp.le.f32.partialorder %v6552_v0, 16.0 }
 0x38c   : > { %v1157_v40 = vpop.permute.xlu1 %1156  ;;  %v2217_v45 = vpop.permute.xlu0 %2216  ;;  %vm1251_vm4 = vmand %vm1219_vm0, %vm1235_vm1 }
 0x38d   : > { %v1203_v48 = vadd.f32 %v6322_v22, %v1157_v40  ;;  %v4289_v21 = vsel %vm1251_vm4, 1.0, %v8245_v3  ;;  %v6566_v55 = vadd.f32 %v6303_v13, %v2217_v45  ;;  %vm1330_vm11 = vmand %vm1298_vm8, %vm1314_vm9 }
 0x38e   : > { %2246 = vrot.lane.b32.xlu1 %v2199_v12, %s5612_s15  ;;  %2340 = vrot.lane.b32.xlu0 %v2294_v44, %s5614_s26  ;;  %v4785_v57 = vpack.i.bf16 %v4289_v21, %v4288_v54  ;;  %s748_s15 = scalar_lea.vmem [#allocation29], %s4260_s14 }
 0x38f   : > { %vm1299_vm6 = vcmp.ge.f32.partialorder %v1203_v48, -1.0  ;;  %vm1315_vm7 = vcmp.le.f32.partialorder %v1203_v48, 16.0  ;;  %v1411_v52 = vmax.f32 %v1203_v48, 0.0  ;;  %vm2376_vm14 = vcmp.ge.f32.partialorder %v6566_v55, -1.0 }
 0x390   : > { %v2219_v7 = vpop.permute.xlu1 %2218  ;;  %v2313_v51 = vpop.permute.xlu0 %2312  ;;  %vm1331_vm10 = vmand %vm1299_vm6, %vm1315_vm7  ;;  %vm2392_vm15 = vcmp.le.f32.partialorder %v6566_v55, 16.0 }
 0x391   : > { %v6558_v53 = vadd.f32 %v6322_v22, %v2219_v7  ;;  %v2360_v1 = vadd.f32 %v6303_v13, %v2313_v51  ;;  %v1427_v58 = vmin.f32 %v1411_v52, 15.0  ;;  %v4305_v59 = vsel %vm1331_vm10, 1.0, %v8245_v3  ;;  %vm2408_vm1 = vmand %vm2376_vm14, %vm2392_vm15 }
 0x392   : > { %2342 = vrot.lane.b32.xlu1 %v2295_v49, %s5614_s26  ;;  %1444 = vperm.xlu0 %4880, %v1394_v50   ;;  %v4304_v13 = vsel %vm1330_vm11, 1.0, %v8245_v3  ;;  %v4320_v6 = vsel %vm2408_vm1, 1.0, %v8245_v3  ;;  %s4005_s26 = sshll.u32 %s748_s15, 4  ;;  %s8144_s26 = int_to_ptr.vmem [resolvable:$true] %s4005_s26 }
 0x393   : > { %vm2377_vm12 = vcmp.ge.f32.partialorder %v6558_v53, -1.0  ;;  %vm2393_vm13 = vcmp.le.f32.partialorder %v6558_v53, 16.0  ;;  %v2568_v11 = vmax.f32 %v2360_v1, 0.0  ;;  %v4791_v4 = vpack.i.bf16 %v4305_v59, %v4304_v13 }
 0x394   : > { %v2315_v18 = vpop.permute.xlu1 %2314  ;;  %v1015_v56 = vpop.permute.xlu0 %1014  ;;  %vm2409_vm0 = vmand %vm2377_vm12, %vm2393_vm13  ;;  %vm2456_vm4 = vcmp.ge.f32.partialorder %v2360_v1, -1.0  ;;  %vm2472_vm5 = vcmp.le.f32.partialorder %v2360_v1, 16.0 }
 0x395   : > { %v6572_v60 = vadd.f32 %v6322_v22, %v2315_v18  ;;  %v1060_v61 = vadd.f32 %v6305_v14, %v1015_v56  ;;  %v2584_v10 = vmin.f32 %v2568_v11, 15.0  ;;  %v4321_v2 = vsel %vm2409_vm0, 1.0, %v8245_v3  ;;  %vm2488_vm7 = vmand %vm2456_vm4, %vm2472_vm5 }
 0x396   : > { %4883 = vset.pattern.permute.xlu0 %v8247_v62  ;;  %4786 = vperm.xlu1 %4784, %v4785_v57   ;;  %v4797_v20 = vpack.i.bf16 %v4321_v2, %v4320_v6  ;;  %v4336_v41 = vsel %vm2488_vm7, 1.0, %v8245_v3 }
 0x397   : > { %1812 = vperm.xlu0 %4883, %v1427_v58   ;;  %vm2457_vm2 = vcmp.ge.f32.partialorder %v6572_v60, -1.0  ;;  %vm2473_vm3 = vcmp.le.f32.partialorder %v6572_v60, 16.0  ;;  %v1380_v22 = vmax.f32 %v1060_v61, 0.0  ;;  %vm1220_vm10 = vcmp.ge.f32.partialorder %v1060_v61, -1.0 }
 0x398   : > { %v1017_v63 = vpop.permute.xlu1 %1016  ;;  %v1159_v27 = vpop.permute.xlu0 %1158  ;;  %vm2489_vm6 = vmand %vm2457_vm2, %vm2473_vm3  ;;  %vm1236_vm11 = vcmp.le.f32.partialorder %v1060_v61, 16.0 }
 0x399   : > { %v6584_v5 = vadd.f32 %v6326_v23, %v1017_v63  ;;  %v1204_v9 = vadd.f32 %v6305_v14, %v1159_v27  ;;  %v1396_v19 = vmin.f32 %v1380_v22, 15.0  ;;  %v4337_v17 = vsel %vm2489_vm6, 1.0, %v8245_v3  ;;  %vm1252_vm13 = vmand %vm1220_vm10, %vm1236_vm11 }
 0x39a   : > { %4790 = vset.pattern.permute.xlu1 %v8247_v62  ;;  %v4803_v44 = vpack.i.bf16 %v4337_v17, %v4336_v41  ;;  %v4290_v7 = vsel %vm1252_vm13, 1.0, %v8245_v3 }
 0x39b   : > { %4792 = vperm.xlu1 %4790, %v4791_v4   ;;  %2954 = vperm.xlu0 %4883, %v2584_v10   ;;  %vm1221_vm8 = vcmp.ge.f32.partialorder %v6584_v5, -1.0  ;;  %vm1237_vm9 = vcmp.le.f32.partialorder %v6584_v5, 16.0  ;;  %v1412_v24 = vmax.f32 %v1204_v9, 0.0  ;;  %vm1300_vm0 = vcmp.ge.f32.partialorder %v1204_v9, -1.0 }
 0x39c   : > { %v1161_v26 = vpop.permute.xlu1 %1160  ;;  %v2221_v15 = vpop.permute.xlu0 %2220  ;;  %vm1253_vm12 = vmand %vm1221_vm8, %vm1237_vm9  ;;  %vm1316_vm1 = vcmp.le.f32.partialorder %v1204_v9, 16.0 }
 0x39d   : > { %v6594_v25 = vadd.f32 %v6326_v23, %v1161_v26  ;;  %v2266_v28 = vadd.f32 %v6305_v14, %v2221_v15  ;;  %v1428_v12 = vmin.f32 %v1412_v24, 15.0  ;;  %v4291_v48 = vsel %vm1253_vm12, 1.0, %v8245_v3  ;;  %vm1332_vm3 = vmand %vm1300_vm0, %vm1316_vm1 }
 0x39e   : > { %v4809_v1 = vpack.i.bf16 %v4291_v48, %v4290_v7  ;;  %v4306_v57 = vsel %vm1332_vm3, 1.0, %v8245_v3 }
 0x39f   : > { %4796 = vset.pattern.permute.xlu1 %v8251_v16  ;;  %4886 = vset.pattern.permute.xlu0 %v8251_v16  ;;  %vm1301_vm14 = vcmp.ge.f32.partialorder %v6594_v25, -1.0  ;;  %vm1317_vm15 = vcmp.le.f32.partialorder %v6594_v25, 16.0  ;;  %v2538_v8 = vmax.f32 %v2266_v28, 0.0  ;;  %vm2378_vm6 = vcmp.ge.f32.partialorder %v2266_v28, -1.0 }
 0x3a0   : > { %v2223_v29 = vpop.permute.xlu1 %2222  ;;  %4798 = vperm.xlu1 %4796, %v4797_v20   ;;  %1454 = vperm.xlu0 %4886, %v1396_v19   ;;  %v2317_v34 = vpop.permute.xlu0 %2316  ;;  %vm1333_vm2 = vmand %vm1301_vm14, %vm1317_vm15  ;;  %vm2394_vm7 = vcmp.le.f32.partialorder %v2266_v28, 16.0 }
 0x3a1   : > { %v6606_v49 = vadd.f32 %v6326_v23, %v2223_v29  ;;  %v2362_v50 = vadd.f32 %v6305_v14, %v2317_v34  ;;  %v2554_v51 = vmin.f32 %v2538_v8, 15.0  ;;  %v4307_v14 = vsel %vm1333_vm2, 1.0, %v8245_v3  ;;  %vm2410_vm9 = vmand %vm2378_vm6, %vm2394_vm7 }
 0x3a2   : > { %v4815_v13 = vpack.i.bf16 %v4307_v14, %v4306_v57  ;;  %v4322_v2 = vsel %vm2410_vm9, 1.0, %v8245_v3 }
 0x3a3   : > { %vm2379_vm4 = vcmp.ge.f32.partialorder %v6606_v49, -1.0  ;;  %vm2395_vm5 = vcmp.le.f32.partialorder %v6606_v49, 16.0  ;;  %v2570_v54 = vmax.f32 %v2362_v50, 0.0  ;;  %vm2458_vm12 = vcmp.ge.f32.partialorder %v2362_v50, -1.0 }
 0x3a4   : > { %v2319_v40 = vpop.permute.xlu1 %2318  ;;  %4802 = vset.pattern.permute.xlu1 %v8247_v62  ;;  %4888 = vset.pattern.permute.xlu0 %v8247_v62  ;;  %v1019_v45 = vpop.permute.xlu0 %1018  ;;  %vm2411_vm8 = vmand %vm2379_vm4, %vm2395_vm5  ;;  %vm2474_vm13 = vcmp.le.f32.partialorder %v2362_v50, 16.0 }
 0x3a5   : > { %4804 = vperm.xlu1 %4802, %v4803_v44   ;;  %1817 = vperm.xlu0 %4888, %v1428_v12   ;;  %v6618_v18 = vadd.f32 %v6326_v23, %v2319_v40  ;;  %v2586_v61 = vmin.f32 %v2570_v54, 15.0  ;;  %v6625_v23 = vadd.f32 %v6340_v31, %v1019_v45  ;;  %v4323_v63 = vsel %vm2411_vm8, 1.0, %v8245_v3  ;;  %vm2490_vm1 = vmand %vm2458_vm12, %vm2474_vm13 }
 0x3a6   : > { %v4821_v26 = vpack.i.bf16 %v4323_v63, %v4322_v2  ;;  %v4338_v17 = vsel %vm2490_vm1, 1.0, %v8245_v3 }
 0x3a7   : > { %vm2459_vm10 = vcmp.ge.f32.partialorder %v6618_v18, -1.0  ;;  %vm2475_vm11 = vcmp.le.f32.partialorder %v6618_v18, 16.0  ;;  %vm1222_vm15 = vcmp.ge.f32.partialorder %v6625_v23, -1.0  ;;  %vm1238_vm0 = vcmp.le.f32.partialorder %v6625_v23, 16.0 }
 0x3a8   : > { %v1021_v21 = vpop.permute.xlu1 %1020  ;;  %v1163_v52 = vpop.permute.xlu0 %1162  ;;  %vm2491_vm14 = vmand %vm2459_vm10, %vm2475_vm11 }
 0x3a9   : > { %4808 = vset.pattern.permute.xlu1 %v8251_v16  ;;  %4890 = vset.pattern.permute.xlu0 %v8251_v16  ;;  %v1206_v56 = vadd.f32 %v6340_v31, %v1163_v52  ;;  %v6631_v27 = vadd.f32 %v6338_v30, %v1021_v21  ;;  %v4339_v15 = vsel %vm2491_vm14, 1.0, %v8245_v3  ;;  %vm1254_vm4 = vmand %vm1222_vm15, %vm1238_vm0 }
 0x3aa   : > { %4810 = vperm.xlu1 %4808, %v4809_v1   ;;  %2612 = vperm.xlu0 %4890, %v2554_v51   ;;  %v4827_v29 = vpack.i.bf16 %v4339_v15, %v4338_v17  ;;  %v4292_v44 = vsel %vm1254_vm4, 1.0, %v8245_v3 }
 0x3ab   : > { %v1414_v58 = vmax.f32 %v1206_v56, 0.0  ;;  %vm1223_vm2 = vcmp.ge.f32.partialorder %v6631_v27, -1.0  ;;  %vm1239_vm3 = vcmp.le.f32.partialorder %v6631_v27, 16.0  ;;  %vm1302_vm6 = vcmp.ge.f32.partialorder %v1206_v56, -1.0 }
 0x3ac   : > { %v1165_v11 = vpop.permute.xlu1 %1164  ;;  %v2225_v59 = vpop.permute.xlu0 %2224  ;;  %vm1255_vm5 = vmand %vm1223_vm2, %vm1239_vm3  ;;  %vm1318_vm7 = vcmp.le.f32.partialorder %v1206_v56, 16.0 }
 0x3ad   : > { %v1430_v10 = vmin.f32 %v1414_v58, 15.0  ;;  %v6646_v6 = vadd.f32 %v6338_v30, %v1165_v11  ;;  %v6655_v34 = vadd.f32 %v6340_v31, %v2225_v59  ;;  %v4293_v8 = vsel %vm1255_vm5, 1.0, %v8245_v3  ;;  %vm1334_vm10 = vmand %vm1302_vm6, %vm1318_vm7 }
 0x3ae   : > { %4814 = vset.pattern.permute.xlu1 %v8247_v62  ;;  %4892 = vset.pattern.permute.xlu0 %v8247_v62  ;;  %v4833_v7 = vpack.i.bf16 %v4293_v8, %v4292_v44  ;;  %v4308_v51 = vsel %vm1334_vm10, 1.0, %v8245_v3 }
 0x3af   : > { %4816 = vperm.xlu1 %4814, %v4815_v13   ;;  %2964 = vperm.xlu0 %4892, %v2586_v61   ;;  %vm1303_vm8 = vcmp.ge.f32.partialorder %v6646_v6, -1.0  ;;  %vm1319_vm9 = vcmp.le.f32.partialorder %v6646_v6, 16.0  ;;  %vm2380_vm12 = vcmp.ge.f32.partialorder %v6655_v34, -1.0  ;;  %vm2396_vm13 = vcmp.le.f32.partialorder %v6655_v34, 16.0 }
 0x3b0   : > { %v2227_v4 = vpop.permute.xlu1 %2226  ;;  %v2321_v22 = vpop.permute.xlu0 %2320  ;;  %vm1335_vm11 = vmand %vm1303_vm8, %vm1319_vm9 }
 0x3b1   : > { %v6639_v9 = vadd.f32 %v6340_v31, %v2321_v22  ;;  %v6661_v40 = vadd.f32 %v6338_v30, %v2227_v4  ;;  %v4309_v21 = vsel %vm1335_vm11, 1.0, %v8245_v3  ;;  %vm2412_vm0 = vmand %vm2380_vm12, %vm2396_vm13 }
 0x3b2   : > { %v4839_v56 = vpack.i.bf16 %v4309_v21, %v4308_v51  ;;  %v4324_v58 = vsel %vm2412_vm0, 1.0, %v8245_v3 }
 0x3b3   : > { %4820 = vset.pattern.permute.xlu1 %v8251_v16  ;;  %1827 = vperm.xlu0 %4892, %v1430_v10   ;;  %v2572_v19 = vmax.f32 %v6639_v9, 0.0  ;;  %vm2381_vm14 = vcmp.ge.f32.partialorder %v6661_v40, -1.0  ;;  %vm2397_vm15 = vcmp.le.f32.partialorder %v6661_v40, 16.0  ;;  %vm2460_vm2 = vcmp.ge.f32.partialorder %v6639_v9, -1.0 }
 0x3b4   : > { %v2323_v20 = vpop.permute.xlu1 %2322  ;;  %4822 = vperm.xlu1 %4820, %v4821_v26   ;;  %v1023_v24 = vpop.permute.xlu0 %1022  ;;  %vm2413_vm1 = vmand %vm2381_vm14, %vm2397_vm15  ;;  %vm2476_vm3 = vcmp.le.f32.partialorder %v6639_v9, 16.0 }
 0x3b5   : > { %v2588_v28 = vmin.f32 %v2572_v19, 15.0  ;;  %v6675_v52 = vadd.f32 %v6338_v30, %v2323_v20  ;;  %v6682_v57 = vadd.f32 %v6344_v33, %v1023_v24  ;;  %v4325_v11 = vsel %vm2413_vm1, 1.0, %v8245_v3  ;;  %vm2492_vm6 = vmand %vm2460_vm2, %vm2476_vm3 }
 0x3b6   : > { %v4845_v4 = vpack.i.bf16 %v4325_v11, %v4324_v58  ;;  %v4340_v22 = vsel %vm2492_vm6, 1.0, %v8245_v3 }
 0x3b7   : > { %2974 = vperm.xlu0 %4892, %v2588_v28   ;;  %vm2461_vm4 = vcmp.ge.f32.partialorder %v6675_v52, -1.0  ;;  %vm2477_vm5 = vcmp.le.f32.partialorder %v6675_v52, 16.0  ;;  %vm1224_vm8 = vcmp.ge.f32.partialorder %v6682_v57, -1.0  ;;  %vm1240_vm9 = vcmp.le.f32.partialorder %v6682_v57, 16.0 }
 0x3b8   : > { %v1025_v41 = vpop.permute.xlu1 %1024  ;;  %4826 = vset.pattern.permute.xlu1 %v8247_v62  ;;  %v1167_v12 = vpop.permute.xlu0 %1166  ;;  %vm2493_vm7 = vmand %vm2461_vm4, %vm2477_vm5 }
 0x3b9   : > { %4828 = vperm.xlu1 %4826, %v4827_v29   ;;  %v6664_v45 = vadd.f32 %v6344_v33, %v1167_v12  ;;  %v6691_v59 = vadd.f32 %v6342_v32, %v1025_v41  ;;  %v4341_v2 = vsel %vm2493_vm7, 1.0, %v8245_v3  ;;  %vm1256_vm12 = vmand %vm1224_vm8, %vm1240_vm9 }
 0x3ba   : > { %v4851_v20 = vpack.i.bf16 %v4341_v2, %v4340_v22  ;;  %v4294_v41 = vsel %vm1256_vm12, 1.0, %v8245_v3 }
 0x3bb   : > { %v1416_v31 = vmax.f32 %v6664_v45, 0.0  ;;  %vm1225_vm10 = vcmp.ge.f32.partialorder %v6691_v59, -1.0  ;;  %vm1241_vm11 = vcmp.le.f32.partialorder %v6691_v59, 16.0  ;;  %vm1304_vm14 = vcmp.ge.f32.partialorder %v6664_v45, -1.0 }
 0x3bc   : > { %v1169_v48 = vpop.permute.xlu1 %1168  ;;  %v2229_v50 = vpop.permute.xlu0 %2228  ;;  %vm1257_vm13 = vmand %vm1225_vm10, %vm1241_vm11  ;;  %vm1320_vm15 = vcmp.le.f32.partialorder %v6664_v45, 16.0 }
 0x3bd   : > { %4832 = vset.pattern.permute.xlu1 %v8251_v16  ;;  %v1432_v1 = vmin.f32 %v1416_v31, 15.0  ;;  %v6704_v9 = vadd.f32 %v6342_v32, %v1169_v48  ;;  %v6716_v24 = vadd.f32 %v6344_v33, %v2229_v50  ;;  %v4295_v12 = vsel %vm1257_vm13, 1.0, %v8245_v3  ;;  %vm1336_vm2 = vmand %vm1304_vm14, %vm1320_vm15 }
 0x3be   : > { %4834 = vperm.xlu1 %4832, %v4833_v7   ;;  %v4857_v31 = vpack.i.bf16 %v4295_v12, %v4294_v41  ;;  %v4310_v48 = vsel %vm1336_vm2, 1.0, %v8245_v3  ;;  %v1379_v41 = vmax.f32 %v6544_v35, 0.0  ;;  %v1410_v35 = vmax.f32 %v6552_v0, 0.0  ;;  %v5006_v0 = vld [vmem:[%s6226_s28 + $0x40] sm:$0xff]  }
 0x3bf   : > { %1837 = vperm.xlu0 %4892, %v1432_v1   ;;  %vm1305_vm0 = vcmp.ge.f32.partialorder %v6704_v9, -1.0  ;;  %vm1321_vm1 = vcmp.le.f32.partialorder %v6704_v9, 16.0  ;;  %vm2382_vm4 = vcmp.ge.f32.partialorder %v6716_v24, -1.0  ;;  %vm2398_vm5 = vcmp.le.f32.partialorder %v6716_v24, 16.0  ;;  %4390 = vmatprep.subr.bf16.mxu0 %v5006_v0 }
 0x3c0   : > { %v2231_v54 = vpop.permute.xlu1 %2230  ;;  %v2325_v14 = vpop.permute.xlu0 %2324  ;;  %vm1337_vm3 = vmand %vm1305_vm0, %vm1321_vm1 }
 0x3c1   : > { %v6685_v30 = vadd.f32 %v6344_v33, %v2325_v14  ;;  %v6727_v44 = vadd.f32 %v6342_v32, %v2231_v54  ;;  %v4311_v50 = vsel %vm1337_vm3, 1.0, %v8245_v3  ;;  %vm2414_vm8 = vmand %vm2382_vm4, %vm2398_vm5 }
 0x3c2   : > { %4838 = vset.pattern.permute.xlu1 %v8247_v62  ;;  %v4863_v14 = vpack.i.bf16 %v4311_v50, %v4310_v48 }
 0x3c3   : > { %4840 = vperm.xlu1 %4838, %v4839_v56   ;;  %v2574_v61 = vmax.f32 %v6685_v30, 0.0  ;;  %vm2383_vm6 = vcmp.ge.f32.partialorder %v6727_v44, -1.0  ;;  %vm2399_vm7 = vcmp.le.f32.partialorder %v6727_v44, 16.0  ;;  %vm2462_vm10 = vcmp.ge.f32.partialorder %v6685_v30, -1.0 }
 0x3c4   : > { %v2327_v13 = vpop.permute.xlu1 %2326  ;;  %v6694_v63 = vpop.permute.xlu0 %1026  ;;  %vm2415_vm9 = vmand %vm2383_vm6, %vm2399_vm7  ;;  %vm2478_vm11 = vcmp.le.f32.partialorder %v6685_v30, 16.0  ;;  %v4326_v56 = vsel %vm2414_vm8, 1.0, %v8245_v3 }
 0x3c5   : > { %v2590_v10 = vmin.f32 %v2574_v61, 15.0  ;;  %v6739_v7 = vadd.f32 %v6342_v32, %v2327_v13  ;;  %v4327_v58 = vsel %vm2415_vm9, 1.0, %v8245_v3  ;;  %vm2494_vm14 = vmand %vm2462_vm10, %vm2478_vm11 }
 0x3c6   : > { %v4869_v13 = vpack.i.bf16 %v4327_v58, %v4326_v56  ;;  %v1426_v58 = vmin.f32 %v1410_v35, 15.0 }
 0x3c7   : > { %4844 = vset.pattern.permute.xlu1 %v8251_v16  ;;  %2984 = vperm.xlu0 %4892, %v2590_v10   ;;  %vm2463_vm12 = vcmp.ge.f32.partialorder %v6739_v7, -1.0  ;;  %vm2479_vm13 = vcmp.le.f32.partialorder %v6739_v7, 16.0  ;;  %v4342_v10 = vsel %vm2494_vm14, 1.0, %v8245_v3 }
 0x3c8   : > { %v6706_v26 = vpop.permute.xlu1 %1028  ;;  %4846 = vperm.xlu1 %4844, %v4845_v4   ;;  %v1171_v15 = vpop.permute.xlu0 %1170  ;;  %vm2495_vm15 = vmand %vm2463_vm12, %vm2479_vm13 }
 0x3c9   : > { %v6709_v19 = vadd.f32 %v6354_v37, %v1171_v15  ;;  %v4343_v4 = vsel %vm2495_vm15, 1.0, %v8245_v3 }
 0x3cb   : > { %v1418_v17 = vmax.f32 %v6709_v19, 0.0 }
 0x3cc   : > { %v6719_v28 = vpop.permute.xlu1 %1172  ;;  %4850 = vset.pattern.permute.xlu1 %v8247_v62  ;;  %v6722_v29 = vpop.permute.xlu0 %2232 }
 0x3cd   : > { %4852 = vperm.xlu1 %4850, %v4851_v20   ;;  %v1434_v8 = vmin.f32 %v1418_v17, 15.0  ;;  %v4875_v17 = vpack.i.bf16 %v4343_v4, %v4342_v10 }
 0x3cf   : > { %1847 = vperm.xlu0 %4892, %v1434_v8  }
 0x3d0   : > { %v6731_v33 = vpop.permute.xlu1 %2234  ;;  %v2329_v45 = vpop.permute.xlu0 %2328 }
 0x3d1   : > { %4856 = vset.pattern.permute.xlu1 %v8251_v16  ;;  %v6742_v51 = vadd.f32 %v6354_v37, %v2329_v45 }
 0x3d2   : > { %4858 = vperm.xlu1 %4856, %v4857_v31   ;;  %v1395_v31 = vmin.f32 %v1379_v41, 15.0 }
 0x3d3   : > { %v2576_v21 = vmax.f32 %v6742_v51, 0.0 }
 0x3d4   : > { %v6745_v1 = vpop.permute.xlu1 %2330  ;;  %v6747_v54 = vpop.permute.xlu0 %1030 }
 0x3d5   : > { %v2592_v32 = vmin.f32 %v2576_v21, 15.0 }
 0x3d6   : > { %4862 = vset.pattern.permute.xlu1 %v8247_v62 }
 0x3d7   : > { %4864 = vperm.xlu1 %4862, %v4863_v14   ;;  %2994 = vperm.xlu0 %4892, %v2592_v32  }
 0x3d8   : > { %v6756_v11 = vpop.permute.xlu1 %1032  ;;  %v1175_v61 = vpop.permute.xlu0 %1174 }
 0x3d9   : > { %v6759_v30 = vadd.f32 %v6358_v39, %v1175_v61  ;;  %v2536_v61 = vmax.f32 %v6566_v55, 0.0  ;;  %v2537_v55 = vmax.f32 %v6558_v53, 0.0 }
 0x3db   : > { %4868 = vset.pattern.permute.xlu1 %v8251_v16  ;;  %v1420_v22 = vmax.f32 %v6759_v30, 0.0 }
 0x3dc   : > { %v6765_v2 = vpop.permute.xlu1 %1176  ;;  %4870 = vperm.xlu1 %4868, %v4869_v13   ;;  %v6767_v15 = vpop.permute.xlu0 %2236 }
 0x3dd   : > { %v1436_v20 = vmin.f32 %v1420_v22, 15.0  ;;  %v5007_v22 = vld [vmem:[%s6226_s28] sm:$0xff]  }
 0x3de   : > { %4391 = vmatpush3.bf16.msra.mxu0 %v5007_v22 }
 0x3df   : > { %1857 = vperm.xlu0 %4892, %v1436_v20  }
 0x3e0   : > { %v6770_v12 = vpop.permute.xlu1 %2238  ;;  %4874 = vset.pattern.permute.xlu1 %v8247_v62  ;;  %v2333_v8 = vpop.permute.xlu0 %2332 }
 0x3e1   : > { %4876 = vperm.xlu1 %4874, %v4875_v17   ;;  %v6774_v45 = vadd.f32 %v6358_v39, %v2333_v8  ;;  %v2552_v17 = vmin.f32 %v2536_v61, 15.0  ;;  %v5008_v8 = vld [vmem:[%s6226_s28 + $0x48] sm:$0xff]  }
 0x3e2   : > { %4392 = vmatprep.subr.bf16.mxu0 %v5008_v8  ;;  %v5013_v8 = vld [vmem:[%s6226_s28 + $0x18] sm:$0xff]  }
 0x3e3   : > { %v2578_v48 = vmax.f32 %v6774_v45, 0.0 }
 0x3e4   : > { %v6777_v50 = vpop.permute.xlu1 %2334  ;;  %v6779_v21 = vpop.permute.xlu0 %1034 }
 0x3e5   : > { %4881 = vset.pattern.permute.xlu1 %v8251_v16  ;;  %v2594_v14 = vmin.f32 %v2578_v48, 15.0  ;;  %v5009_v48 = vld [vmem:[%s6226_s28 + $0x8] sm:$0xff]  }
 0x3e6   : > { %1449 = vperm.xlu1 %4881, %v1395_v31   ;;  %4393 = vmatpush3.bf16.msra.mxu0 %v5009_v48 }
 0x3e7   : > { %3004 = vperm.xlu0 %4892, %v2594_v14   ;;  %v2553_v14 = vmin.f32 %v2537_v55, 15.0  ;;  %v5012_v55 = vld [vmem:[%s6226_s28 + $0x58] sm:$0xff]  }
 0x3e8   : > { %v6783_v32 = vpop.permute.xlu1 %1036  ;;  %v1179_v56 = vpop.permute.xlu0 %1178 }
 0x3e9   : > { %v6787_v13 = vadd.f32 %v6384_v43, %v1179_v56  ;;  %v2569_v56 = vmax.f32 %v6572_v60, 0.0 }
 0x3ea   : > { %4882 = vset.pattern.permute.xlu1 %v8247_v62 }
 0x3eb   : > { %1807 = vperm.xlu1 %4882, %v1426_v58   ;;  %v1422_v10 = vmax.f32 %v6787_v13, 0.0  ;;  %v5010_v58 = vld [vmem:[%s6226_s28 + $0x50] sm:$0xff]  }
 0x3ec   : > { %v6792_v4 = vpop.permute.xlu0 %2240  ;;  %v6795_v20 = vpop.permute.xlu1 %1180  ;;  %4394 = vmatprep.subr.bf16.mxu0 %v5010_v58 }
 0x3ed   : > { %v1438_v41 = vmin.f32 %v1422_v10, 15.0  ;;  %v5011_v10 = vld [vmem:[%s6226_s28 + $0x10] sm:$0xff]  }
 0x3ee   : > { %4395 = vmatpush3.bf16.msra.mxu0 %v5011_v10  ;;  %v1413_v10 = vmax.f32 %v6594_v25, 0.0  ;;  %v2539_v25 = vmax.f32 %v6606_v49, 0.0  ;;  %v5020_v49 = vld [vmem:[%s6226_s28 + $0x78] sm:$0xff]  }
 0x3ef   : > { %4884 = vset.pattern.permute.xlu1 %v8251_v16  ;;  %1867 = vperm.xlu0 %4892, %v1438_v41   ;;  %v1381_v41 = vmax.f32 %v6584_v5, 0.0 }
 0x3f0   : > { %2602 = vperm.xlu1 %4884, %v2552_v17   ;;  %v2337_v31 = vpop.permute.xlu0 %2336  ;;  %v6805_v53 = vpop.permute.xlu1 %2242  ;;  %v2585_v17 = vmin.f32 %v2569_v56, 15.0  ;;  %4396 = vmatprep.subr.bf16.mxu0 %v5012_v55  ;;  %v5016_v55 = vld [vmem:[%s6226_s28 + $0x68] sm:$0xff]  }
 0x3f1   : > { %v6802_v35 = vadd.f32 %v6384_v43, %v2337_v31  ;;  %v1397_v56 = vmin.f32 %v1381_v41, 15.0  ;;  %v5017_v41 = vld [vmem:[%s6226_s28 + $0x28] sm:$0xff]  }
 0x3f2   : > { %4397 = vmatpush3.bf16.msra.mxu0 %v5013_v8  ;;  %v1429_v8 = vmin.f32 %v1413_v10, 15.0  ;;  %v2555_v10 = vmin.f32 %v2539_v25, 15.0  ;;  %v1383_v25 = vmax.f32 %v6631_v27, 0.0  ;;  %v2542_v27 = vmax.f32 %v6716_v24, 0.0 }
 0x3f3   : > { %v2580_v61 = vmax.f32 %v6802_v35, 0.0 }
 0x3f4   : > { %2607 = vperm.xlu1 %4884, %v2553_v14   ;;  %v6809_v0 = vpop.permute.xlu0 %1038  ;;  %v6816_v31 = vpop.permute.xlu1 %2338  ;;  %v5014_v14 = vld [vmem:[%s6226_s28 + $0x60] sm:$0xff]  }
 0x3f5   : > { %v2596_v22 = vmin.f32 %v2580_v61, 15.0  ;;  %v5015_v61 = vld [vmem:[%s6226_s28 + $0x20] sm:$0xff]   ;;  %4398 = vmatprep.subr.bf16.mxu0 %v5014_v14  ;;  %v5018_v14 = vld [vmem:[%s6226_s28 + $0x70] sm:$0xff]  }
 0x3f6   : > { %4399 = vmatpush3.bf16.msra.mxu0 %v5015_v61 }
 0x3f7   : > { %3014 = vperm.xlu0 %4892, %v2596_v22   ;;  %4400 = vmatprep.subr.bf16.mxu0 %v5016_v55  ;;  %v2571_v55 = vmax.f32 %v6618_v18, 0.0  ;;  %v8365_v18 = vmov 0  }
 0x3f8   : > { %4885 = vset.pattern.permute.xlu1 %v8247_v62  ;;  %v1183_v60 = vpop.permute.xlu0 %1182 }
 0x3f9   : > { %v6819_v48 = vadd.f32 %v6394_v47, %v1183_v60  ;;  %2959 = vperm.xlu1 %4885, %v2585_v17   ;;  %v6828_v17 = vpop.permute.xlu1 %1040 }
 0x3fa   : > { %4401 = vmatpush3.bf16.msra.mxu0 %v5017_v41  ;;  %v5021_v41 = vld [vmem:[%s6226_s28 + $0x38] sm:$0xff]  }
 0x3fb   : > { %8364 = vst [vmem:[#allocation48_spill] sm:$0xff] %v6819_v48  ;;  %v1424_v58 = vmax.f32 %v6819_v48, 0.0  ;;  %4402 = vmatprep.subr.bf16.mxu0 %v5018_v14  ;;  %v2540_v48 = vmax.f32 %v6655_v34, 0.0 }
 0x3fc   : > { %v6823_v5 = vpop.permute.xlu0 %2244 }
 0x3fd   : > { %4887 = vset.pattern.permute.xlu1 %v8251_v16  ;;  %v1440_v22 = vmin.f32 %v1424_v58, 15.0  ;;  %v5019_v58 = vld [vmem:[%s6226_s28 + $0x30] sm:$0xff]   ;;  %v6840_v61 = vpop.permute.xlu1 %1184  ;;  %s5623_s28 = smov 32  }
 0x3fe   : > { %1459 = vperm.xlu1 %4887, %v1397_v56   ;;  %4403 = vmatpush3.bf16.msra.mxu0 %v5019_v58  ;;  %v1399_v58 = vmin.f32 %v1383_v25, 15.0 }
 0x3ff   : > { %1877 = vperm.xlu0 %4892, %v1440_v22   ;;  %4404 = vmatprep.subr.bf16.mxu0 %v5020_v49  ;;  %v6870_v49 = vadd.f32 %v6354_v37, %v6722_v29 }
 0x400   : > { %v2341_v60 = vpop.permute.xlu0 %2340 }
 0x401   : > { %v6833_v3 = vadd.f32 %v6394_v47, %v2341_v60  ;;  %v1382_v60 = vmax.f32 %v6625_v23, 0.0  ;;  %v6848_v14 = vpop.permute.xlu1 %2246  ;;  %v2556_v23 = vmin.f32 %v2540_v48, 15.0  ;;  %v2544_v25 = vmax.f32 %v6870_v49, 0.0 }
 0x402   : > { %4889 = vset.pattern.permute.xlu1 %v8247_v62  ;;  %4405 = vmatpush3.bf16.msra.mxu0 %v5021_v41 }
 0x403   : > { %1822 = vperm.xlu1 %4889, %v1429_v8   ;;  %v2582_v56 = vmax.f32 %v6833_v3, 0.0  ;;  %v2587_v8 = vmin.f32 %v2571_v55, 15.0  ;;  %v1398_v62 = vmin.f32 %v1382_v60, 15.0  ;;  %vm2470_vm8 = vcmp.ge.f32.partialorder %v6833_v3, -1.0 }
 0x404   : > { %vm2486_vm9 = vcmp.le.f32.partialorder %v6833_v3, 16.0 }
 0x405   : > { %v2598_v22 = vmin.f32 %v2582_v56, 15.0  ;;  %v1384_v56 = vmax.f32 %v6682_v57, 0.0  ;;  %v2541_v57 = vmax.f32 %v6661_v40, 0.0  ;;  %v6879_v40 = vadd.f32 %v6358_v39, %v6747_v54  ;;  %vm2502_vm11 = vmand %vm2470_vm8, %vm2486_vm9 }
 0x407   : > { %4891 = vset.pattern.permute.xlu1 %v8251_v16  ;;  %3024 = vperm.xlu0 %4892, %v2598_v22   ;;  %v6855_v22 = vpop.permute.xlu1 %2342  ;;  %v1400_v34 = vmin.f32 %v1384_v56, 15.0  ;;  %v2557_v24 = vmin.f32 %v2541_v57, 15.0  ;;  %v1388_v29 = vmax.f32 %v6879_v40, 0.0  ;;  %v6896_v57 = vadd.f32 %v6384_v43, %v6779_v21 }
 0x408   : > { %2617 = vperm.xlu1 %4891, %v2555_v10   ;;  %v1415_v10 = vmax.f32 %v6646_v6, 0.0  ;;  %v2558_v6 = vmin.f32 %v2542_v27, 15.0 }
 0x40a   : > { %v1431_v55 = vmin.f32 %v1415_v10, 15.0  ;;  %v1404_v10 = vmin.f32 %v1388_v29, 15.0 }
 0x40b   : > { %4972 = vset.pattern.permute.xlu0 %v8251_v16 }
 0x40c   : > { %4893 = vset.pattern.permute.xlu1 %v8365_v18  ;;  %1464 = vperm.xlu0 %4972, %v1398_v62   ;;  %v6861_v62 = vadd.f32 %v6354_v37, %v6694_v63  ;;  %v2573_v63 = vmax.f32 %v6675_v52, 0.0  ;;  %v2560_v37 = vmin.f32 %v2544_v25, 15.0  ;;  %v6888_v52 = vadd.f32 %v6358_v39, %v6767_v15 }
 0x40d   : > { %2969 = vperm.xlu1 %4893, %v2587_v8   ;;  %v2575_v25 = vmax.f32 %v6739_v7, 0.0 }
 0x40e   : > { %v1386_v60 = vmax.f32 %v6861_v62, 0.0  ;;  %v2546_v54 = vmax.f32 %v6888_v52, 0.0  ;;  %vm1226_vm12 = vcmp.ge.f32.partialorder %v6861_v62, -1.0  ;;  %vm1242_vm13 = vcmp.le.f32.partialorder %v6861_v62, 16.0 }
 0x40f   : > { %v2591_v7 = vmin.f32 %v2575_v25, 15.0 }
 0x410   : > { %2622 = vperm.xlu0 %4972, %v2556_v23   ;;  %v1402_v8 = vmin.f32 %v1386_v60, 15.0  ;;  %v2589_v23 = vmin.f32 %v2573_v63, 15.0  ;;  %v2562_v39 = vmin.f32 %v2546_v54, 15.0  ;;  %v1072_v63 = vadd.f32 %v6394_v47, %v6809_v0 }
 0x411   : > { %4894 = vset.pattern.permute.xlu1 %v8251_v16  ;;  %v6925_v0 = vadd.f32 %v6352_v36, %v6706_v26 }
 0x412   : > { %1469 = vperm.xlu1 %4894, %v1399_v58   ;;  %v1385_v58 = vmax.f32 %v6691_v59, 0.0  ;;  %v1390_v59 = vmax.f32 %v6896_v57, 0.0  ;;  %vm1232_vm0 = vcmp.ge.f32.partialorder %v1072_v63, -1.0  ;;  %vm1248_vm1 = vcmp.le.f32.partialorder %v1072_v63, 16.0 }
 0x413   : > { %vm1264_vm4 = vmand %vm1232_vm0, %vm1248_vm1  ;;  %vm1227_vm14 = vcmp.ge.f32.partialorder %v6925_v0, -1.0  ;;  %vm1243_vm15 = vcmp.le.f32.partialorder %v6925_v0, 16.0  ;;  %vm1306_vm1 = vcmp.ge.f32.partialorder %v6709_v19, -1.0 }
 0x414   : > { %1474 = vperm.xlu0 %4972, %v1400_v34   ;;  %v1401_v34 = vmin.f32 %v1385_v58, 15.0  ;;  %v1406_v21 = vmin.f32 %v1390_v59, 15.0  ;;  %v1387_v58 = vmax.f32 %v6925_v0, 0.0  ;;  %vm1258_vm0 = vmand %vm1226_vm12, %vm1242_vm13  ;;  %v1069_v0 = vadd.f32 %v6356_v38, %v6756_v11  ;;  %v897_v11 = vld [vmem:[#allocation10] sm:$0x3] }
 0x415   : > { %v6863_v48 = vpop.permute.xlu1 %4786  ;;  %vm2464_vm12 = vcmp.ge.f32.partialorder %v6742_v51, -1.0  ;;  %vm2480_vm13 = vcmp.le.f32.partialorder %v6742_v51, 16.0 }
 0x416   : > { %4895 = vset.pattern.permute.xlu1 %v8365_v18 }
 0x417   : > { %1832 = vperm.xlu1 %4895, %v1431_v55   ;;  %v1417_v55 = vmax.f32 %v6704_v9, 0.0  ;;  %v2543_v9 = vmax.f32 %v6727_v44, 0.0 }
 0x418   : > { %2632 = vperm.xlu0 %4972, %v2558_v6   ;;  %v6902_v6 = vadd.f32 %v6384_v43, %v6792_v4  ;;  %v6913_v43 = vadd.f32 %v6392_v46, %v6828_v17  ;;  %v6927_v17 = vpop.permute.xlu0 %1444 }
 0x419   : > { %v1433_v15 = vmin.f32 %v1417_v55, 15.0  ;;  %v8366_v55 = vmov 0.0  }
 0x41a   : > { %v6872_v41 = vpop.permute.xlu1 %4792  ;;  %vm1233_vm2 = vcmp.ge.f32.partialorder %v6913_v43, -1.0  ;;  %vm1249_vm3 = vcmp.le.f32.partialorder %v6913_v43, 16.0 }
 0x41b   : > { %4896 = vset.pattern.permute.xlu1 %v8251_v16  ;;  %vm1265_vm5 = vmand %vm1233_vm2, %vm1249_vm3  ;;  %vm1322_vm2 = vcmp.le.f32.partialorder %v6709_v19, 16.0 }
 0x41c   : > { %2627 = vperm.xlu1 %4896, %v2557_v24   ;;  %1484 = vperm.xlu0 %4972, %v1402_v8   ;;  %v2548_v24 = vmax.f32 %v6902_v6, 0.0  ;;  %v2559_v8 = vmin.f32 %v2543_v9, 15.0  ;;  %v4303_v59 = vsel %vm1265_vm5, 1.0, %v8366_v55  ;;  %v2273_v9 = vadd.f32 %v6352_v36, %v6731_v33  ;;  %vm1259_vm3 = vmand %vm1227_vm14, %vm1243_vm15 }
 0x41d   : > { %v2369_v33 = vadd.f32 %v6352_v36, %v6745_v1  ;;  %v896_v1 = vld [vmem:[#allocation8] sm:$0x3]  ;;  %vm6990_vm8 = vmand %vm1306_vm1, %vm1322_vm2  ;;  %vm1228_vm2 = vcmp.ge.f32.partialorder %v6879_v40, -1.0 }
 0x41e   : > { %v2564_v44 = vmin.f32 %v2548_v24, 15.0  ;;  %v2545_v3 = vmax.f32 %v2273_v9, 0.0  ;;  %vm2385_vm9 = vcmp.ge.f32.partialorder %v2273_v9, -1.0 }
 0x41f   : > { %v6882_v56 = vpop.permute.xlu1 %4798  ;;  %vm2465_vm15 = vcmp.ge.f32.partialorder %v2369_v33, -1.0 }
 0x420   : > { %4897 = vset.pattern.permute.xlu1 %v8365_v18  ;;  %2642 = vperm.xlu0 %4972, %v2560_v37   ;;  %v6920_v37 = vadd.f32 %v6394_v47, %v6823_v5  ;;  %v6934_v5 = vadd.f32 %v6392_v46, %v6855_v22  ;;  %v6946_v22 = vpop.permute.xlu0 %1812 }
 0x421   : > { %2979 = vperm.xlu1 %4897, %v2589_v23   ;;  %v1392_v23 = vmax.f32 %v1072_v63, 0.0 }
 0x422   : > { %v2550_v47 = vmax.f32 %v6920_v37, 0.0  ;;  %vm2471_vm6 = vcmp.ge.f32.partialorder %v6934_v5, -1.0  ;;  %vm2487_vm7 = vcmp.le.f32.partialorder %v6934_v5, 16.0 }
 0x423   : > { %v1408_v29 = vmin.f32 %v1392_v23, 15.0  ;;  %vm2503_vm10 = vmand %vm2471_vm6, %vm2487_vm7  ;;  %vm2384_vm6 = vcmp.ge.f32.partialorder %v6870_v49, -1.0  ;;  %vm2400_vm7 = vcmp.le.f32.partialorder %v6870_v49, 16.0 }
 0x424   : > { %v6891_v27 = vpop.permute.xlu1 %4804  ;;  %1494 = vperm.xlu0 %4972, %v1404_v10   ;;  %v6942_v10 = vadd.f32 %v6352_v36, %v6719_v28  ;;  %v2566_v54 = vmin.f32 %v2550_v47, 15.0  ;;  %v6959_v25 = vpop.permute.xlu0 %2954  ;;  %v2561_v47 = vmin.f32 %v2545_v3, 15.0  ;;  %v2577_v36 = vmax.f32 %v2369_v33, 0.0  ;;  %vm7014_vm14 = vmand %vm2384_vm6, %vm2400_vm7 }
 0x425   : > { %4898 = vset.pattern.permute.xlu1 %v8251_v16  ;;  %v7020_v3 = vadd.f32 %v6356_v38, %v6765_v2  ;;  %vm1245_vm6 = vcmp.le.f32.partialorder %v1069_v0, 16.0 }
 0x426   : > { %1479 = vperm.xlu1 %4898, %v1401_v34   ;;  %v1403_v34 = vmin.f32 %v1387_v58, 15.0  ;;  %v1419_v28 = vmax.f32 %v6942_v10, 0.0  ;;  %vm1323_vm5 = vcmp.le.f32.partialorder %v6942_v10, 16.0  ;;  %v2593_v19 = vmin.f32 %v2577_v36, 15.0 }
 0x428   : > { %2652 = vperm.xlu0 %4972, %v2562_v39   ;;  %v4302_v39 = vsel %vm1264_vm4, 1.0, %v8366_v55  ;;  %v1435_v63 = vmin.f32 %v1419_v28, 15.0  ;;  %v6976_v62 = vpop.permute.xlu0 %1454  ;;  %vm1307_vm4 = vcmp.ge.f32.partialorder %v6942_v10, -1.0  ;;  %v1389_v10 = vmax.f32 %v1069_v0, 0.0 }
 0x429   : > { %v6904_v60 = vpop.permute.xlu1 %4810  ;;  %v4979_v24 = vpack.i.bf16 %v4303_v59, %v4302_v39  ;;  %v6986_v39 = vsel %vm1258_vm0, 1.0, %v8366_v55  ;;  %vm2481_vm0 = vcmp.le.f32.partialorder %v2369_v33, 16.0 }
 0x42a   : > { %4899 = vset.pattern.permute.xlu1 %v8365_v18  ;;  %vm7058_vm7 = vmand %vm2465_vm15, %vm2481_vm0  ;;  %v1405_v33 = vmin.f32 %v1389_v10, 15.0  ;;  %vm2386_vm0 = vcmp.ge.f32.partialorder %v6888_v52, -1.0 }
 0x42b   : > { %1842 = vperm.xlu1 %4899, %v1433_v15  }
 0x42c   : > { %1504 = vperm.xlu0 %4972, %v1406_v21   ;;  %v1523_v21 = vlaneseq }
 0x42e   : > { %v6915_v4 = vpop.permute.xlu1 %4816  ;;  %v1524_v23 = vshrl.u32 %v1523_v21, 7  ;;  %v6998_v21 = vsel %vm1259_vm3, 1.0, %v8366_v55  ;;  %vm1244_vm3 = vcmp.le.f32.partialorder %v6879_v40, 16.0  ;;  %v7090_v40 = vsel %vm7014_vm14, 1.0, %v8366_v55 }
 0x42f   : > { %4900 = vset.pattern.permute.xlu1 %v8251_v16 }
 0x430   : > { %2637 = vperm.xlu1 %4900, %v2559_v8   ;;  %2662 = vperm.xlu0 %4972, %v2564_v44   ;;  %v4351_v8 = vsel %vm2503_vm10, 1.0, %v8366_v55  ;;  %v1525_v58 = vsub.s32 0, %v1524_v23  ;;  %vm2401_vm10 = vcmp.le.f32.partialorder %v2273_v9, 16.0  ;;  %v7047_v9 = vadd.f32 %v6356_v38, %v6770_v12 }
 0x431   : > { %vm7025_vm1 = vmand %vm2385_vm9, %vm2401_vm10  ;;  %vm1308_vm9 = vcmp.ge.f32.partialorder %v6759_v30, -1.0  ;;  %vm1324_vm10 = vcmp.le.f32.partialorder %v6759_v30, 16.0  ;;  %v4907_v12 = vpack.i.bf16 %v6998_v21, %v6986_v39  ;;  %v7128_v30 = vsel %vm7058_vm7, 1.0, %v8366_v55 }
 0x432   : > { %v6994_v28 = vrot.slane %v896_v1, %v1525_v58  ;;  %vm2387_vm14 = vcmp.ge.f32.partialorder %v7047_v9, -1.0  ;;  %v7235_v21 = vadd.f32 %v6382_v42, %v6805_v53 }
 0x433   : > { %v6936_v26 = vpop.permute.xlu1 %4822 }
 0x434   : > { %4901 = vset.pattern.permute.xlu1 %v8365_v18  ;;  %1514 = vperm.xlu0 %4972, %v1408_v29  }
 0x435   : > { %2989 = vperm.xlu1 %4901, %v2591_v7   ;;  %v4350_v7 = vsel %vm2502_vm11, 1.0, %v8366_v55  ;;  %vm7002_vm11 = vmand %vm1307_vm4, %vm1323_vm5  ;;  %vm1229_vm5 = vcmp.ge.f32.partialorder %v1069_v0, -1.0  ;;  %v7118_v0 = vadd.f32 %v6382_v42, %v6783_v32 }
 0x436   : > { %v4996_v29 = vpack.i.bf16 %v4351_v8, %v4350_v7  ;;  %v7033_v7 = vrot.slane %v897_v11, %v1525_v58  ;;  %vm7041_vm4 = vmand %vm2464_vm12, %vm2480_vm13  ;;  %v7054_v58 = vsel %vm6990_vm8, 1.0, %v8366_v55  ;;  %vm1309_vm8 = vcmp.ge.f32.partialorder %v7020_v3, -1.0 }
 0x437   : > { %vm7070_vm12 = vmand %vm1228_vm2, %vm1244_vm3  ;;  %vm1325_vm13 = vcmp.le.f32.partialorder %v7020_v3, 16.0  ;;  %v7085_v39 = vsel %vm7002_vm11, 1.0, %v8366_v55  ;;  %vm2402_vm2 = vcmp.le.f32.partialorder %v6888_v52, 16.0  ;;  %vm2403_vm3 = vcmp.le.f32.partialorder %v7047_v9, 16.0 }
 0x438   : > { %v6950_v15 = vpop.permute.xlu1 %4828  ;;  %2672 = vperm.xlu0 %4972, %v2566_v54   ;;  %vm7094_vm15 = vmand %vm1229_vm5, %vm1245_vm6  ;;  %vm2466_vm5 = vcmp.ge.f32.partialorder %v6774_v45, -1.0  ;;  %vm2482_vm6 = vcmp.le.f32.partialorder %v6774_v45, 16.0  ;;  %v1215_v52 = vadd.f32 %v6382_v42, %v6795_v20  ;;  %v4913_v2 = vpack.i.bf16 %v7085_v39, %v7054_v58 }
 0x439   : > { %4902 = vset.pattern.permute.xlu1 %v8251_v16  ;;  %vm7110_vm11 = vmand %vm1308_vm9, %vm1324_vm10  ;;  %v7161_v45 = vsel %vm7094_vm15, 1.0, %v8366_v55  ;;  %vm1231_vm15 = vcmp.ge.f32.partialorder %v7118_v0, -1.0 }
 0x43a   : > { %1489 = vperm.xlu1 %4902, %v1403_v34   ;;  %v1529_v34 = vsub.s32 1, %v1524_v23  ;;  %vm7167_vm10 = vmand %vm2387_vm14, %vm2403_vm3  ;;  %v7190_v20 = vsel %vm7110_vm11, 1.0, %v8366_v55  ;;  %vm1310_vm14 = vcmp.ge.f32.partialorder %v6787_v13, -1.0  ;;  %vm1326_vm3 = vcmp.le.f32.partialorder %v6787_v13, 16.0 }
 0x43b   : > { %v7242_v8 = vsel %vm7167_vm10, 1.0, %v8366_v55  ;;  %vm2404_vm10 = vcmp.le.f32.partialorder %v6902_v6, 16.0  ;;  %v2373_v13 = vadd.f32 %v6382_v42, %v6816_v31  ;;  %v1217_v31 = vadd.f32 %v6392_v46, %v6840_v61 }
 0x43c   : > { %4980 = vperm.xlu0 %4972, %v4979_v24   ;;  %v7031_v49 = vrot.slane %v896_v1, %v1529_v34  ;;  %v7078_v1 = vadd.f32 %v6356_v38, %v6777_v50  ;;  %v7104_v38 = vsel %vm7025_vm1, 1.0, %v8366_v55  ;;  %vm7134_vm1 = vmand %vm1309_vm8, %vm1325_vm13  ;;  %v7145_v24 = vsel %vm7070_vm12, 1.0, %v8366_v55 }
 0x43d   : > { %v6961_v44 = vpop.permute.xlu1 %4834  ;;  %vm1230_vm12 = vcmp.ge.f32.partialorder %v6896_v57, -1.0  ;;  %vm1246_vm8 = vcmp.le.f32.partialorder %v6896_v57, 16.0  ;;  %vm7177_vm13 = vmand %vm2466_vm5, %vm2482_vm6  ;;  %v7195_v36 = vsel %vm7134_vm1, 1.0, %v8366_v55  ;;  %vm1311_vm5 = vcmp.ge.f32.partialorder %v1215_v52, -1.0 }
 0x43e   : > { %8367 = vst [vmem:[#allocation49_spill] sm:$0xff] %v6961_v44  ;;  %4903 = vset.pattern.permute.xlu1 %v8365_v18  ;;  %vm2467_vm7 = vcmp.ge.f32.partialorder %v7078_v1, -1.0  ;;  %vm2483_vm9 = vcmp.le.f32.partialorder %v7078_v1, 16.0  ;;  %vm7212_vm11 = vmand %vm1230_vm12, %vm1246_vm8  ;;  %vm1327_vm6 = vcmp.le.f32.partialorder %v1215_v52, 16.0  ;;  %vm2389_vm12 = vcmp.ge.f32.partialorder %v7235_v21, -1.0 }
 0x43f   : > { %1852 = vperm.xlu1 %4903, %v1435_v63   ;;  %vm2405_vm8 = vcmp.le.f32.partialorder %v7235_v21, 16.0  ;;  %v1533_v61 = vsub.f32 %v6927_v17, %v6994_v28  ;;  %v2581_v42 = vmax.f32 %v2373_v13, 0.0 }
 0x440   : > { %4995 = vset.pattern.permute.xlu0 %v8365_v18 }
 0x441   : > { %4997 = vperm.xlu0 %4995, %v4996_v29   ;;  %v7035_v29 = vpop.permute.xlu0 %1817 }
 0x442   : > { %v6972_v54 = vpop.permute.xlu1 %4840 }
 0x443   : > { %8368 = vst [vmem:[#allocation50_spill] sm:$0xff] %v6972_v54  ;;  %4904 = vset.pattern.permute.xlu1 %v8251_v16 }
 0x444   : > { %2647 = vperm.xlu1 %4904, %v2561_v47   ;;  %v7049_v47 = vrot.slane %v897_v11, %v1529_v34  ;;  %v7123_v11 = vsel %vm7041_vm4, 1.0, %v8366_v55  ;;  %vm7152_vm4 = vmand %vm2386_vm0, %vm2402_vm2  ;;  %vm1247_vm0 = vcmp.le.f32.partialorder %v7118_v0, 16.0 }
 0x445   : > { %5002 = vset.pattern.permute.xlu0 %v8251_v16  ;;  %v7140_v32 = vpop.permute.xlu0 %2612  ;;  %vm7202_vm2 = vmand %vm2467_vm7, %vm2483_vm9  ;;  %v7223_v50 = vsel %vm7152_vm4, 1.0, %v8366_v55  ;;  %vm2388_vm9 = vcmp.ge.f32.partialorder %v6902_v6, -1.0  ;;  %v8413_v6 = vld [vmem:[#allocation48_spill] sm:$0xff] }
 0x446   : > { %vm7229_vm1 = vmand %vm1231_vm15, %vm1247_vm0  ;;  %v7259_v10 = vsel %vm7202_vm2, 1.0, %v8366_v55  ;;  %vm2468_vm0 = vcmp.ge.f32.partialorder %v6802_v35, -1.0  ;;  %vm2484_vm2 = vcmp.le.f32.partialorder %v6802_v35, 16.0  ;;  %v1899_v35 = vsub.f32 %v6946_v22, %v7049_v47 }
 0x447   : > { %v7008_v63 = vpop.permute.xlu1 %4846  ;;  %vm1342_vm4 = vmand %vm1310_vm14, %vm1326_vm3  ;;  %v7273_v23 = vsel %vm7229_vm1, 1.0, %v8366_v55  ;;  %vm2485_vm14 = vcmp.le.f32.partialorder %v2373_v13, 16.0  ;;  %vm1312_vm3 = vcmp.ge.f32.partialorder %v8413_v6, -1.0  ;;  %vm1328_vm1 = vcmp.le.f32.partialorder %v8413_v6, 16.0 }
 0x448   : > { %8373 = vst [vmem:[#allocation51_spill] sm:$0xff] %v7008_v63  ;;  %4905 = vset.pattern.permute.xlu1 %v8365_v18  ;;  %8407 = vst [vmem:[#allocation57_spill] sm:$0xff] %v7273_v23  ;;  %v7292_v59 = vsel %vm1342_vm4, 1.0, %v8366_v55  ;;  %vm1329_vm4 = vcmp.le.f32.partialorder %v1217_v31, 16.0 }
 0x449   : > { %2999 = vperm.xlu1 %4905, %v2593_v19   ;;  %v1421_v19 = vmax.f32 %v7020_v3, 0.0  ;;  %vm1343_vm7 = vmand %vm1311_vm5, %vm1327_vm6  ;;  %8408 = vst [vmem:[#allocation58_spill] sm:$0xff] %v7292_v59  ;;  %vm1313_vm6 = vcmp.ge.f32.partialorder %v1217_v31, -1.0  ;;  %v8432_v59 = vpack.i.bf16 %v7104_v38, %v7090_v40 }
 0x44a   : > { %v7297_v57 = vsel %vm1343_vm7, 1.0, %v8366_v55  ;;  %vm2421_vm15 = vmand %vm2389_vm12, %vm2405_vm8 }
 0x44b   : > { %v1437_v39 = vmin.f32 %v1421_v19, 15.0  ;;  %v7237_v19 = vpop.permute.xlu0 %2964  ;;  %8409 = vst [vmem:[#allocation59_spill] sm:$0xff] %v7297_v57  ;;  %vm7338_vm5 = vmand %vm2468_vm0, %vm2484_vm2 }
 0x44c   : > { %v7080_v34 = vpop.permute.xlu1 %4852  ;;  %vm7358_vm12 = vmand %vm1312_vm3, %vm1328_vm1  ;;  %v7376_v54 = vsel %vm7338_vm5, 1.0, %v8366_v55  ;;  %vm3621_vm3 = vcmask 97344   ;;  %vm3627_vm1 = vcmask 130144   ;;  %vm3633_vm5 = vcmask 162944  }
 0x44d   : > { %8384 = vst [vmem:[#allocation52_spill] sm:$0xff] %v7080_v34  ;;  %4906 = vset.pattern.permute.xlu1 %v8251_v16  ;;  %8426 = vst [vmem:[#allocation63_spill] sm:$0xff] %v7376_v54 }
 0x44e   : > { %1499 = vperm.xlu1 %4906, %v1405_v33   ;;  %v2547_v33 = vmax.f32 %v7047_v9, 0.0  ;;  %v2579_v9 = vmax.f32 %v7078_v1, 0.0  ;;  %v1423_v1 = vmax.f32 %v1215_v52, 0.0 }
 0x450   : > { %v2563_v53 = vmin.f32 %v2547_v33, 15.0  ;;  %v7283_v33 = vpop.permute.xlu0 %1827  ;;  %v7299_v16 = vmin.f32 %v1423_v1, 15.0  ;;  %v2549_v1 = vmax.f32 %v7235_v21, 0.0  ;;  %v1898_v21 = vsub.f32 %v6946_v22, %v7033_v7 }
 0x451   : > { %v7175_v3 = vpop.permute.xlu1 %4858  ;;  %v1538_v22 = vsub.f32 %v6976_v62, %v7031_v49 }
 0x452   : > { %8395 = vst [vmem:[#allocation53_spill] sm:$0xff] %v7175_v3  ;;  %4908 = vperm.xlu1 %4906, %v4907_v12   ;;  %v1391_v12 = vmax.f32 %v7118_v0, 0.0  ;;  %v7254_v3 = vsel %vm7177_vm13, 1.0, %v8366_v55  ;;  %v7268_v0 = vsel %vm7212_vm11, 1.0, %v8366_v55  ;;  %vm7301_vm13 = vmand %vm2388_vm9, %vm2404_vm10  ;;  %vm2469_vm11 = vcmp.ge.f32.partialorder %v2373_v13, -1.0 }
 0x453   : > { %8405 = vst [vmem:[#allocation55_spill] sm:$0xff] %v7254_v3  ;;  %8406 = vst [vmem:[#allocation56_spill] sm:$0xff] %v7268_v0  ;;  %v7333_v58 = vsel %vm7301_vm13, 1.0, %v8366_v55  ;;  %vm2390_vm9 = vcmp.ge.f32.partialorder %v6920_v37, -1.0  ;;  %vm2406_vm10 = vcmp.le.f32.partialorder %v6920_v37, 16.0  ;;  %v7364_v34 = vmin.f32 %v2549_v1, 15.0 }
 0x454   : > { %v7289_v52 = vmin.f32 %v1391_v12, 15.0  ;;  %8414 = vst [vmem:[#allocation48_spill] sm:$0xff] %v7333_v58  ;;  %vm7346_vm7 = vmand %vm2469_vm11, %vm2485_vm14  ;;  %v1930_v6 = vand.u32 2147483647, %v1898_v21  ;;  %v1425_v1 = vmax.f32 %v1217_v31, 0.0  ;;  %v3032_v37 = vsub.f32 %v6959_v25, %v7033_v7 }
 0x455   : > { %vm7387_vm0 = vmand %vm2390_vm9, %vm2406_vm10  ;;  %v3033_v13 = vsub.f32 %v6959_v25, %v7049_v47  ;;  %vm3609_vm11 = vcmask 31744   ;;  %vm3615_vm14 = vcmask 64544   ;;  %vm3651_vm9 = vcmask 261344  }
 0x456   : > { %v7246_v51 = vpop.permute.xlu1 %4864  ;;  %4912 = vset.pattern.permute.xlu1 %v8365_v18  ;;  %v1962_v25 = vsub.f32 1.0, %v1930_v6  ;;  %v7426_v38 = vmin.f32 %v1425_v1, 15.0  ;;  %v7431_v0 = vsel %vm7387_vm0, 1.0, %v8366_v55  ;;  %vm3657_vm10 = vcmask 294144  }
 0x457   : > { %8404 = vst [vmem:[#allocation54_spill] sm:$0xff] %v7246_v51  ;;  %1862 = vperm.xlu1 %4912, %v1437_v39   ;;  %v7287_v39 = vmin.f32 %v2579_v9, 15.0  ;;  %v1534_v9 = vsub.f32 %v6927_v17, %v7031_v49  ;;  %v7342_v17 = vpop.permute.xlu0 %2974  ;;  %v1565_v51 = vand.u32 2147483647, %v1533_v61  ;;  %v1393_v61 = vmax.f32 %v6913_v43, 0.0  ;;  %8437 = vst [vmem:[#allocation69_spill] sm:$0xff] %v7431_v0 }
 0x458   : > { %8436 = vst [vmem:[#allocation68_spill] sm:$0xff] %v7426_v38  ;;  %v1537_v43 = vsub.f32 %v6976_v62, %v6994_v28  ;;  %vm3687_vm0 = vcmask 458144  }
 0x459   : > { %v1566_v23 = vand.u32 2147483647, %v1534_v9  ;;  %v7381_v9 = vsel %vm7346_vm7, 1.0, %v8366_v55  ;;  %v1597_v31 = vsub.f32 1.0, %v1565_v51  ;;  %v7422_v57 = vmin.f32 %v1393_v61, 15.0 }
 0x45a   : > { %8427 = vst [vmem:[#allocation64_spill] sm:$0xff] %v7381_v9  ;;  %v3064_v61 = vand.u32 2147483647, %v3032_v37  ;;  %v1569_v9 = vand.u32 2147483647, %v1537_v43  ;;  %vm3645_vm7 = vcmask 228544  }
 0x45b   : > { %v7307_v12 = vpop.permute.xlu1 %4870  ;;  %4914 = vperm.xlu1 %4912, %v4913_v2   ;;  %v2279_v2 = vadd.f32 %v6392_v46, %v6848_v14  ;;  %v7336_v46 = vsel %vm2421_vm15, 1.0, %v8366_v55  ;;  %vm7369_vm15 = vmand %vm1313_vm6, %vm1329_vm4  ;;  %v7391_v21 = vpop.permute.xlu0 %1837  ;;  %v7395_v14 = vmin.f32 %v2581_v42, 15.0  ;;  %v7413_v42 = vsel %vm7358_vm12, 1.0, %v8366_v55  ;;  %8435 = vst [vmem:[#allocation67_spill] sm:$0xff] %v7422_v57 }
 0x45c   : > { %8412 = vst [vmem:[#allocation60_spill] sm:$0xff] %v7307_v12  ;;  %8415 = vst [vmem:[#allocation61_spill] sm:$0xff] %v7336_v46  ;;  %v8418_v12 = vmov 1   ;;  %v1598_v58 = vsub.f32 1.0, %v1566_v23  ;;  %vm3639_vm6 = vcmask 195744   ;;  %vm5627_vm4 = vmmov 0  }
 0x45d   : > { %vm2391_vm8 = vcmp.ge.f32.partialorder %v2279_v2, -1.0  ;;  %vm2407_vm13 = vcmp.le.f32.partialorder %v2279_v2, 16.0  ;;  %8433 = vst [vmem:[#allocation65_spill] sm:$0xff] %v7413_v42  ;;  %v2551_v51 = vmax.f32 %v2279_v2, 0.0  ;;  %v1629_v2 = vmax.f32 %v1597_v31, 0.0 }
 0x45e   : > { %vm7399_vm2 = vmand %vm2391_vm8, %vm2407_vm13  ;;  %v1630_v1 = vmax.f32 %v1598_v58, 0.0  ;;  %v8443_v58 = vpack.i.bf16 %v7128_v30, %v7123_v11  ;;  %vm3663_vm12 = vcmask 326944   ;;  %vm3669_vm8 = vcmask 359744  }
 0x45f   : > { %4918 = vset.pattern.permute.xlu1 %v8418_v12  ;;  %v7436_v23 = vsel %vm7399_vm2, 1.0, %v8366_v55  ;;  %v7442_v6 = vmin.f32 %v2551_v51, 15.0  ;;  %v7448_v40 = vpop.permute.xlu0 %2984  ;;  %v1570_v51 = vand.u32 2147483647, %v1538_v22  ;;  %vm3675_vm13 = vcmask 392544  }
 0x460   : > { %v7352_v63 = vpop.permute.xlu1 %4876  ;;  %2657 = vperm.xlu1 %4918, %v2563_v53   ;;  %8438 = vst [vmem:[#allocation70_spill] sm:$0xff] %v7436_v23  ;;  %8440 = vst [vmem:[#allocation72_spill] sm:$0xff] %v7448_v40  ;;  %vm3693_vm2 = vcmask 490944  }
 0x461   : > { %8421 = vst [vmem:[#allocation62_spill] sm:$0xff] %v7352_v63  ;;  %v1931_v63 = vand.u32 2147483647, %v1899_v35  ;;  %v7418_v35 = vsel %vm7369_vm15, 1.0, %v8366_v55  ;;  %8439 = vst [vmem:[#allocation71_spill] sm:$0xff] %v7442_v6  ;;  %vm3681_vm15 = vcmask 425344  }
 0x462   : > { %8434 = vst [vmem:[#allocation66_spill] sm:$0xff] %v7418_v35  ;;  %v3096_v35 = vsub.f32 1.0, %v3064_v61  ;;  %v4800_v61 = vunpack.i.l.bf16 %v6882_v56 }
 0x463   : > { %v1963_v44 = vsub.f32 1.0, %v1931_v63  ;;  %v3065_v63 = vand.u32 2147483647, %v3033_v13  ;;  %v1994_v13 = vmax.f32 %v1962_v25, 0.0 }
 0x464   : > { %4920 = vperm.xlu1 %4918, %v8432_v59   ;;  %v2583_v59 = vmax.f32 %v6934_v5, 0.0  ;;  %v4788_v5 = vunpack.i.l.bf16 %v6863_v48 }
 0x465   : > { %v7420_v46 = vpop.permute.xlu1 %1449  ;;  %v1995_v31 = vmax.f32 %v1963_v44, 0.0  ;;  %v3097_v54 = vsub.f32 1.0, %v3065_v63  ;;  %v1900_v63 = vsub.f32 %v7035_v29, %v7033_v7  ;;  %v3128_v44 = vmax.f32 %v3096_v35, 0.0 }
 0x466   : > { %v7454_v53 = vmin.f32 %v2583_v59, 15.0  ;;  %v7459_v42 = vmul.f32 %v4788_v5, %v1629_v2  ;;  %v7462_v25 = vmul.f32 %v4788_v5, %v1630_v1  ;;  %v7465_v59 = vpop.permute.xlu0 %1847  ;;  %v1901_v1 = vsub.f32 %v7035_v29, %v7049_v47 }
 0x467   : > { %8442 = vst [vmem:[#allocation74_spill] sm:$0xff] %v7465_v59  ;;  %v3129_v11 = vmax.f32 %v3097_v54, 0.0  ;;  %v4806_v29 = vunpack.i.l.bf16 %v6891_v27 }
 0x468   : > { %4924 = vset.pattern.permute.xlu1 %v8365_v18  ;;  %8441 = vst [vmem:[#allocation73_spill] sm:$0xff] %v7454_v53 }
 0x469   : > { %3009 = vperm.xlu1 %4924, %v7287_v39   ;;  %v4795_v39 = vunpack.i.h.bf16 %v6872_v41 }
 0x46a   : > { %v1808_v37 = vpop.permute.xlu1 %1807 }
 0x46b   : > { %v1896_v55 = vsub.f32 %v1808_v37, %v7033_v7  ;;  %v1897_v62 = vsub.f32 %v1808_v37, %v7049_v47  ;;  %v7470_v0 = vmul.f32 %v4795_v39, %v1994_v13  ;;  %v7472_v2 = vmul.f32 %v4795_v39, %v1995_v31 }
 0x46c   : > { %v1601_v31 = vsub.f32 1.0, %v1569_v9  ;;  %v1535_v39 = vsub.f32 %v7420_v46, %v6994_v28  ;;  %v1536_v37 = vsub.f32 %v7420_v46, %v7031_v49  ;;  %v7492_v9 = vand.u32 2147483647, %v1901_v1 }
 0x46d   : > { %4926 = vperm.xlu1 %4924, %v8443_v58   ;;  %v1928_v43 = vand.u32 2147483647, %v1896_v55  ;;  %v1929_v22 = vand.u32 2147483647, %v1897_v62  ;;  %v1602_v58 = vsub.f32 1.0, %v1570_v51  ;;  %v7494_v51 = vpop.permute.xlu0 %2994 }
 0x46e   : > { %v7490_v62 = vand.u32 2147483647, %v1900_v63  ;;  %8444 = vst [vmem:[#allocation75_spill] sm:$0xff] %v7494_v51  ;;  %v7498_v38 = vmax.f32 %v1601_v31, 0.0  ;;  %v1568_v63 = vand.u32 2147483647, %v1536_v37 }
 0x46f   : > { %v2603_v5 = vpop.permute.xlu1 %2602  ;;  %v1961_v59 = vsub.f32 1.0, %v1929_v22  ;;  %v3240_v22 = vmul.f32 %v4806_v29, %v3128_v44  ;;  %v2684_v44 = vsub.f32 %v7140_v32, %v6994_v28 }
 0x470   : > { %v2680_v30 = vsub.f32 %v2603_v5, %v6994_v28  ;;  %v2681_v13 = vsub.f32 %v2603_v5, %v7031_v49  ;;  %v1960_v5 = vsub.f32 1.0, %v1928_v43  ;;  %v8445_v43 = vpack.i.bf16 %v7161_v45, %v7145_v24 }
 0x471   : > { %4930 = vset.pattern.permute.xlu1 %v8418_v12  ;;  %v1993_v51 = vmax.f32 %v1961_v59, 0.0 }
 0x472   : > { %v2712_v35 = vand.u32 2147483647, %v2680_v30  ;;  %v2713_v54 = vand.u32 2147483647, %v2681_v13  ;;  %1509 = vperm.xlu1 %4930, %v7289_v52   ;;  %v7500_v30 = vmax.f32 %v1602_v58, 0.0  ;;  %v1992_v31 = vmax.f32 %v1960_v5, 0.0 }
 0x473   : > { %v2608_v23 = vpop.permute.xlu1 %2607  ;;  %v1567_v52 = vand.u32 2147483647, %v1535_v39  ;;  %v3037_v5 = vsub.f32 %v7237_v19, %v7049_v47 }
 0x474   : > { %v2744_v46 = vsub.f32 1.0, %v2712_v35  ;;  %v2745_v53 = vsub.f32 1.0, %v2713_v54  ;;  %v2682_v6 = vsub.f32 %v2608_v23, %v6994_v28  ;;  %v2683_v55 = vsub.f32 %v2608_v23, %v7031_v49 }
 0x475   : > { %v3241_v35 = vmul.f32 %v4806_v29, %v3129_v11  ;;  %v1964_v54 = vsub.f32 1.0, %v7490_v62  ;;  %v1965_v23 = vsub.f32 1.0, %v7492_v9  ;;  %v1599_v37 = vsub.f32 1.0, %v1567_v52 }
 0x476   : > { %v2776_v13 = vmax.f32 %v2744_v46, 0.0  ;;  %v2777_v1 = vmax.f32 %v2745_v53, 0.0  ;;  %v2714_v57 = vand.u32 2147483647, %v2682_v6  ;;  %v2715_v40 = vand.u32 2147483647, %v2683_v55  ;;  %4932 = vperm.xlu1 %4930, %v8445_v43   ;;  %v7507_v53 = vpop.permute.xlu0 %1857 }
 0x477   : > { %v1600_v46 = vsub.f32 1.0, %v1568_v63  ;;  %v3036_v62 = vsub.f32 %v7237_v19, %v7033_v7  ;;  %v8446_v52 = vunpack.i.l.bf16 %v6872_v41 }
 0x478   : > { %v2746_v58 = vsub.f32 1.0, %v2714_v57  ;;  %v2747_v3 = vsub.f32 1.0, %v2715_v40  ;;  %v2960_v39 = vpop.permute.xlu1 %2959  ;;  %v2888_v11 = vmul.f32 %v4800_v61, %v2776_v13  ;;  %v2889_v59 = vmul.f32 %v4800_v61, %v2777_v1 }
 0x479   : > { %v3034_v6 = vsub.f32 %v2960_v39, %v7033_v7  ;;  %v3035_v24 = vsub.f32 %v2960_v39, %v7049_v47  ;;  %v2104_v63 = vmul.f32 %v8446_v52, %v1992_v31  ;;  %v8447_v13 = vmov %v8446_v52 }
 0x47a   : > { %4936 = vset.pattern.permute.xlu1 %v8365_v18  ;;  %v2778_v57 = vmax.f32 %v2746_v58, 0.0  ;;  %v2779_v40 = vmax.f32 %v2747_v3, 0.0  ;;  %v2105_v43 = vmul.f32 %v8447_v13, %v1993_v51  ;;  %v1631_v39 = vmax.f32 %v1599_v37, 0.0  ;;  %v7530_v45 = vpop.permute.xlu0 %3004 }
 0x47b   : > { %v3066_v55 = vand.u32 2147483647, %v3034_v6  ;;  %v3067_v29 = vand.u32 2147483647, %v3035_v24  ;;  %1872 = vperm.xlu1 %4936, %v7299_v16   ;;  %v1632_v61 = vmax.f32 %v1600_v46, 0.0  ;;  %v2685_v16 = vsub.f32 %v7140_v32, %v7031_v49 }
 0x47c   : > { %v2716_v6 = vand.u32 2147483647, %v2684_v44  ;;  %v2921_v24 = vadd.f32 %v2889_v59, %v7462_v25  ;;  %v2920_v19 = vadd.f32 %v2888_v11, %v7459_v42  ;;  %v8448_v31 = vunpack.i.h.bf16 %v6882_v56 }
 0x47d   : > { %v3098_v1 = vsub.f32 1.0, %v3066_v55  ;;  %v3099_v3 = vsub.f32 1.0, %v3067_v29  ;;  %v7524_v58 = vpop.permute.xlu1 %1459  ;;  %v8449_v46 = vpack.i.bf16 %v7195_v36, %v7190_v20  ;;  %v3068_v32 = vand.u32 2147483647, %v3036_v62 }
 0x47e   : > { %v2890_v41 = vmul.f32 %v8448_v31, %v2778_v57  ;;  %v8450_v55 = vmov %v8448_v31  ;;  %v3069_v44 = vand.u32 2147483647, %v3037_v5  ;;  %v3273_v52 = vadd.f32 %v3241_v35, %v2105_v43 }
 0x47f   : > { %v3130_v51 = vmax.f32 %v3098_v1, 0.0  ;;  %v3131_v37 = vmax.f32 %v3099_v3, 0.0  ;;  %4938 = vperm.xlu1 %4936, %v8449_v46   ;;  %v2891_v29 = vmul.f32 %v8450_v55, %v2779_v40  ;;  %v3272_v25 = vadd.f32 %v3240_v22, %v2104_v63 }
 0x480   : > { %v8451_v42 = vunpack.i.h.bf16 %v6863_v48  ;;  %v8452_v59 = vunpack.i.h.bf16 %v6891_v27  ;;  %v4812_v36 = vunpack.i.l.bf16 %v6904_v60  ;;  %v2717_v56 = vand.u32 2147483647, %v2685_v16 }
 0x481   : > { %v3305_v62 = vmul.f32 %v3273_v52, %v2921_v24  ;;  %v3304_v35 = vmul.f32 %v3272_v25, %v2920_v19  ;;  %v1996_v48 = vmax.f32 %v1964_v54, 0.0  ;;  %v1904_v27 = vsub.f32 %v7283_v33, %v7033_v7  ;;  %v7558_v19 = vpop.permute.xlu0 %1867 }
 0x482   : > { %v1743_v11 = vmul.f32 %v8451_v42, %v1631_v39  ;;  %v3242_v13 = vmul.f32 %v8452_v59, %v3130_v51  ;;  %v8453_v57 = vmov %v8451_v42  ;;  %v8454_v3 = vmov %v8452_v59  ;;  %v7548_v40 = vpop.permute.xlu1 %1822 }
 0x483   : > { %v1744_v1 = vmul.f32 %v8453_v57, %v1632_v61  ;;  %v3243_v20 = vmul.f32 %v8454_v3, %v3131_v37  ;;  %4942 = vset.pattern.permute.xlu1 %v8418_v12  ;;  %v2748_v39 = vsub.f32 1.0, %v2716_v6  ;;  %v3101_v61 = vsub.f32 1.0, %v3069_v44 }
 0x484   : > { %v2922_v63 = vadd.f32 %v2890_v41, %v1743_v11  ;;  %v3274_v43 = vadd.f32 %v3242_v13, %v7470_v0  ;;  %2667 = vperm.xlu1 %4942, %v7364_v34   ;;  %v3100_v16 = vsub.f32 1.0, %v3068_v32  ;;  %v1905_v24 = vsub.f32 %v7283_v33, %v7049_v47 }
 0x485   : > { %v2923_v22 = vadd.f32 %v2891_v29, %v1744_v1  ;;  %v3275_v5 = vadd.f32 %v3243_v20, %v7472_v2  ;;  %v2749_v2 = vsub.f32 1.0, %v2717_v56  ;;  %v4830_v41 = vunpack.i.l.bf16 %v6950_v15 }
 0x486   : > { %v3306_v51 = vmul.f32 %v3274_v43, %v2922_v63  ;;  %v3040_v0 = vsub.f32 %v7342_v17, %v7033_v7  ;;  %v3041_v54 = vsub.f32 %v7342_v17, %v7049_v47  ;;  %v3337_v34 = vmul.f32 0.25, %v3305_v62 }
 0x487   : > { %v3307_v31 = vmul.f32 %v3275_v5, %v2923_v22  ;;  %v7565_v6 = vpop.permute.xlu1 %2617  ;;  %v3336_v46 = vmul.f32 0.25, %v3304_v35  ;;  %v4818_v33 = vunpack.i.l.bf16 %v6915_v4  ;;  %v3133_v29 = vmax.f32 %v3101_v61, 0.0  ;;  %v7575_v35 = vpop.permute.xlu0 %3014 }
 0x488   : > { %v3338_v55 = vmul.f32 0.25, %v3306_v51  ;;  %v4824_v32 = vunpack.i.l.bf16 %v6936_v26  ;;  %v1936_v44 = vand.u32 2147483647, %v1904_v27  ;;  %v8455_v52 = vpack.i.bf16 %v7242_v8, %v7223_v50 }
 0x489   : > { %v3339_v37 = vmul.f32 0.25, %v3307_v31  ;;  %v3132_v25 = vmax.f32 %v3100_v16, 0.0  ;;  %v1937_v42 = vand.u32 2147483647, %v1905_v24  ;;  %v1997_v59 = vmax.f32 %v1965_v23, 0.0 }
 0x48a   : > { %4944 = vperm.xlu1 %4942, %v8455_v52   ;;  %v3400_v17 = vpack.c.bf16 %v3338_v55, %v3336_v46  ;;  %v2781_v13 = vmax.f32 %v2749_v2, 0.0  ;;  %v3245_v57 = vmul.f32 %v4830_v41, %v3133_v29  ;;  %v3072_v1 = vand.u32 2147483647, %v3040_v0  ;;  %v8456_v55 = vld [vmem:[#allocation55_spill] sm:$0xff] }
 0x48b   : > { %v3401_v11 = vpack.c.bf16 %v3339_v37, %v3337_v34  ;;  %v1745_v3 = vmul.f32 %v4812_v36, %v7498_v38  ;;  %v2780_v20 = vmax.f32 %v2748_v39, 0.0  ;;  %v3244_v56 = vmul.f32 %v4830_v41, %v3132_v25  ;;  %v8458_v25 = vld [vmem:[#allocation49_spill] sm:$0xff] }
 0x48c   : > { %v3073_v62 = vand.u32 2147483647, %v3041_v54  ;;  %v1746_v50 = vmul.f32 %v4812_v36, %v7500_v30  ;;  %v4819_v8 = vunpack.i.h.bf16 %v6915_v4  ;;  %v2109_v22 = vmul.f32 %v4818_v33, %v1997_v59  ;;  %v2970_v63 = vpop.permute.xlu1 %2969 }
 0x48d   : > { %3544 = vmatprep.mubr.bf16.mxu0 %v3401_v11  ;;  %v2893_v5 = vmul.f32 %v4824_v32, %v2781_v13  ;;  %v2108_v9 = vmul.f32 %v4818_v33, %v1996_v48  ;;  %v2892_v23 = vmul.f32 %v4824_v32, %v2780_v20  ;;  %v1968_v43 = vsub.f32 1.0, %v1936_v44  ;;  %v7587_v48 = vpop.permute.xlu0 %1877  ;;  %v8459_v13 = vld [vmem:[#allocation72_spill] sm:$0xff] }
 0x48e   : > { %4948 = vset.pattern.permute.xlu1 %v8365_v18  ;;  %3545 = vmatmul.mubr.bf16.vlgmr.msra.gmra.mrb[0].mxu0 %v3400_v17  ;;  %v1969_v38 = vsub.f32 1.0, %v1937_v42  ;;  %v3277_v39 = vadd.f32 %v3245_v57, %v2109_v22  ;;  %v3104_v61 = vsub.f32 1.0, %v3072_v1  ;;  %v2687_v27 = vsub.f32 %v7565_v6, %v7031_v49  ;;  %v8460_v22 = vld [vmem:[#allocation50_spill] sm:$0xff]  ;;  %v8466_v42 = vld [vmem:[#allocation51_spill] sm:$0xff] }
 0x48f   : > { %3019 = vperm.xlu1 %4948, %v7395_v14   ;;  %v3039_v30 = vsub.f32 %v2970_v63, %v7049_v47  ;;  %v4825_v36 = vunpack.i.h.bf16 %v6936_v26  ;;  %v3276_v16 = vadd.f32 %v3244_v56, %v2108_v9  ;;  %v3105_v24 = vsub.f32 1.0, %v3073_v62 }
 0x490   : > { %v1908_v31 = vsub.f32 %v7391_v21, %v7033_v7  ;;  %v2925_v51 = vadd.f32 %v2893_v5, %v1746_v50  ;;  %v1909_v14 = vsub.f32 %v7391_v21, %v7049_v47  ;;  %v1540_v2 = vsub.f32 %v7524_v58, %v7031_v49 }
 0x491   : > { %v1903_v41 = vsub.f32 %v7548_v40, %v7049_v47  ;;  %v2924_v0 = vadd.f32 %v2892_v23, %v1745_v3  ;;  %v4831_v54 = vunpack.i.h.bf16 %v6950_v15  ;;  %v2000_v34 = vmax.f32 %v1968_v43, 0.0  ;;  %v7596_v46 = vpop.permute.xlu1 %1469  ;;  %v7607_v56 = vpop.permute.xlu0 %3024 }
 0x492   : > { %v2001_v37 = vmax.f32 %v1969_v38, 0.0  ;;  %v8457_v33 = vpack.i.bf16 %v7259_v10, %v8456_v55  ;;  %v3136_v29 = vmax.f32 %v3104_v61, 0.0  ;;  %v2719_v32 = vand.u32 2147483647, %v2687_v27  ;;  %v8461_v38 = vld [vmem:[#allocation67_spill] sm:$0xff] }
 0x493   : > { %v3071_v21 = vand.u32 2147483647, %v3039_v30  ;;  %v3309_v44 = vmul.f32 %v3277_v39, %v2925_v51  ;;  %v3137_v52 = vmax.f32 %v3105_v24, 0.0  ;;  %v1940_v11 = vand.u32 2147483647, %v1908_v31  ;;  %v8462_v51 = vld [vmem:[#allocation52_spill] sm:$0xff] }
 0x494   : > { %4950 = vperm.xlu1 %4948, %v8457_v33   ;;  %v3308_v17 = vmul.f32 %v3276_v16, %v2924_v0  ;;  %v1941_v59 = vand.u32 2147483647, %v1909_v14  ;;  %v3044_v57 = vsub.f32 %v8459_v13, %v7033_v7  ;;  %v1572_v1 = vand.u32 2147483647, %v1540_v2 }
 0x495   : > { %v1935_v3 = vand.u32 2147483647, %v1903_v41  ;;  %v4836_v20 = vunpack.i.l.bf16 %v8458_v25  ;;  %v3045_v10 = vsub.f32 %v8459_v13, %v7049_v47  ;;  %v2686_v62 = vsub.f32 %v7565_v6, %v6994_v28 }
 0x496   : > { %v3038_v50 = vsub.f32 %v2970_v63, %v7033_v7  ;;  %v4842_v5 = vunpack.i.l.bf16 %v8460_v22  ;;  %v2751_v9 = vsub.f32 1.0, %v2719_v32  ;;  %v3103_v23 = vsub.f32 1.0, %v3071_v21  ;;  %v7614_v43 = vpop.permute.xlu1 %1832 }
 0x497   : > { %v7617_v39 = vmul.f32 0.25, %v3309_v44  ;;  %v1972_v61 = vsub.f32 1.0, %v1940_v11  ;;  %v1539_v27 = vsub.f32 %v7524_v58, %v6994_v28  ;;  %v1902_v6 = vsub.f32 %v7548_v40, %v7033_v7  ;;  %v8463_v58 = vld [vmem:[#allocation57_spill] sm:$0xff]  ;;  %v8464_v44 = vld [vmem:[#allocation56_spill] sm:$0xff] }
 0x498   : > { %4954 = vset.pattern.permute.xlu1 %v8418_v12  ;;  %v7623_v63 = vmul.f32 0.25, %v3308_v17  ;;  %v1973_v30 = vsub.f32 1.0, %v1941_v59  ;;  %v3076_v16 = vand.u32 2147483647, %v3044_v57  ;;  %v1604_v24 = vsub.f32 1.0, %v1572_v1  ;;  %v1465_v57 = vpop.permute.xlu0 %1464 }
 0x499   : > { %1519 = vperm.xlu1 %4954, %v8461_v38   ;;  %v1967_v31 = vsub.f32 1.0, %v1935_v3  ;;  %v4854_v14 = vunpack.i.l.bf16 %v8462_v51  ;;  %v3077_v2 = vand.u32 2147483647, %v3045_v10  ;;  %v2718_v41 = vand.u32 2147483647, %v2686_v62 }
 0x49a   : > { %v3070_v0 = vand.u32 2147483647, %v3038_v50  ;;  %v2112_v33 = vmul.f32 %v4842_v5, %v2000_v34  ;;  %v2783_v32 = vmax.f32 %v2751_v9, 0.0  ;;  %v3135_v21 = vmax.f32 %v3103_v23, 0.0 }
 0x49b   : > { %v8465_v11 = vpack.i.bf16 %v8463_v58, %v8464_v44  ;;  %v2113_v40 = vmul.f32 %v4842_v5, %v2001_v37  ;;  %v7630_v17 = vmax.f32 %v1972_v61, 0.0  ;;  %v1571_v59 = vand.u32 2147483647, %v1539_v27  ;;  %v7632_v1 = vpop.permute.xlu1 %2627  ;;  %v8471_v61 = vld [vmem:[#allocation59_spill] sm:$0xff] }
 0x49c   : > { %v1934_v13 = vand.u32 2147483647, %v1902_v6  ;;  %v7634_v3 = vmax.f32 %v1973_v30, 0.0  ;;  %v3108_v10 = vsub.f32 1.0, %v3076_v16  ;;  %v1636_v62 = vmax.f32 %v1604_v24, 0.0  ;;  %v8467_v30 = vld [vmem:[#allocation68_spill] sm:$0xff] }
 0x49d   : > { %4956 = vperm.xlu1 %4954, %v8465_v11   ;;  %v1999_v50 = vmax.f32 %v1967_v31, 0.0  ;;  %v3248_v34 = vmul.f32 %v4854_v14, %v3136_v29  ;;  %v3109_v9 = vsub.f32 1.0, %v3077_v2  ;;  %v2750_v23 = vsub.f32 1.0, %v2718_v41  ;;  %v2623_v11 = vpop.permute.xlu0 %2622 }
 0x49e   : > { %v3102_v38 = vsub.f32 1.0, %v3070_v0  ;;  %v3249_v44 = vmul.f32 %v4854_v14, %v3137_v52  ;;  %v2895_v37 = vmul.f32 %v4825_v36, %v2783_v32  ;;  %v3247_v5 = vmul.f32 %v4831_v54, %v3135_v21 }
 0x49f   : > { %v1603_v6 = vsub.f32 1.0, %v1571_v59  ;;  %v1966_v29 = vsub.f32 1.0, %v1934_v13  ;;  %v7645_v16 = vmax.f32 %v3108_v10, 0.0  ;;  %v8468_v52 = vunpack.i.h.bf16 %v6904_v60  ;;  %v8469_v13 = vld [vmem:[#allocation53_spill] sm:$0xff] }
 0x4a0   : > { %v2111_v31 = vmul.f32 %v4819_v8, %v1999_v50  ;;  %v1541_v14 = vsub.f32 %v1465_v57, %v6994_v28  ;;  %v7652_v2 = vpop.permute.xlu1 %2979  ;;  %v7654_v41 = vadd.f32 %v3248_v34, %v2112_v33  ;;  %v7656_v0 = vmax.f32 %v3109_v9, 0.0  ;;  %v8470_v50 = vld [vmem:[#allocation54_spill] sm:$0xff] }
 0x4a1   : > { %4960 = vset.pattern.permute.xlu1 %v8365_v18  ;;  %v1748_v24 = vmul.f32 %v8468_v52, %v1636_v62  ;;  %v2782_v32 = vmax.f32 %v2750_v23, 0.0  ;;  %v3134_v21 = vmax.f32 %v3102_v38, 0.0  ;;  %v7658_v59 = vadd.f32 %v3249_v44, %v2113_v40  ;;  %v8472_v33 = vld [vmem:[#allocation58_spill] sm:$0xff] }
 0x4a2   : > { %1882 = vperm.xlu1 %4960, %v8467_v30   ;;  %v3279_v62 = vadd.f32 %v3247_v5, %v2111_v31  ;;  %v4860_v52 = vunpack.i.l.bf16 %v8469_v13  ;;  %v1635_v55 = vmax.f32 %v1603_v6, 0.0  ;;  %v1998_v27 = vmax.f32 %v1966_v29, 0.0 }
 0x4a3   : > { %v2927_v30 = vadd.f32 %v2895_v37, %v1748_v24  ;;  %v8473_v34 = vpack.i.bf16 %v8471_v61, %v8472_v33  ;;  %v1542_v9 = vsub.f32 %v1465_v57, %v7031_v49  ;;  %v1573_v23 = vand.u32 2147483647, %v1541_v14  ;;  %v8474_v61 = vld [vmem:[#allocation60_spill] sm:$0xff] }
 0x4a4   : > { %v2689_v40 = vsub.f32 %v2623_v11, %v7031_v49  ;;  %v2894_v37 = vmul.f32 %v4825_v36, %v2782_v32  ;;  %v3246_v5 = vmul.f32 %v4831_v54, %v3134_v21  ;;  %v2688_v6 = vsub.f32 %v2623_v11, %v6994_v28 }
 0x4a5   : > { %v3311_v38 = vmul.f32 %v3279_v62, %v2927_v30  ;;  %v7674_v29 = vpop.permute.xlu1 %1479  ;;  %v1907_v57 = vsub.f32 %v7614_v43, %v7049_v47  ;;  %v2691_v31 = vsub.f32 %v7632_v1, %v7031_v49  ;;  %v8475_v30 = vunpack.i.h.bf16 %v6904_v60  ;;  %v7690_v62 = vpop.permute.xlu0 %1474  ;;  %v8476_v60 = vld [vmem:[#allocation71_spill] sm:$0xff] }
 0x4a6   : > { %4962 = vperm.xlu1 %4960, %v8473_v34   ;;  %v2110_v15 = vmul.f32 %v4819_v8, %v1998_v27  ;;  %v1543_v36 = vsub.f32 %v7596_v46, %v6994_v28  ;;  %v1544_v54 = vsub.f32 %v7596_v46, %v7031_v49  ;;  %v1574_v32 = vand.u32 2147483647, %v1542_v9 }
 0x4a7   : > { %v3343_v14 = vmul.f32 0.25, %v3311_v38  ;;  %v1747_v26 = vmul.f32 %v8475_v30, %v1635_v55  ;;  %v1605_v21 = vsub.f32 1.0, %v1573_v23  ;;  %v2721_v11 = vand.u32 2147483647, %v2689_v40 }
 0x4a8   : > { %v2720_v55 = vand.u32 2147483647, %v2688_v6  ;;  %v3043_v4 = vsub.f32 %v7652_v2, %v7049_v47  ;;  %v3278_v27 = vadd.f32 %v3246_v5, %v2110_v15  ;;  %v1939_v34 = vand.u32 2147483647, %v1907_v57  ;;  %v8477_v57 = vld [vmem:[#allocation61_spill] sm:$0xff] }
 0x4a9   : > { %v3403_v33 = vpack.c.bf16 %v3343_v14, %v7617_v39  ;;  %v2926_v8 = vadd.f32 %v2894_v37, %v1747_v26  ;;  %v2690_v46 = vsub.f32 %v7632_v1, %v6994_v28  ;;  %v2723_v38 = vand.u32 2147483647, %v2691_v31  ;;  %v8478_v1 = vld [vmem:[#allocation48_spill] sm:$0xff]  ;;  %v8480_v26 = vld [vmem:[#allocation62_spill] sm:$0xff] }
 0x4aa   : > { %4966 = vset.pattern.permute.xlu1 %v8418_v12  ;;  %v3042_v9 = vsub.f32 %v7652_v2, %v7033_v7  ;;  %v7700_v23 = vpop.permute.xlu1 %1842  ;;  %v1575_v39 = vand.u32 2147483647, %v1543_v36  ;;  %v1576_v40 = vand.u32 2147483647, %v1544_v54  ;;  %v3075_v14 = vand.u32 2147483647, %v3043_v4  ;;  %v2633_v54 = vpop.permute.xlu0 %2632 }
 0x4ab   : > { %2677 = vperm.xlu1 %4966, %v8476_v60   ;;  %3552 = vmatprep.mubr.bf16.mxu0 %v3403_v33  ;;  %v3310_v6 = vmul.f32 %v3278_v27, %v2926_v8  ;;  %v4872_v30 = vunpack.i.l.bf16 %v8474_v61  ;;  %v1606_v60 = vsub.f32 1.0, %v1574_v32  ;;  %v2753_v37 = vsub.f32 1.0, %v2721_v11 }
 0x4ac   : > { %v1906_v5 = vsub.f32 %v7614_v43, %v7033_v7  ;;  %v8479_v31 = vpack.i.bf16 %v8477_v57, %v8478_v1  ;;  %v2752_v2 = vsub.f32 1.0, %v2720_v55  ;;  %v3107_v33 = vsub.f32 1.0, %v3075_v14 }
 0x4ad   : > { %v3342_v10 = vmul.f32 0.25, %v3310_v6  ;;  %v1971_v36 = vsub.f32 1.0, %v1939_v34  ;;  %v2722_v4 = vand.u32 2147483647, %v2690_v46  ;;  %v2755_v8 = vsub.f32 1.0, %v2723_v38  ;;  %v8481_v38 = vld [vmem:[#allocation73_spill] sm:$0xff] }
 0x4ae   : > { %v3074_v27 = vand.u32 2147483647, %v3042_v9  ;;  %v1637_v58 = vmax.f32 %v1605_v21, 0.0  ;;  %v1607_v32 = vsub.f32 1.0, %v1575_v39  ;;  %v1608_v11 = vsub.f32 1.0, %v1576_v40 }
 0x4af   : > { %4968 = vperm.xlu1 %4966, %v8479_v31   ;;  %v3402_v24 = vpack.c.bf16 %v3342_v10, %v7623_v63  ;;  %v7710_v43 = vpop.permute.xlu1 %2637  ;;  %v1638_v44 = vmax.f32 %v1606_v60, 0.0  ;;  %v2785_v57 = vmax.f32 %v2753_v37, 0.0  ;;  %v1938_v1 = vand.u32 2147483647, %v1906_v5 }
 0x4b0   : > { %v3139_v31 = vmax.f32 %v3107_v33, 0.0  ;;  %v4878_v55 = vunpack.i.l.bf16 %v8480_v26  ;;  %v2784_v34 = vmax.f32 %v2752_v2, 0.0  ;;  %v1545_v46 = vsub.f32 %v7690_v62, %v6994_v28 }
 0x4b1   : > { %v2693_v21 = vsub.f32 %v2633_v54, %v7031_v49  ;;  %3553 = vmatmul.mubr.bf16.gmra.mrb[4].mxu0 %v3402_v24  ;;  %v2003_v63 = vmax.f32 %v1971_v36, 0.0  ;;  %v2754_v10 = vsub.f32 1.0, %v2722_v4  ;;  %v2787_v9 = vmax.f32 %v2755_v8, 0.0 }
 0x4b2   : > { %v3106_v39 = vsub.f32 1.0, %v3074_v27  ;;  %v1749_v40 = vmul.f32 %v4836_v20, %v1637_v58  ;;  %v1639_v14 = vmax.f32 %v1607_v32, 0.0  ;;  %v1640_v6 = vmax.f32 %v1608_v11, 0.0 }
 0x4b3   : > { %4973 = vset.pattern.permute.xlu1 %v8365_v18  ;;  %v1546_v60 = vsub.f32 %v7690_v62, %v7031_v49  ;;  %v1750_v37 = vmul.f32 %v4836_v20, %v1638_v44  ;;  %v8482_v5 = vunpack.i.l.bf16 %v8466_v42  ;;  %v1970_v2 = vsub.f32 1.0, %v1938_v1  ;;  %v8485_v62 = vld [vmem:[#allocation64_spill] sm:$0xff] }
 0x4b4   : > { %3029 = vperm.xlu1 %4973, %v8481_v38   ;;  %v8483_v33 = vunpack.i.h.bf16 %v8462_v51  ;;  %v2990_v4 = vpop.permute.xlu1 %2989  ;;  %v7730_v58 = vand.u32 2147483647, %v1545_v46  ;;  %v2692_v32 = vsub.f32 %v2633_v54, %v6994_v28  ;;  %v2725_v11 = vand.u32 2147483647, %v2693_v21  ;;  %v8486_v38 = vld [vmem:[#allocation63_spill] sm:$0xff] }
 0x4b5   : > { %v2897_v24 = vmul.f32 %v8482_v5, %v2785_v57  ;;  %v8484_v8 = vmov %v8482_v5  ;;  %v8487_v15 = vpack.i.bf16 %v8485_v62, %v8486_v38  ;;  %v8488_v20 = vunpack.i.h.bf16 %v8460_v22 }
 0x4b6   : > { %v3251_v36 = vmul.f32 %v8483_v33, %v3139_v31  ;;  %v2896_v27 = vmul.f32 %v8484_v8, %v2784_v34  ;;  %v2786_v57 = vmax.f32 %v2754_v10, 0.0  ;;  %v8489_v1 = vunpack.i.h.bf16 %v8466_v42 }
 0x4b7   : > { %v2115_v44 = vmul.f32 %v8488_v20, %v2003_v63  ;;  %v3138_v5 = vmax.f32 %v3106_v39, 0.0  ;;  %v8490_v33 = vunpack.i.h.bf16 %v8458_v25  ;;  %v1578_v54 = vand.u32 2147483647, %v1546_v60  ;;  %v8492_v25 = vld [vmem:[#allocation66_spill] sm:$0xff] }
 0x4b8   : > { %4975 = vperm.xlu1 %4973, %v8487_v15   ;;  %v2899_v31 = vmul.f32 %v8489_v1, %v2787_v9  ;;  %v2695_v21 = vsub.f32 %v7710_v43, %v7031_v49  ;;  %v2929_v62 = vadd.f32 %v2897_v24, %v1750_v37  ;;  %v2002_v15 = vmax.f32 %v1970_v2, 0.0 }
 0x4b9   : > { %v1751_v34 = vmul.f32 %v8490_v33, %v1639_v14  ;;  %v8491_v46 = vmov %v8490_v33  ;;  %v3283_v38 = vadd.f32 %v3251_v36, %v2115_v44  ;;  %v1911_v63 = vsub.f32 %v7700_v23, %v7049_v47  ;;  %v7750_v14 = vpop.permute.xlu1 %1489 }
 0x4ba   : > { %v1752_v8 = vmul.f32 %v8491_v46, %v1640_v6  ;;  %v2928_v10 = vadd.f32 %v2896_v27, %v1749_v40  ;;  %v2724_v20 = vand.u32 2147483647, %v2692_v32  ;;  %v2757_v9 = vsub.f32 1.0, %v2725_v11  ;;  %v8493_v6 = vld [vmem:[#allocation65_spill] sm:$0xff] }
 0x4bb   : > { %v1548_v39 = vsub.f32 %v7674_v29, %v7031_v49  ;;  %v8494_v60 = vpack.i.bf16 %v8492_v25, %v8493_v6  ;;  %v1609_v1 = vsub.f32 1.0, %v7730_v58  ;;  %v8495_v37 = vunpack.i.h.bf16 %v8466_v42 }
 0x4bc   : > { %v2931_v2 = vadd.f32 %v2899_v31, %v1752_v8  ;;  %v8496_v36 = vunpack.i.h.bf16 %v8462_v51  ;;  %v1610_v27 = vsub.f32 1.0, %v1578_v54  ;;  %v1910_v32 = vsub.f32 %v7700_v23, %v7033_v7 }
 0x4bd   : > { %4985 = vperm.xlu1 %4973, %v8494_v60   ;;  %v2898_v24 = vmul.f32 %v8495_v37, %v2786_v57  ;;  %v2694_v11 = vsub.f32 %v7710_v43, %v6994_v28  ;;  %v2727_v44 = vand.u32 2147483647, %v2695_v21  ;;  %v8497_v33 = vunpack.i.h.bf16 %v8460_v22  ;;  %v8498_v22 = vld [vmem:[#allocation70_spill] sm:$0xff] }
 0x4be   : > { %v3250_v40 = vmul.f32 %v8496_v36, %v3138_v5  ;;  %v1943_v25 = vand.u32 2147483647, %v1911_v63  ;;  %v3313_v58 = vmul.f32 %v7658_v59, %v2929_v62  ;;  %v3315_v42 = vmul.f32 %v3283_v38, %v2931_v2  ;;  %v7770_v21 = vpop.permute.xlu1 %1852 }
 0x4bf   : > { %v2114_v46 = vmul.f32 %v8497_v33, %v2002_v15  ;;  %v2756_v57 = vsub.f32 1.0, %v2724_v20  ;;  %v2789_v31 = vmax.f32 %v2757_v9, 0.0  ;;  %v1547_v51 = vsub.f32 %v7674_v29, %v6994_v28  ;;  %v8499_v15 = vld [vmem:[#allocation69_spill] sm:$0xff] }
 0x4c0   : > { %v1580_v5 = vand.u32 2147483647, %v1548_v39  ;;  %v2930_v23 = vadd.f32 %v2898_v24, %v1751_v34  ;;  %v3345_v54 = vmul.f32 0.25, %v3313_v58  ;;  %v3347_v43 = vmul.f32 0.25, %v3315_v42 }
 0x4c1   : > { %4989 = vset.pattern.permute.xlu1 %v8418_v12  ;;  %v3282_v8 = vadd.f32 %v3250_v40, %v2114_v46  ;;  %v8500_v63 = vpack.i.bf16 %v8498_v22, %v8499_v15  ;;  %v1942_v59 = vand.u32 2147483647, %v1910_v32  ;;  %v2726_v62 = vand.u32 2147483647, %v2694_v11 }
 0x4c2   : > { %v2759_v38 = vsub.f32 1.0, %v2727_v44  ;;  %v3046_v20 = vsub.f32 %v2990_v4, %v7033_v7  ;;  %v1975_v9 = vsub.f32 1.0, %v1943_v25  ;;  %v3405_v29 = vpack.c.bf16 %v3347_v43, %v3345_v54 }
 0x4c3   : > { %4991 = vperm.xlu1 %4989, %v8500_v63   ;;  %v3047_v39 = vsub.f32 %v2990_v4, %v7049_v47  ;;  %v3312_v12 = vmul.f32 %v7654_v41, %v2928_v10  ;;  %v1642_v34 = vmax.f32 %v1610_v27, 0.0  ;;  %v1579_v6 = vand.u32 2147483647, %v1547_v51  ;;  %v7781_v4 = vpop.permute.xlu1 %2647 }
 0x4c4   : > { %v1612_v60 = vsub.f32 1.0, %v1580_v5  ;;  %v3078_v37 = vand.u32 2147483647, %v3046_v20  ;;  %v2788_v24 = vmax.f32 %v2756_v57, 0.0  ;;  %v2901_v2 = vmul.f32 %v4872_v30, %v2789_v31  ;;  %3560 = vmatprep.mubr.bf16.mxu0 %v3405_v29 }
 0x4c5   : > { %v3079_v36 = vand.u32 2147483647, %v3047_v39  ;;  %v3314_v40 = vmul.f32 %v3282_v8, %v2930_v23  ;;  %v1974_v32 = vsub.f32 1.0, %v1942_v59  ;;  %v2758_v11 = vsub.f32 1.0, %v2726_v62 }
 0x4c6   : > { %v2791_v44 = vmax.f32 %v2759_v38, 0.0  ;;  %v3110_v33 = vsub.f32 1.0, %v3078_v37  ;;  %v2007_v41 = vmax.f32 %v1975_v9, 0.0  ;;  %v3344_v27 = vmul.f32 0.25, %v3312_v12 }
 0x4c7   : > { %5001 = vset.pattern.permute.xlu1 %v8365_v18  ;;  %v3111_v10 = vsub.f32 1.0, %v3079_v36  ;;  %v3346_v46 = vmul.f32 0.25, %v3314_v40  ;;  %v3253_v25 = vmul.f32 %v4878_v55, %v7656_v0  ;;  %v1611_v58 = vsub.f32 1.0, %v1579_v6 }
 0x4c8   : > { %v1644_v42 = vmax.f32 %v1612_v60, 0.0  ;;  %v3142_v57 = vmax.f32 %v3110_v33, 0.0  ;;  %v1641_v31 = vmax.f32 %v1609_v1, 0.0  ;;  %v1754_v18 = vmul.f32 %v4860_v52, %v1642_v34  ;;  %v7799_v20 = vpop.permute.xlu1 %2999 }
 0x4c9   : > { %v3143_v51 = vmax.f32 %v3111_v10, 0.0  ;;  %v3404_v5 = vpack.c.bf16 %v3346_v46, %v3344_v27  ;;  %v8501_v23 = vunpack.i.l.bf16 %v8470_v50  ;;  %v2006_v54 = vmax.f32 %v1974_v32, 0.0 }
 0x4ca   : > { %v2790_v43 = vmax.f32 %v2758_v11, 0.0  ;;  %v8502_v22 = vunpack.i.h.bf16 %v8474_v61  ;;  %v2900_v0 = vmul.f32 %v4872_v30, %v2788_v24  ;;  %v2933_v63 = vadd.f32 %v2901_v2, %v1754_v18 }
 0x4cb   : > { %v2117_v8 = vmul.f32 %v8501_v23, %v7634_v3  ;;  %v8503_v1 = vunpack.i.h.bf16 %v8470_v50  ;;  %v8504_v62 = vunpack.i.h.bf16 %v8480_v26  ;;  %3561 = vmatmul.mubr.bf16.gmra.mrb[8].mxu0 %v3404_v5  ;;  %v1643_v9 = vmax.f32 %v1611_v58, 0.0  ;;  %v8511_v58 = vld [vmem:[#allocation74_spill] sm:$0xff] }
 0x4cc   : > { %v2903_v15 = vmul.f32 %v8502_v22, %v2791_v44  ;;  %v8505_v3 = vunpack.i.h.bf16 %v8469_v13  ;;  %v3252_v30 = vmul.f32 %v4878_v55, %v7645_v16  ;;  %v1753_v6 = vmul.f32 %v4860_v52, %v1641_v31  ;;  %v8512_v31 = vld [vmem:[#allocation75_spill] sm:$0xff] }
 0x4cd   : > { %v2119_v59 = vmul.f32 %v8503_v1, %v2007_v41  ;;  %v3255_v38 = vmul.f32 %v8504_v62, %v3143_v51  ;;  %v8506_v39 = vmov %v8504_v62  ;;  %v3285_v34 = vadd.f32 %v3253_v25, %v2117_v8  ;;  %v7819_v52 = vpop.permute.xlu1 %1499  ;;  %v1485_v51 = vpop.permute.xlu0 %1484 }
 0x4ce   : > { %v1756_v29 = vmul.f32 %v8505_v3, %v1644_v42  ;;  %v3254_v12 = vmul.f32 %v8506_v39, %v3142_v57  ;;  %v8507_v37 = vmov %v8503_v1  ;;  %v8508_v2 = vmov %v8502_v22 }
 0x4cf   : > { %v3287_v60 = vadd.f32 %v3255_v38, %v2119_v59  ;;  %v2118_v24 = vmul.f32 %v8507_v37, %v2006_v54  ;;  %v2902_v36 = vmul.f32 %v8508_v2, %v2790_v43  ;;  %v8509_v32 = vmov %v8501_v23 }
 0x4d0   : > { %v2935_v40 = vadd.f32 %v2903_v15, %v1756_v29  ;;  %v2116_v11 = vmul.f32 %v8509_v32, %v7630_v17  ;;  %v2932_v44 = vadd.f32 %v2900_v0, %v1753_v6  ;;  %v3317_v33 = vmul.f32 %v3285_v34, %v2933_v63 }
 0x4d1   : > { %v8510_v16 = vmov %v8505_v3  ;;  %v3286_v55 = vadd.f32 %v3254_v12, %v2118_v24  ;;  %v1912_v42 = vsub.f32 %v8511_v58, %v7033_v7  ;;  %v7823_v17 = vpop.permute.xlu1 %4908  ;;  %v1913_v13 = vsub.f32 %v8511_v58, %v7049_v47  ;;  %v2643_v59 = vpop.permute.xlu0 %2642 }
 0x4d2   : > { %v1755_v26 = vmul.f32 %v8510_v16, %v1643_v9  ;;  %v3319_v41 = vmul.f32 %v3287_v60, %v2935_v40  ;;  %v3284_v10 = vadd.f32 %v3252_v30, %v2116_v11  ;;  %v3349_v46 = vmul.f32 0.25, %v3317_v33 }
 0x4d3   : > { %v3048_v18 = vsub.f32 %v8512_v31, %v7033_v7  ;;  %v3049_v8 = vsub.f32 %v8512_v31, %v7049_v47  ;;  %v1944_v54 = vand.u32 2147483647, %v1912_v42  ;;  %v1945_v22 = vand.u32 2147483647, %v1913_v13 }
 0x4d4   : > { %v2934_v27 = vadd.f32 %v2902_v36, %v1755_v26  ;;  %v3351_v25 = vmul.f32 0.25, %v3319_v41  ;;  %v3316_v61 = vmul.f32 %v3284_v10, %v2932_v44  ;;  %v1549_v38 = vsub.f32 %v1485_v51, %v6994_v28 }
 0x4d5   : > { %v3080_v0 = vand.u32 2147483647, %v3048_v18  ;;  %v3081_v63 = vand.u32 2147483647, %v3049_v8  ;;  %v1976_v1 = vsub.f32 1.0, %v1944_v54  ;;  %v1977_v62 = vsub.f32 1.0, %v1945_v22 }
 0x4d6   : > { %v3407_v57 = vpack.c.bf16 %v3351_v25, %v3349_v46  ;;  %v3318_v50 = vmul.f32 %v3286_v55, %v2934_v27  ;;  %v3348_v5 = vmul.f32 0.25, %v3316_v61  ;;  %v7831_v15 = vpop.permute.xlu1 %1862  ;;  %v1550_v39 = vsub.f32 %v1485_v51, %v7031_v49 }
 0x4d7   : > { %v3112_v3 = vsub.f32 1.0, %v3080_v0  ;;  %v3113_v29 = vsub.f32 1.0, %v3081_v63  ;;  %v2696_v12 = vsub.f32 %v2643_v59, %v6994_v28  ;;  %v7838_v30 = vmax.f32 %v1976_v1, 0.0 }
 0x4d8   : > { %3568 = vmatprep.mubr.bf16.mxu0 %v3407_v57  ;;  %v3350_v23 = vmul.f32 0.25, %v3318_v50  ;;  %v2697_v34 = vsub.f32 %v2643_v59, %v7031_v49  ;;  %v1551_v6 = vsub.f32 %v7750_v14, %v6994_v28  ;;  %v1552_v60 = vsub.f32 %v7750_v14, %v7031_v49 }
 0x4d9   : > { %v7845_v37 = vmax.f32 %v1977_v62, 0.0  ;;  %v1581_v24 = vand.u32 2147483647, %v1549_v38  ;;  %v1914_v2 = vsub.f32 %v7770_v21, %v7033_v7  ;;  %v1915_v36 = vsub.f32 %v7770_v21, %v7049_v47 }
 0x4da   : > { %v3406_v43 = vpack.c.bf16 %v3350_v23, %v3348_v5  ;;  %v7834_v9 = vpop.permute.xlu1 %4914  ;;  %v7851_v40 = vmax.f32 %v3112_v3, 0.0  ;;  %v2698_v32 = vsub.f32 %v7781_v4, %v6994_v28  ;;  %v2699_v11 = vsub.f32 %v7781_v4, %v7031_v49 }
 0x4db   : > { %v3050_v14 = vsub.f32 %v7799_v20, %v7033_v7  ;;  %v7861_v33 = vmax.f32 %v3113_v29, 0.0  ;;  %v1582_v16 = vand.u32 2147483647, %v1550_v39  ;;  %v2728_v26 = vand.u32 2147483647, %v2696_v12 }
 0x4dc   : > { %3569 = vmatmul.mubr.bf16.gmra.mrb[12].mxu0 %v3406_v43  ;;  %v3051_v21 = vsub.f32 %v7799_v20, %v7049_v47  ;;  %v2729_v55 = vand.u32 2147483647, %v2697_v34  ;;  %v1583_v41 = vand.u32 2147483647, %v1551_v6  ;;  %v1584_v10 = vand.u32 2147483647, %v1552_v60 }
 0x4dd   : > { %v1916_v27 = vsub.f32 %v7507_v53, %v7033_v7  ;;  %v1613_v46 = vsub.f32 1.0, %v1581_v24  ;;  %v1946_v4 = vand.u32 2147483647, %v1914_v2  ;;  %v1947_v25 = vand.u32 2147483647, %v1915_v36 }
 0x4de   : > { %v1917_v61 = vsub.f32 %v7507_v53, %v7049_v47  ;;  %v2730_v58 = vand.u32 2147483647, %v2698_v32  ;;  %v2731_v42 = vand.u32 2147483647, %v2699_v11  ;;  %v3082_v57 = vand.u32 2147483647, %v3050_v14 }
 0x4df   : > { %v7859_v44 = vpop.permute.xlu1 %2657  ;;  %v3052_v13 = vsub.f32 %v7530_v45, %v7033_v7  ;;  %v1614_v20 = vsub.f32 1.0, %v1582_v16  ;;  %v2760_v31 = vsub.f32 1.0, %v2728_v26  ;;  %v3083_v18 = vand.u32 2147483647, %v3051_v21 }
 0x4e0   : > { %v3053_v51 = vsub.f32 %v7530_v45, %v7049_v47  ;;  %v2761_v5 = vsub.f32 1.0, %v2729_v55  ;;  %v1615_v23 = vsub.f32 1.0, %v1583_v41  ;;  %v1616_v8 = vsub.f32 1.0, %v1584_v10  ;;  %v7882_v55 = vpop.permute.xlu0 %1494 }
 0x4e1   : > { %v1920_v54 = vsub.f32 %v7558_v19, %v7033_v7  ;;  %v1921_v43 = vsub.f32 %v7558_v19, %v7049_v47  ;;  %v1978_v22 = vsub.f32 1.0, %v1946_v4  ;;  %v1979_v0 = vsub.f32 1.0, %v1947_v25 }
 0x4e2   : > { %v1645_v63 = vmax.f32 %v1613_v46, 0.0  ;;  %v2762_v1 = vsub.f32 1.0, %v2730_v58  ;;  %v2763_v59 = vsub.f32 1.0, %v2731_v42  ;;  %v3114_v62 = vsub.f32 1.0, %v3082_v57 }
 0x4e3   : > { %v4921_v50 = vpop.permute.xlu1 %4920  ;;  %v1646_v38 = vmax.f32 %v1614_v20, 0.0  ;;  %v2792_v3 = vmax.f32 %v2760_v31, 0.0  ;;  %v3115_v29 = vsub.f32 1.0, %v3083_v18  ;;  %v4911_v39 = vunpack.i.h.bf16 %v7823_v17 }
 0x4e4   : > { %v2793_v34 = vmax.f32 %v2761_v5, 0.0  ;;  %v1647_v6 = vmax.f32 %v1615_v23, 0.0  ;;  %v1648_v60 = vmax.f32 %v1616_v8, 0.0  ;;  %v4923_v24 = vunpack.i.h.bf16 %v4921_v50 }
 0x4e5   : > { %v2010_v2 = vmax.f32 %v1978_v22, 0.0  ;;  %v2011_v36 = vmax.f32 %v1979_v0, 0.0  ;;  %v4910_v32 = vunpack.i.l.bf16 %v7823_v17  ;;  %v4922_v11 = vunpack.i.l.bf16 %v4921_v50 }
 0x4e6   : > { %v2794_v14 = vmax.f32 %v2762_v1, 0.0  ;;  %v2795_v16 = vmax.f32 %v2763_v59, 0.0  ;;  %v3146_v26 = vmax.f32 %v3114_v62, 0.0  ;;  %v4917_v21 = vunpack.i.h.bf16 %v7834_v9 }
 0x4e7   : > { %v3147_v41 = vmax.f32 %v3115_v29, 0.0  ;;  %v1759_v10 = vmul.f32 %v4911_v39, %v1647_v6  ;;  %v1760_v46 = vmul.f32 %v4911_v39, %v1648_v60  ;;  %v4916_v4 = vunpack.i.l.bf16 %v7834_v9 }
 0x4e8   : > { %v7878_v12 = vpop.permute.xlu1 %3009  ;;  %v2906_v58 = vmul.f32 %v4923_v24, %v2794_v14  ;;  %v2907_v42 = vmul.f32 %v4923_v24, %v2795_v16  ;;  %v1757_v31 = vmul.f32 %v4910_v32, %v1645_v63  ;;  %v1758_v17 = vmul.f32 %v4910_v32, %v1646_v38  ;;  %v2653_v38 = vpop.permute.xlu0 %2652 }
 0x4e9   : > { %v2904_v50 = vmul.f32 %v4922_v11, %v2792_v3  ;;  %v2905_v18 = vmul.f32 %v4922_v11, %v2793_v34  ;;  %v2122_v5 = vmul.f32 %v4917_v21, %v2010_v2  ;;  %v2123_v23 = vmul.f32 %v4917_v21, %v2011_v36 }
 0x4ea   : > { %v2120_v0 = vmul.f32 %v4916_v4, %v7838_v30  ;;  %v2121_v1 = vmul.f32 %v4916_v4, %v7845_v37  ;;  %v2938_v62 = vadd.f32 %v2906_v58, %v1759_v10  ;;  %v2939_v29 = vadd.f32 %v2907_v42, %v1760_v46 }
 0x4eb   : > { %v2936_v3 = vadd.f32 %v2904_v50, %v1757_v31  ;;  %v2937_v34 = vadd.f32 %v2905_v18, %v1758_v17  ;;  %v1948_v30 = vand.u32 2147483647, %v1916_v27  ;;  %v3084_v32 = vand.u32 2147483647, %v3052_v13 }
 0x4ec   : > { %v4927_v25 = vpop.permute.xlu1 %4926  ;;  %v1952_v27 = vand.u32 2147483647, %v1920_v54  ;;  %v1953_v53 = vand.u32 2147483647, %v1921_v43  ;;  %v3057_v13 = vsub.f32 %v7575_v35, %v7049_v47  ;;  %v7915_v10 = vpop.permute.xlu0 %1504  ;;  %v1924_v19 = vsub.f32 %v7587_v48, %v7033_v7 }
 0x4ed   : > { %v4929_v57 = vunpack.i.h.bf16 %v4927_v25  ;;  %v4928_v20 = vunpack.i.l.bf16 %v4927_v25  ;;  %v1980_v45 = vsub.f32 1.0, %v1948_v30  ;;  %v3116_v25 = vsub.f32 1.0, %v3084_v32 }
 0x4ee   : > { %v1984_v58 = vsub.f32 1.0, %v1952_v27  ;;  %v1985_v42 = vsub.f32 1.0, %v1953_v53  ;;  %v1554_v31 = vsub.f32 %v7882_v55, %v7031_v49  ;;  %v2700_v17 = vsub.f32 %v2653_v38, %v6994_v28 }
 0x4ef   : > { %v3258_v8 = vmul.f32 %v4929_v57, %v3146_v26  ;;  %v3259_v22 = vmul.f32 %v4929_v57, %v3147_v41  ;;  %v3256_v59 = vmul.f32 %v4928_v20, %v7851_v40  ;;  %v3257_v9 = vmul.f32 %v4928_v20, %v7861_v33 }
 0x4f0   : > { %v1949_v33 = vand.u32 2147483647, %v1917_v61  ;;  %v3085_v26 = vand.u32 2147483647, %v3053_v51  ;;  %v3056_v61 = vsub.f32 %v7575_v35, %v7033_v7  ;;  %v7923_v35 = vand.u32 2147483647, %v3057_v13 }
 0x4f1   : > { %v3290_v39 = vadd.f32 %v3258_v8, %v2122_v5  ;;  %v3291_v6 = vadd.f32 %v3259_v22, %v2123_v23  ;;  %v7889_v63 = vpop.permute.xlu1 %1509  ;;  %v3288_v60 = vadd.f32 %v3256_v59, %v2120_v0  ;;  %v3289_v24 = vadd.f32 %v3257_v9, %v2121_v1 }
 0x4f2   : > { %v1981_v51 = vsub.f32 1.0, %v1949_v33  ;;  %v3117_v54 = vsub.f32 1.0, %v3085_v26  ;;  %v7921_v57 = vand.u32 2147483647, %v3056_v61  ;;  %v1553_v20 = vsub.f32 %v7882_v55, %v6994_v28  ;;  %v7945_v55 = vpop.permute.xlu0 %2662 }
 0x4f3   : > { %v3323_v2 = vmul.f32 %v3291_v6, %v2939_v29  ;;  %v3322_v36 = vmul.f32 %v3290_v39, %v2938_v62  ;;  %v3321_v37 = vmul.f32 %v3289_v24, %v2937_v34  ;;  %v3320_v40 = vmul.f32 %v3288_v60, %v2936_v3 }
 0x4f4   : > { %v7930_v50 = vmax.f32 %v1980_v45, 0.0  ;;  %v7932_v18 = vmax.f32 %v1981_v51, 0.0  ;;  %v1925_v5 = vsub.f32 %v7587_v48, %v7049_v47  ;;  %v2701_v23 = vsub.f32 %v2653_v38, %v7031_v49 }
 0x4f5   : > { %v7900_v11 = vpop.permute.xlu1 %4932  ;;  %v3355_v14 = vmul.f32 0.25, %v3323_v2  ;;  %v3354_v16 = vmul.f32 0.25, %v3322_v36  ;;  %v3353_v21 = vmul.f32 0.25, %v3321_v37  ;;  %v3352_v41 = vmul.f32 0.25, %v3320_v40 }
 0x4f6   : > { %v7937_v8 = vmax.f32 %v3116_v25, 0.0  ;;  %v7939_v22 = vmax.f32 %v3117_v54, 0.0  ;;  %v7941_v0 = vmax.f32 %v1984_v58, 0.0  ;;  %v7943_v1 = vand.u32 2147483647, %v1924_v19  ;;  %v7978_v27 = vpop.permute.xlu0 %1514 }
 0x4f7   : > { %v3409_v46 = vpack.c.bf16 %v3355_v14, %v3353_v21  ;;  %v3408_v4 = vpack.c.bf16 %v3354_v16, %v3352_v41  ;;  %v7949_v9 = vmax.f32 %v1985_v42, 0.0  ;;  %v3060_v29 = vsub.f32 %v7607_v56, %v7033_v7 }
 0x4f8   : > { %v1585_v39 = vand.u32 2147483647, %v1553_v20  ;;  %v1586_v6 = vand.u32 2147483647, %v1554_v31  ;;  %v2732_v38 = vand.u32 2147483647, %v2700_v17  ;;  %v1555_v60 = vsub.f32 %v7819_v52, %v6994_v28 }
 0x4f9   : > { %3576 = vmatprep.mubr.bf16.mxu0 %v3409_v46  ;;  %v7955_v3 = vand.u32 2147483647, %v1925_v5  ;;  %v2733_v34 = vand.u32 2147483647, %v2701_v23  ;;  %v1556_v24 = vsub.f32 %v7819_v52, %v7031_v49  ;;  %v3061_v36 = vsub.f32 %v7607_v56, %v7049_v47 }
 0x4fa   : > { %v7919_v43 = vpop.permute.xlu1 %1872  ;;  %3577 = vmatmul.mubr.bf16.gmra.mrb[16].mxu0 %v3408_v4  ;;  %v1918_v30 = vsub.f32 %v7831_v15, %v7033_v7  ;;  %v1919_v37 = vsub.f32 %v7831_v15, %v7049_v47  ;;  %v7968_v40 = vand.u32 2147483647, %v3060_v29  ;;  %v2702_v33 = vsub.f32 %v7859_v44, %v6994_v28 }
 0x4fb   : > { %v2703_v32 = vsub.f32 %v7859_v44, %v7031_v49  ;;  %v3054_v52 = vsub.f32 %v7878_v12, %v7033_v7  ;;  %v1617_v56 = vsub.f32 1.0, %v1585_v39  ;;  %v1618_v16 = vsub.f32 1.0, %v1586_v6  ;;  %v7993_v39 = vpop.permute.xlu0 %2672 }
 0x4fc   : > { %v2764_v26 = vsub.f32 1.0, %v2732_v38  ;;  %v3055_v15 = vsub.f32 %v7878_v12, %v7049_v47  ;;  %v2765_v61 = vsub.f32 1.0, %v2733_v34  ;;  %v1587_v13 = vand.u32 2147483647, %v1555_v60 }
 0x4fd   : > { %v1588_v21 = vand.u32 2147483647, %v1556_v24  ;;  %v7983_v41 = vand.u32 2147483647, %v3061_v36  ;;  %v1557_v44 = vsub.f32 %v7915_v10, %v6994_v28  ;;  %v1950_v45 = vand.u32 2147483647, %v1918_v30 }
 0x4fe   : > { %v7947_v59 = vpop.permute.xlu1 %4938  ;;  %v1951_v51 = vand.u32 2147483647, %v1919_v37  ;;  %v2734_v46 = vand.u32 2147483647, %v2702_v33  ;;  %v2735_v4 = vand.u32 2147483647, %v2703_v32  ;;  %v1558_v31 = vsub.f32 %v7915_v10, %v7031_v49 }
 0x4ff   : > { %v3086_v25 = vand.u32 2147483647, %v3054_v52  ;;  %v1649_v58 = vmax.f32 %v1617_v56, 0.0  ;;  %v1650_v19 = vmax.f32 %v1618_v16, 0.0  ;;  %v2796_v42 = vmax.f32 %v2764_v26, 0.0 }
 0x500   : > { %v3087_v12 = vand.u32 2147483647, %v3055_v15  ;;  %v2797_v20 = vmax.f32 %v2765_v61, 0.0  ;;  %v1619_v17 = vsub.f32 1.0, %v1587_v13  ;;  %v1620_v5 = vsub.f32 1.0, %v1588_v21 }
 0x501   : > { %v7989_v23 = vand.u32 2147483647, %v1557_v44  ;;  %v2704_v29 = vsub.f32 %v7945_v55, %v6994_v28  ;;  %v1982_v6 = vsub.f32 1.0, %v1950_v45  ;;  %v1983_v38 = vsub.f32 1.0, %v1951_v51 }
 0x502   : > { %v2705_v34 = vsub.f32 %v7945_v55, %v7031_v49  ;;  %v2766_v60 = vsub.f32 1.0, %v2734_v46  ;;  %v2767_v24 = vsub.f32 1.0, %v2735_v4  ;;  %v3118_v36 = vsub.f32 1.0, %v3086_v25 }
 0x503   : > { %v7976_v14 = vpop.permute.xlu1 %2667  ;;  %v1561_v10 = vsub.f32 %v7978_v27, %v6994_v28  ;;  %v1562_v30 = vsub.f32 %v7978_v27, %v7031_v49  ;;  %v3119_v37 = vsub.f32 1.0, %v3087_v12  ;;  %v4935_v33 = vunpack.i.h.bf16 %v7900_v11 }
 0x504   : > { %v2708_v52 = vsub.f32 %v7993_v39, %v6994_v28  ;;  %v1651_v56 = vmax.f32 %v1619_v17, 0.0  ;;  %v1652_v16 = vmax.f32 %v1620_v5, 0.0  ;;  %v2014_v26 = vmax.f32 %v1982_v6, 0.0 }
 0x505   : > { %v2015_v15 = vmax.f32 %v1983_v38, 0.0  ;;  %v4934_v61 = vunpack.i.l.bf16 %v7900_v11  ;;  %v2798_v21 = vmax.f32 %v2766_v60, 0.0  ;;  %v2799_v44 = vmax.f32 %v2767_v24, 0.0 }
 0x506   : > { %v3150_v45 = vmax.f32 %v3118_v36, 0.0  ;;  %v4941_v27 = vunpack.i.h.bf16 %v7947_v59  ;;  %v3151_v51 = vmax.f32 %v3119_v37, 0.0  ;;  %v1763_v46 = vmul.f32 %v4935_v33, %v1651_v56 }
 0x507   : > { %v1764_v4 = vmul.f32 %v4935_v33, %v1652_v16  ;;  %v4940_v25 = vunpack.i.l.bf16 %v7947_v59  ;;  %v1761_v6 = vmul.f32 %v4934_v61, %v1649_v58  ;;  %v1762_v38 = vmul.f32 %v4934_v61, %v1650_v19 }
 0x508   : > { %v2127_v60 = vmul.f32 %v4941_v27, %v2015_v15  ;;  %v1590_v15 = vand.u32 2147483647, %v1558_v31  ;;  %v1621_v31 = vsub.f32 1.0, %v7989_v23  ;;  %v8515_v23 = vsub.f32 1.0, %v7943_v1 }
 0x509   : > { %v4945_v54 = vpop.permute.xlu1 %4944  ;;  %v2124_v62 = vmul.f32 %v4940_v25, %v7930_v50  ;;  %v2125_v37 = vmul.f32 %v4940_v25, %v7932_v18  ;;  %v2709_v50 = vsub.f32 %v7993_v39, %v7031_v49  ;;  %v8022_v39 = vpop.permute.xlu0 %4980 }
 0x50a   : > { %v4947_v55 = vunpack.i.h.bf16 %v4945_v54  ;;  %v4946_v13 = vunpack.i.l.bf16 %v4945_v54  ;;  %v2126_v54 = vmul.f32 %v4941_v27, %v2014_v26 }
 0x50c   : > { %v2910_v53 = vmul.f32 %v4947_v55, %v2798_v21  ;;  %v2911_v17 = vmul.f32 %v4947_v55, %v2799_v44  ;;  %v2908_v48 = vmul.f32 %v4946_v13, %v2796_v42  ;;  %v2909_v11 = vmul.f32 %v4946_v13, %v2797_v20 }
 0x50d   : > { %v2736_v13 = vand.u32 2147483647, %v2704_v29  ;;  %v2741_v29 = vand.u32 2147483647, %v2709_v50  ;;  %v4982_v50 = vunpack.i.l.bf16 %v8022_v39 }
 0x50e   : > { %v8002_v32 = vpop.permute.xlu1 %3019  ;;  %v2942_v56 = vadd.f32 %v2910_v53, %v1763_v46  ;;  %v2943_v16 = vadd.f32 %v2911_v17, %v1764_v4  ;;  %v2940_v19 = vadd.f32 %v2908_v48, %v1761_v6  ;;  %v2941_v42 = vadd.f32 %v2909_v11, %v1762_v38 }
 0x50f   : > { %v1593_v53 = vand.u32 2147483647, %v1561_v10  ;;  %v2740_v46 = vand.u32 2147483647, %v2708_v52  ;;  %v1622_v4 = vsub.f32 1.0, %v1590_v15  ;;  %v8514_v10 = vsub.f32 1.0, %v7923_v35 }
 0x510   : > { %v8516_v11 = vsub.f32 1.0, %v7955_v3  ;;  %v1559_v3 = vsub.f32 %v7889_v63, %v6994_v28 }
 0x511   : > { %v8030_v17 = vmax.f32 %v8514_v10, 0.0  ;;  %v1625_v52 = vsub.f32 1.0, %v1593_v53  ;;  %v4983_v53 = vunpack.i.h.bf16 %v8022_v39 }
 0x513   : > { %v4951_v12 = vpop.permute.xlu1 %4950 }
 0x514   : > { %v4953_v5 = vunpack.i.h.bf16 %v4951_v12  ;;  %v4952_v2 = vunpack.i.l.bf16 %v4951_v12  ;;  %v8513_v12 = vsub.f32 1.0, %v7921_v57 }
 0x516   : > { %v3262_v24 = vmul.f32 %v4953_v5, %v3150_v45  ;;  %v3263_v36 = vmul.f32 %v4953_v5, %v3151_v51  ;;  %v3260_v33 = vmul.f32 %v4952_v2, %v7937_v8  ;;  %v3261_v59 = vmul.f32 %v4952_v2, %v7939_v22 }
 0x517   : > { %v2737_v8 = vand.u32 2147483647, %v2705_v34  ;;  %v3124_v2 = vsub.f32 1.0, %v7968_v40  ;;  %v1594_v51 = vand.u32 2147483647, %v1562_v30  ;;  %v8026_v40 = vmax.f32 %v8513_v12, 0.0 }
 0x518   : > { %v3294_v55 = vadd.f32 %v3262_v24, %v2126_v54  ;;  %v3295_v21 = vadd.f32 %v3263_v36, %v2127_v60  ;;  %v8013_v58 = vpop.permute.xlu1 %1519  ;;  %v3292_v20 = vadd.f32 %v3260_v33, %v2124_v62  ;;  %v3293_v26 = vadd.f32 %v3261_v59, %v2125_v37 }
 0x519   : > { %v3125_v62 = vsub.f32 1.0, %v7983_v41  ;;  %v2768_v5 = vsub.f32 1.0, %v2736_v13  ;;  %v2769_v41 = vsub.f32 1.0, %v2737_v8  ;;  %v8034_v30 = vmax.f32 %v8515_v23, 0.0 }
 0x51a   : > { %v3327_v61 = vmul.f32 %v3295_v21, %v2943_v16  ;;  %v3326_v18 = vmul.f32 %v3294_v55, %v2942_v56  ;;  %v3325_v44 = vmul.f32 %v3293_v26, %v2941_v42  ;;  %v3324_v22 = vmul.f32 %v3292_v20, %v2940_v19  ;;  %v8048_v16 = vpop.permute.xlu0 %4997 }
 0x51b   : > { %v8038_v54 = vmax.f32 %v8516_v11, 0.0  ;;  %v3156_v57 = vmax.f32 %v3124_v2, 0.0  ;;  %v1626_v60 = vsub.f32 1.0, %v1594_v51  ;;  %v2772_v24 = vsub.f32 1.0, %v2740_v46 }
 0x51c   : > { %v8018_v45 = vpop.permute.xlu1 %4956  ;;  %v3359_v27 = vmul.f32 0.25, %v3327_v61  ;;  %v3358_v48 = vmul.f32 0.25, %v3326_v18  ;;  %v3357_v34 = vmul.f32 0.25, %v3325_v44  ;;  %v3356_v25 = vmul.f32 0.25, %v3324_v22 }
 0x51d   : > { %v3157_v35 = vmax.f32 %v3125_v62, 0.0  ;;  %v8040_v37 = vmax.f32 %v1621_v31, 0.0  ;;  %v8042_v33 = vmax.f32 %v1622_v4, 0.0  ;;  %v2773_v59 = vsub.f32 1.0, %v2741_v29 }
 0x51e   : > { %v3411_v6 = vpack.c.bf16 %v3359_v27, %v3357_v34  ;;  %v3410_v38 = vpack.c.bf16 %v3358_v48, %v3356_v25  ;;  %v8044_v1 = vmax.f32 %v2768_v5, 0.0  ;;  %v8046_v56 = vmax.f32 %v2769_v41, 0.0 }
 0x51f   : > { %v1560_v55 = vsub.f32 %v7889_v63, %v7031_v49  ;;  %v1657_v21 = vmax.f32 %v1625_v52, 0.0  ;;  %v1922_v19 = vsub.f32 %v7919_v43, %v7033_v7  ;;  %v1923_v42 = vsub.f32 %v7919_v43, %v7049_v47 }
 0x520   : > { %3584 = vmatprep.mubr.bf16.mxu0 %v3411_v6  ;;  %v2706_v20 = vsub.f32 %v7976_v14, %v6994_v28  ;;  %v1658_v26 = vmax.f32 %v1626_v60, 0.0  ;;  %v8060_v15 = vmax.f32 %v2772_v24, 0.0  ;;  %v2707_v61 = vsub.f32 %v7976_v14, %v7031_v49 }
 0x521   : > { %v1883_v36 = vpop.permute.xlu1 %1882  ;;  %3585 = vmatmul.mubr.bf16.gmra.mrb[20].mxu0 %v3410_v38  ;;  %v8067_v18 = vmax.f32 %v2773_v59, 0.0  ;;  %v4999_v13 = vunpack.i.l.bf16 %v8048_v16  ;;  %v3058_v43 = vsub.f32 %v8002_v32, %v7033_v7  ;;  %v3059_v8 = vsub.f32 %v8002_v32, %v7049_v47 }
 0x522   : > { %v1591_v44 = vand.u32 2147483647, %v1559_v3  ;;  %v1592_v22 = vand.u32 2147483647, %v1560_v55  ;;  %v1563_v2 = vsub.f32 %v8013_v58, %v6994_v28  ;;  %v1564_v14 = vsub.f32 %v8013_v58, %v7031_v49 }
 0x523   : > { %v1954_v27 = vand.u32 2147483647, %v1922_v19  ;;  %v1955_v48 = vand.u32 2147483647, %v1923_v42  ;;  %v2738_v62 = vand.u32 2147483647, %v2706_v20  ;;  %v8079_v31 = vmul.f32 %v4982_v50, %v1657_v21 }
 0x524   : > { %v8081_v51 = vmul.f32 %v4982_v50, %v1658_v26  ;;  %v5000_v46 = vunpack.i.h.bf16 %v8048_v16  ;;  %v2739_v32 = vand.u32 2147483647, %v2707_v61  ;;  %v3090_v4 = vand.u32 2147483647, %v3058_v43 }
 0x525   : > { %v8065_v63 = vpop.permute.xlu1 %4962  ;;  %v3091_v29 = vand.u32 2147483647, %v3059_v8  ;;  %v1926_v34 = vsub.f32 %v1883_v36, %v7033_v7  ;;  %v1927_v25 = vsub.f32 %v1883_v36, %v7049_v47  ;;  %v8086_v58 = vmul.f32 %v4999_v13, %v3156_v57 }
 0x526   : > { %v1623_v10 = vsub.f32 1.0, %v1591_v44  ;;  %v1595_v5 = vand.u32 2147483647, %v1563_v2  ;;  %v1596_v41 = vand.u32 2147483647, %v1564_v14  ;;  %v1624_v23 = vsub.f32 1.0, %v1592_v22 }
 0x527   : > { %v1986_v52 = vsub.f32 1.0, %v1954_v27  ;;  %v1987_v6 = vsub.f32 1.0, %v1955_v48  ;;  %v2770_v38 = vsub.f32 1.0, %v2738_v62  ;;  %v8088_v11 = vmul.f32 %v4999_v13, %v3157_v35 }
 0x528   : > { %v2771_v60 = vsub.f32 1.0, %v2739_v32  ;;  %v3122_v3 = vsub.f32 1.0, %v3090_v4  ;;  %v3123_v55 = vsub.f32 1.0, %v3091_v29  ;;  %v1958_v36 = vand.u32 2147483647, %v1926_v34 }
 0x529   : > { %v1959_v21 = vand.u32 2147483647, %v1927_v25  ;;  %v1655_v19 = vmax.f32 %v1623_v10, 0.0  ;;  %v1627_v42 = vsub.f32 1.0, %v1595_v5  ;;  %v1628_v20 = vsub.f32 1.0, %v1596_v41 }
 0x52a   : > { %v2678_v12 = vpop.permute.xlu1 %2677  ;;  %v4959_v26 = vunpack.i.h.bf16 %v8018_v45  ;;  %v1656_v50 = vmax.f32 %v1624_v23, 0.0  ;;  %v2018_v61 = vmax.f32 %v1986_v52, 0.0  ;;  %v2019_v43 = vmax.f32 %v1987_v6, 0.0 }
 0x52b   : > { %v2710_v24 = vsub.f32 %v2678_v12, %v6994_v28  ;;  %v2711_v59 = vsub.f32 %v2678_v12, %v7031_v49  ;;  %v2802_v35 = vmax.f32 %v2770_v38, 0.0  ;;  %v2803_v13 = vmax.f32 %v2771_v60, 0.0 }
 0x52c   : > { %v4958_v8 = vunpack.i.l.bf16 %v8018_v45  ;;  %v3154_v49 = vmax.f32 %v3122_v3, 0.0  ;;  %v3155_v22 = vmax.f32 %v3123_v55, 0.0  ;;  %v1990_v2 = vsub.f32 1.0, %v1958_v36 }
 0x52d   : > { %v2742_v28 = vand.u32 2147483647, %v2710_v24  ;;  %v2743_v44 = vand.u32 2147483647, %v2711_v59  ;;  %v1991_v14 = vsub.f32 1.0, %v1959_v21  ;;  %v8094_v27 = vmax.f32 %v1627_v42, 0.0 }
 0x52e   : > { %v4969_v57 = vpop.permute.xlu1 %4968  ;;  %v8096_v48 = vmax.f32 %v1628_v20, 0.0  ;;  %v1767_v62 = vmul.f32 %v4959_v26, %v1655_v19  ;;  %v4965_v32 = vunpack.i.h.bf16 %v8065_v63  ;;  %v1768_v29 = vmul.f32 %v4959_v26, %v1656_v50 }
 0x52f   : > { %v4971_v34 = vunpack.i.h.bf16 %v4969_v57  ;;  %v1765_v12 = vmul.f32 %v4958_v8, %v8040_v37  ;;  %v4964_v10 = vunpack.i.l.bf16 %v8065_v63  ;;  %v2774_v5 = vsub.f32 1.0, %v2742_v28 }
 0x530   : > { %v2775_v41 = vsub.f32 1.0, %v2743_v44  ;;  %v1766_v23 = vmul.f32 %v4958_v8, %v8042_v33  ;;  %v2022_v52 = vmax.f32 %v1990_v2, 0.0  ;;  %v2023_v6 = vmax.f32 %v1991_v14, 0.0 }
 0x531   : > { %v4970_v38 = vunpack.i.l.bf16 %v4969_v57  ;;  %v2130_v60 = vmul.f32 %v4965_v32, %v2018_v61  ;;  %v2131_v24 = vmul.f32 %v4965_v32, %v2019_v43  ;;  %v2914_v36 = vmul.f32 %v4971_v34, %v2802_v35 }
 0x532   : > { %v2128_v37 = vmul.f32 %v4964_v10, %v7941_v0  ;;  %v2129_v63 = vmul.f32 %v4964_v10, %v7949_v9  ;;  %v2806_v19 = vmax.f32 %v2774_v5, 0.0  ;;  %v2807_v42 = vmax.f32 %v2775_v41, 0.0 }
 0x533   : > { %v3030_v4 = vpop.permute.xlu1 %3029  ;;  %v2912_v33 = vmul.f32 %v4970_v38, %v8044_v1  ;;  %v2913_v20 = vmul.f32 %v4970_v38, %v8046_v56  ;;  %v2946_v8 = vadd.f32 %v2914_v36, %v1767_v62 }
 0x534   : > { %v3062_v25 = vsub.f32 %v3030_v4, %v7033_v7  ;;  %v3063_v45 = vsub.f32 %v3030_v4, %v7049_v47  ;;  %v2915_v7 = vmul.f32 %v4971_v34, %v2803_v13 }
 0x535   : > { %v2944_v1 = vadd.f32 %v2912_v33, %v1765_v12  ;;  %v2945_v4 = vadd.f32 %v2913_v20, %v1766_v23 }
 0x536   : > { %v3094_v59 = vand.u32 2147483647, %v3062_v25  ;;  %v3095_v3 = vand.u32 2147483647, %v3063_v45  ;;  %v2947_v28 = vadd.f32 %v2915_v7, %v1768_v29 }
 0x537   : > { %v4976_v55 = vpop.permute.xlu1 %4975 }
 0x538   : > { %v4978_v21 = vunpack.i.h.bf16 %v4976_v55  ;;  %v4977_v47 = vunpack.i.l.bf16 %v4976_v55  ;;  %v3126_v50 = vsub.f32 1.0, %v3094_v59  ;;  %v3127_v61 = vsub.f32 1.0, %v3095_v3 }
 0x53a   : > { %v3266_v57 = vmul.f32 %v4978_v21, %v3154_v49  ;;  %v3267_v26 = vmul.f32 %v4978_v21, %v3155_v22  ;;  %v3264_v43 = vmul.f32 %v4977_v47, %v8026_v40  ;;  %v3265_v35 = vmul.f32 %v4977_v47, %v8030_v17 }
 0x53b   : > { %v3158_v22 = vmax.f32 %v3126_v50, 0.0  ;;  %v3159_v34 = vmax.f32 %v3127_v61, 0.0 }
 0x53c   : > { %v4986_v13 = vpop.permute.xlu1 %4985  ;;  %v3298_v0 = vadd.f32 %v3266_v57, %v2130_v60  ;;  %v3299_v44 = vadd.f32 %v3267_v26, %v2131_v24  ;;  %v3296_v9 = vadd.f32 %v3264_v43, %v2128_v37  ;;  %v3297_v2 = vadd.f32 %v3265_v35, %v2129_v63 }
 0x53d   : > { %v4988_v14 = vunpack.i.h.bf16 %v4986_v13  ;;  %v4987_v32 = vunpack.i.l.bf16 %v4986_v13 }
 0x53e   : > { %v3331_v56 = vmul.f32 %v3299_v44, %v2947_v28  ;;  %v3330_v49 = vmul.f32 %v3298_v0, %v2946_v8  ;;  %v3329_v29 = vmul.f32 %v3297_v2, %v2945_v4  ;;  %v3328_v10 = vmul.f32 %v3296_v9, %v2944_v1 }
 0x53f   : > { %v2132_v25 = vmul.f32 %v4987_v32, %v8034_v30  ;;  %v2133_v40 = vmul.f32 %v4987_v32, %v8038_v54  ;;  %v2134_v17 = vmul.f32 %v4988_v14, %v2022_v52  ;;  %v2135_v45 = vmul.f32 %v4988_v14, %v2023_v6 }
 0x540   : > { %v3363_v38 = vmul.f32 0.25, %v3331_v56  ;;  %v3362_v12 = vmul.f32 0.25, %v3330_v49  ;;  %v3361_v24 = vmul.f32 0.25, %v3329_v29  ;;  %v3360_v59 = vmul.f32 0.25, %v3328_v10 }
 0x541   : > { %v3300_v5 = vadd.f32 %v8086_v58, %v2132_v25  ;;  %v3301_v41 = vadd.f32 %v8088_v11, %v2133_v40  ;;  %v1771_v30 = vmul.f32 %v4983_v53, %v8094_v27  ;;  %v1772_v54 = vmul.f32 %v4983_v53, %v8096_v48 }
 0x542   : > { %v4992_v62 = vpop.permute.xlu1 %4991  ;;  %v3270_v52 = vmul.f32 %v5000_v46, %v3158_v22  ;;  %v3271_v58 = vmul.f32 %v5000_v46, %v3159_v34  ;;  %v3413_v21 = vpack.c.bf16 %v3363_v38, %v3361_v24  ;;  %v3412_v27 = vpack.c.bf16 %v3362_v12, %v3360_v59 }
 0x543   : > { %v4994_v23 = vunpack.i.h.bf16 %v4992_v62  ;;  %v4993_v60 = vunpack.i.l.bf16 %v4992_v62 }
 0x544   : > { %v3302_v36 = vadd.f32 %v3270_v52, %v2134_v17  ;;  %v3303_v7 = vadd.f32 %v3271_v58, %v2135_v45  ;;  %3592 = vmatprep.mubr.bf16.mxu0 %v3413_v21  ;;  %v5022_v52 = vld [vmem:[#allocation14] sm:$0xff]  }
 0x545   : > { %v2918_v11 = vmul.f32 %v4994_v23, %v2806_v19  ;;  %v2919_v6 = vmul.f32 %v4994_v23, %v2807_v42  ;;  %v2916_v3 = vmul.f32 %v4993_v60, %v8060_v15  ;;  %v2917_v55 = vmul.f32 %v4993_v60, %v8067_v18  ;;  %3593 = vmatmul.mubr.bf16.gmra.mrb[24].mxu0 %v3412_v27 }
 0x546   : > { %4477 = vmatpush3.bf16.msra.mxu1 %v5022_v52  ;;  %v3795_v52 = vld [vmem:[#allocation17 + $0x40] sm:$0xff] }
 0x547   : > { %v2948_v47 = vadd.f32 %v2916_v3, %v8079_v31  ;;  %v2949_v39 = vadd.f32 %v2917_v55, %v8081_v51  ;;  %v2950_v53 = vadd.f32 %v2918_v11, %v1771_v30  ;;  %v2951_v48 = vadd.f32 %v2919_v6, %v1772_v54  ;;  %v5023_v6 = vld [vmem:[#allocation14 + $0x8] sm:$0xff]  }
 0x548   : > { %v8517_v11 = vmov 0.0  }
 0x549   : > { %v3333_v16 = vmul.f32 %v3301_v41, %v2949_v39  ;;  %v3335_v46 = vmul.f32 %v3303_v7, %v2951_v48  ;;  %v3332_v37 = vmul.f32 %v3300_v5, %v2948_v47  ;;  %v3334_v63 = vmul.f32 %v3302_v36, %v2950_v53  ;;  %4478 = vmatprep.subr.bf16.mxu1 %v8517_v11  ;;  %v5024_v36 = vld [vmem:[#allocation14 + $0x10] sm:$0xff]   ;;  %v5025_v39 = vld [vmem:[#allocation14 + $0x18] sm:$0xff]  }
 0x54a   : > { %4479 = vmatpush3.bf16.msra.mxu1 %v5023_v6  ;;  %4484 = vmatprep.mubr.msk.bf16.mxu1 %vm5627_vm4, %v8517_v11  ;;  %v3797_v6 = vld [vmem:[#allocation17 + $0x50] sm:$0xff] }
 0x54b   : > { %v3365_v19 = vmul.f32 0.25, %v3333_v16  ;;  %v3367_v15 = vmul.f32 0.25, %v3335_v46  ;;  %v3364_v42 = vmul.f32 0.25, %v3332_v37  ;;  %v3366_v18 = vmul.f32 0.25, %v3334_v63  ;;  %4480 = vmatprep.subr.bf16.mxu1 %v8517_v11  ;;  %v3880_v46 = vld [vmem:[%s6250_s8] sm:$0xff]  ;;  %s4385_s8 = sshll.u32 %s5769_s24, 7 }
 0x54c   : > { %s5635_s24 = smov [#allocation29]  }
 0x54d   : > { %v3415_v33 = vpack.c.bf16 %v3367_v15, %v3365_v19  ;;  %v3414_v20 = vpack.c.bf16 %v3366_v18, %v3364_v42  ;;  %v3882_v18 = vmul.f32 0.015625, %v3880_v46  ;;  %s5470_s14 = sshll.u32 %s5635_s24, 4  ;;  %s5471_s14 = int_to_ptr.vmem [resolvable:$false] %s5470_s14 }
 0x54e   : > { %4481 = vmatpush3.bf16.msra.mxu1 %v5024_v36  ;;  %v3799_v36 = vld [vmem:[#allocation17 + $0x60] sm:$0xff]  ;;  %p5473_p13 = scmp.lt.s32.totalorder %s8144_s26, %s5471_s14 }
 0x54f   : > { %3600 = vmatprep.mubr.bf16.mxu0 %v3415_v33  ;;  %4482 = vmatprep.subr.bf16.mxu1 %v8517_v11  ;;  %v5632_v33 = vmov 2  }
 0x550   : > { %3601 = vmatmul.mubr.bf16.gmra.mrb[28].mxu0 %v3414_v20  ;;  %v5633_v20 = vmov 3  }
 0x552   : > { %4483 = vmatpush3.bf16.msra.mxu1 %v5025_v39 }
 0x561   : > { %v4406_v57 = vpop.f32.mrb[0].mxu0 }
 0x562   : > { %v4407_v31 = vpop.f32.mrb[1].mxu0 }
 0x563   : > { %v4408_v51 = vadd.f32 %v4407_v31, %v4406_v57  ;;  %v4409_v26 = vpop.f32.mrb[2].mxu0 }
 0x564   : > { %v4410_v50 = vpop.f32.mrb[3].mxu0 }
 0x565   : > { %3610 = vst.msk [vmem:[#allocation2] sm:$0xff] %vm3609_vm11, %v4408_v51  ;;  %v4411_v61 = vadd.f32 %v4410_v50, %v4409_v26  ;;  %vm3699_vm11 = vcmask 523744  }
 0x567   : > { %3612 = vrot.lane.b32.xlu1 %v4411_v61, %s5616_s6 }
 0x584   : > { %v4412_v43 = vpop.f32.mrb[4].mxu0 }
 0x585   : > { %v4413_v35 = vpop.f32.mrb[5].mxu0 }
 0x586   : > { %v4414_v13 = vadd.f32 %v4413_v35, %v4412_v43  ;;  %v4415_v8 = vpop.f32.mrb[6].mxu0 }
 0x587   : > { %v4416_v28 = vpop.f32.mrb[7].mxu0 }
 0x588   : > { %v4417_v0 = vadd.f32 %v4416_v28, %v4415_v8  ;;  %3618 = vrot.lane.b32.xlu1 %v4414_v13, %s5617_s10  ;;  %v4375_v28 = vld [vmem:[#allocation20] ss:$0 sm:$0xff] }
 0x58a   : > { %3624 = vrot.lane.b32.xlu0 %v4417_v0, %s5618_s20  ;;  %v4376_v0 = vld [vmem:[#allocation22] ss:$0 sm:$0xff]  ;;  %s8518_s20 = sld [smem:[#allocation92_spill]] }
 0x59e   : > { %v4418_v44 = vpop.f32.mrb[8].mxu0 }
 0x59f   : > { %v4419_v9 = vpop.f32.mrb[9].mxu0 }
 0x5a0   : > { %v4420_v2 = vadd.f32 %v4419_v9, %v4418_v44  ;;  %v4421_v14 = vpop.f32.mrb[10].mxu0  ;;  %v4377_v9 = vld [vmem:[#allocation20 + $0x1] ss:$0 sm:$0xff] }
 0x5a1   : > { %v4422_v32 = vpop.f32.mrb[11].mxu0 }
 0x5a2   : > { %v4423_v1 = vadd.f32 %v4422_v32, %v4421_v14  ;;  %3630 = vrot.lane.b32.xlu1 %v4420_v2, %s5619_s2  ;;  %s8519_s2 = smov %s8518_s20 }
 0x5a4   : > { %3636 = vrot.lane.b32.xlu0 %v4423_v1, %s5620_s13  ;;  %s8142_s13 = scalar_lea.hbm %s8518_s20, %s4385_s8 }
 0x5af   : > { %v4424_v4 = vpop.f32.mrb[12].mxu0 }
 0x5b0   : > { %v4425_v56 = vpop.f32.mrb[13].mxu0 }
 0x5b1   : > { %v4426_v49 = vadd.f32 %v4425_v56, %v4424_v4  ;;  %v4427_v22 = vpop.f32.mrb[14].mxu0  ;;  %v4378_v4 = vld [vmem:[#allocation20 + $0x2] ss:$0 sm:$0xff] }
 0x5b2   : > { %v4428_v34 = vpop.f32.mrb[15].mxu0 }
 0x5b3   : > { %v4429_v25 = vadd.f32 %v4428_v34, %v4427_v22  ;;  %3642 = vrot.lane.b32.xlu1 %v4426_v49, %s5621_s16  ;;  %v4379_v34 = vld [vmem:[#allocation20 + $0x3] ss:$0 sm:$0xff]  ;;  %s3992_s16 = scalar_lea.sflag [#allocation7], %s6238_s18 }
 0x5b5   : > { %3648 = vrot.lane.b32.xlu0 %v4429_v25, %s5622_s12  ;;  %s5466_s12 = scalar_lea.vmem %s8144_s26, 128 }
 0x5b6   : > { %p5467_p5 = scmp.ne.s32.totalorder %s8144_s26, %s5466_s12 }
 0x5b8   : > { %p5468_p8 = pnand %p5467_p5, %p8520_p7 }
 0x5ba   : > { %p5469_p6 = pneg %p5468_p8 }
 0x5cd   : > { %v4430_v40 = vpop.f32.mrb[16].mxu0 }
 0x5ce   : > { %v4431_v17 = vpop.f32.mrb[17].mxu0 }
 0x5cf   : > { %v4432_v45 = vadd.f32 %v4431_v17, %v4430_v40  ;;  %v4433_v62 = vpop.f32.mrb[18].mxu0 }
 0x5d0   : > { %v4434_v29 = vpop.f32.mrb[19].mxu0 }
 0x5d1   : > { %v4435_v10 = vadd.f32 %v4434_v29, %v4433_v62  ;;  %3654 = vrot.lane.b32.xlu1 %v4432_v45, %s5623_s28  ;;  %v3787_v62 = vld [vmem:[#allocation17] sm:$0xff]  ;;  %v3788_v29 = vld [vmem:[#allocation17 + $0x8] sm:$0xff]  ;;  %s5472_s28 = scalar_lea.vmem %s5471_s14, 256 }
 0x5d2   : > { %p5474_p10 = scmp.lt.s32.totalorder %s5472_s28, %s5466_s12 }
 0x5d3   : > { %3660 = vrot.lane.b32.xlu0 %v4435_v10, %s5624_s23  ;;  %v3789_v10 = vld [vmem:[#allocation17 + $0x10] sm:$0xff] }
 0x5d4   : > { %p5475_p11 = por %p5474_p10, %p5473_p13 }
 0x5d6   : > { %p5476_p1 = pnand %p5475_p11, %p5469_p6 }
 0x5d9   : > { %v3613_v5 = vpop.permute.xlu1 %3612 }
 0x5da   : > { %3616 = vst.msk [vmem:[#allocation2] sm:$0xff] %vm3615_vm14, %v3613_v5  ;;  %vm3742_vm14 = vcmask 523264   ;;  %v5634_v5 = vmov 0.0|0.0  }
 0x5db   : > { %4523 = vmatprep.subr.bf16.mxu1 %v5634_v5 }
 0x5f4   : > { %v4436_v41 = vpop.f32.mrb[20].mxu0 }
 0x5f5   : > { %v4437_v38 = vpop.f32.mrb[21].mxu0 }
 0x5f6   : > { %v4438_v12 = vadd.f32 %v4437_v38, %v4436_v41  ;;  %v4439_v23 = vpop.f32.mrb[22].mxu0  ;;  %v4524_v41 = vpack.c.bf16 %v3788_v29, %v3787_v62  ;;  %v3790_v38 = vld [vmem:[#allocation17 + $0x18] sm:$0xff] }
 0x5f7   : > { %v4440_v60 = vpop.f32.mrb[23].mxu0 }
 0x5f8   : > { %v4441_v24 = vadd.f32 %v4440_v60, %v4439_v23  ;;  %3666 = vrot.lane.b32.xlu1 %v4438_v12, %s5625_s11  ;;  %v4527_v12 = vpack.c.bf16 %v3790_v38, %v3789_v10  ;;  %v3791_v23 = vld [vmem:[#allocation17 + $0x20] sm:$0xff]  ;;  %v3792_v60 = vld [vmem:[#allocation17 + $0x28] sm:$0xff] }
 0x5fa   : > { %3672 = vrot.lane.b32.xlu0 %v4441_v24, %s5626_s30  ;;  %v3619_v59 = vpop.permute.xlu1 %3618  ;;  %v4530_v24 = vpack.c.bf16 %v3792_v60, %v3791_v23 }
 0x5fb   : > { %3622 = vst.msk [vmem:[#allocation2] sm:$0xff] %vm3621_vm3, %v3619_v59  ;;  %v3793_v59 = vld [vmem:[#allocation17 + $0x30] sm:$0xff] }
 0x5fc   : > { %v3625_v30 = vpop.permute.xlu0 %3624 }
 0x5fd   : > { %3628 = vst.msk [vmem:[#allocation2] sm:$0xff] %vm3627_vm1, %v3625_v30  ;;  %v3794_v30 = vld [vmem:[#allocation17 + $0x38] sm:$0xff] }
 0x614   : > { %v3631_v54 = vpop.permute.xlu1 %3630 }
 0x615   : > { %3634 = vst.msk [vmem:[#allocation2] sm:$0xff] %vm3633_vm5, %v3631_v54  ;;  %v4533_v54 = vpack.c.bf16 %v3794_v30, %v3793_v59 }
 0x616   : > { %v3637_v58 = vpop.permute.xlu0 %3636 }
 0x617   : > { %3640 = vst.msk [vmem:[#allocation2] sm:$0xff] %vm3639_vm6, %v3637_v58  ;;  %v3796_v58 = vld [vmem:[#allocation17 + $0x48] sm:$0xff] }
 0x618   : > { %v4442_v3 = vpop.f32.mrb[24].mxu0 }
 0x619   : > { %v4443_v55 = vpop.f32.mrb[25].mxu0 }
 0x61a   : > { %v4444_v7 = vadd.f32 %v4443_v55, %v4442_v3  ;;  %v4445_v21 = vpop.f32.mrb[26].mxu0  ;;  %v3798_v3 = vld [vmem:[#allocation17 + $0x58] sm:$0xff] }
 0x61b   : > { %v4446_v27 = vpop.f32.mrb[27].mxu0  ;;  %v4539_v55 = vpack.c.bf16 %v3798_v3, %v3797_v6 }
 0x61c   : > { %v4447_v47 = vadd.f32 %v4446_v27, %v4445_v21  ;;  %3678 = vrot.lane.b32.xlu1 %v4444_v7, %s5628_s4  ;;  %v3800_v7 = vld [vmem:[#allocation17 + $0x68] sm:$0xff]  ;;  %v3801_v27 = vld [vmem:[#allocation17 + $0x70] sm:$0xff] }
 0x61d   : > { %v4542_v21 = vpack.c.bf16 %v3800_v7, %v3799_v36 }
 0x61e   : > { %3684 = vrot.lane.b32.xlu0 %v4447_v47, %s5629_s25  ;;  %v3802_v47 = vld [vmem:[#allocation17 + $0x78] sm:$0xff] }
 0x61f   : > { %v4545_v39 = vpack.c.bf16 %v3802_v47, %v3801_v27 }
 0x623   : > { %v4448_v48 = vpop.f32.mrb[28].mxu0 }
 0x624   : > { %v4449_v16 = vpop.f32.mrb[29].mxu0 }
 0x625   : > { %v3643_v53 = vpop.permute.xlu1 %3642  ;;  %v4450_v63 = vadd.f32 %v4449_v16, %v4448_v48  ;;  %v4451_v19 = vpop.f32.mrb[30].mxu0 }
 0x626   : > { %3646 = vst.msk [vmem:[#allocation2] sm:$0xff] %vm3645_vm7, %v3643_v53  ;;  %v4452_v15 = vpop.f32.mrb[31].mxu0 }
 0x627   : > { %v3649_v37 = vpop.permute.xlu0 %3648  ;;  %v4453_v42 = vadd.f32 %v4452_v15, %v4451_v19  ;;  %3690 = vrot.lane.b32.xlu1 %v4450_v63, %s5630_s3 }
 0x628   : > { %3652 = vst.msk [vmem:[#allocation2] sm:$0xff] %vm3651_vm9, %v3649_v37  ;;  %v4368_v37 = vld [vmem:[#allocation16] ss:$0 sm:$0xff] }
 0x629   : > { %3696 = vrot.lane.b32.xlu0 %v4453_v42, %s5631_s7 }
 0x62b   : > { %3886 = vperm.xlu1 %5001, %v3882_v18  }
 0x62d   : > { %3903 = vperm.xlu0 %5002, %v3882_v18  }
 0x62f   : > { %5003 = vset.pattern.permute.xlu1 %v5632_v33 }
 0x630   : > { %3914 = vperm.xlu1 %5003, %v3882_v18  }
 0x631   : > { %5005 = vset.pattern.permute.xlu0 %v5633_v20 }
 0x634   : > { %5004 = vset.pattern.permute.xlu1 %v5633_v20 }
 0x635   : > { %3925 = vperm.xlu1 %5004, %v3882_v18  }
 0x643   : > { %v3655_v57 = vpop.permute.xlu1 %3654 }
 0x644   : > { %3658 = vst.msk [vmem:[#allocation2] sm:$0xff] %vm3657_vm10, %v3655_v57 }
 0x645   : > { %v3661_v31 = vpop.permute.xlu0 %3660 }
 0x646   : > { %3664 = vst.msk [vmem:[#allocation2] sm:$0xff] %vm3663_vm12, %v3661_v31 }
 0x66a   : > { %v3667_v51 = vpop.permute.xlu1 %3666 }
 0x66b   : > { %3670 = vst.msk [vmem:[#allocation2] sm:$0xff] %vm3669_vm8, %v3667_v51 }
 0x66c   : > { %v3673_v26 = vpop.permute.xlu0 %3672 }
 0x66d   : > { %3676 = vst.msk [vmem:[#allocation2] sm:$0xff] %vm3675_vm13, %v3673_v26 }
 0x68e   : > { %v3679_v50 = vpop.permute.xlu1 %3678 }
 0x68f   : > { %3682 = vst.msk [vmem:[#allocation2] sm:$0xff] %vm3681_vm15, %v3679_v50  ;;  %v4380_v50 = vld [vmem:[#allocation23] ss:$0 sm:$0xff] }
 0x690   : > { %v3685_v61 = vpop.permute.xlu0 %3684 }
 0x691   : > { %3688 = vst.msk [vmem:[#allocation2] sm:$0xff] %vm3687_vm0, %v3685_v61 }
 0x699   : > { %v3691_v43 = vpop.permute.xlu1 %3690 }
 0x69a   : > { %3694 = vst.msk [vmem:[#allocation2] sm:$0xff] %vm3693_vm2, %v3691_v43  ;;  %v4374_v43 = vld [vmem:[#allocation19] ss:$0 sm:$0xff] }
 0x69b   : > { %v3697_v35 = vpop.permute.xlu0 %3696 }
 0x69c   : > { %3700 = vst.msk [vmem:[#allocation2] sm:$0xff] %vm3699_vm11, %v3697_v35  ;;  %v4381_v35 = vld [vmem:[#allocation25] ss:$0 sm:$0xff] }
 0x6a3   : > { %v3701_v13 = vld [vmem:[#allocation2] sm:$0xff] }
 0x6a4   : > { %v3702_v8 = vpack.c.bf16 %v3701_v13, %v3701_v13 }
 0x6a6   : > { %4485 = vmatmul.mubr.msk.bf16.vlgmr.msra.gmra.mrb[0].mxu1 %vm3742_vm14, %v3702_v8 }
 0x6a7   : > { %4520 = vmatprep.mubr.msk.f32.mxu1 %vm5627_vm4, %v8517_v11  ;;  %4525 = vmatpush3.bf16.msra.mxu1 %v4524_v41  ;;  %v4536_v11 = vpack.c.bf16 %v3796_v58, %v3795_v52 }
 0x6a8   : > { %4526 = vmatprep.subr.bf16.mxu1 %v5634_v5 }
 0x6aa   : > { %v3887_v44 = vpop.permute.xlu1 %3886 }
 0x6ab   : > { %v3893_v2 = vmul.f32 %v4375_v28, %v3887_v44  ;;  %4528 = vmatpush3.bf16.msra.mxu1 %v4527_v12 }
 0x6ac   : > { %v3904_v14 = vpop.permute.xlu0 %3903  ;;  %4529 = vmatprep.subr.bf16.mxu1 %v5634_v5 }
 0x6ad   : > { %v3900_v32 = vadd.f32 %v4376_v0, %v3893_v2  ;;  %v3910_v1 = vmul.f32 %v4377_v9, %v3904_v14 }
 0x6af   : > { %v3911_v56 = vadd.f32 %v3910_v1, %v3900_v32  ;;  %v3915_v49 = vpop.permute.xlu1 %3914  ;;  %4531 = vmatpush3.bf16.msra.mxu1 %v4530_v24 }
 0x6b0   : > { %v3921_v22 = vmul.f32 %v4378_v4, %v3915_v49  ;;  %4532 = vmatprep.subr.bf16.mxu1 %v5634_v5 }
 0x6b2   : > { %v3922_v25 = vadd.f32 %v3921_v22, %v3911_v56  ;;  %v4382_v22 = vld [vmem:[#allocation26] ss:$0 sm:$0xff] }
 0x6b3   : > { %4534 = vmatpush3.bf16.msra.mxu1 %v4533_v54 }
 0x6b4   : > { %v3926_v40 = vpop.permute.xlu1 %3925  ;;  %4535 = vmatprep.subr.bf16.mxu1 %v5634_v5 }
 0x6b5   : > { %v3932_v17 = vmul.f32 %v4379_v34, %v3926_v40 }
 0x6b7   : > { %v3933_v45 = vadd.f32 %v3932_v17, %v3922_v25  ;;  %4537 = vmatpush3.bf16.msra.mxu1 %v4536_v11  ;;  %v4383_v25 = vld [vmem:[#allocation28] ss:$0 sm:$0xff] }
 0x6b8   : > { %4538 = vmatprep.subr.bf16.mxu1 %v5634_v5 }
 0x6b9   : > { %3936 = vadd.xlane.f32.xlu0 %v3933_v45 }
 0x6bb   : > { %4540 = vmatpush3.bf16.msra.mxu1 %v4539_v55 }
 0x6bc   : > { %4541 = vmatprep.subr.bf16.mxu1 %v5634_v5 }
 0x6bf   : > { %4543 = vmatpush3.bf16.msra.mxu1 %v4542_v21 }
 0x6c0   : > { %4544 = vmatprep.subr.bf16.mxu1 %v5634_v5 }
 0x6c3   : > { %4546 = vmatpush3.bf16.msra.mxu1 %v4545_v39 }
 0x746   : > { %v3937_v53 = vpop.xlane.xlu0 %3936 }
 0x747   : > { %v3939_v48 = vmul.f32 0.0078125, %v3937_v53 }
 0x749   : > { %v3940_v16 = vsub.f32 %v3933_v45, %v3939_v48 }
 0x74b   : > { %v3941_v46 = vmul.f32 %v3940_v16, %v3940_v16 }
 0x74d   : > { %3942 = vadd.xlane.f32.xlu1 %v3941_v46 }
 0x779   : > { %v3780_v63 = vpop.f32.mrb[0].mxu1 }
 0x77a   : > { %v3781_v19 = vadd.f32 %v4368_v37, %v3780_v63  ;;  %v4486_v15 = vpop.f32.mrb[1].mxu1 }
 0x77b   : > { %v3783_v42 = vpop.f32.mrb[2].mxu1 }
 0x77c   : > { %v3786_v18 = vmax.f32 %v3781_v19, 0.0  ;;  %v4487_v33 = vpop.f32.mrb[3].mxu1 }
 0x77e   : > { %4521 = vmatmul.mubr.f32.vlgmr.msra.gmra.mrb[4].mxu1 %v3786_v18 }
 0x7da   : > { %v3943_v20 = vpop.xlane.xlu1 %3942 }
 0x7db   : > { %v3944_v57 = vmul.f32 0.0078125, %v3943_v20 }
 0x7dd   : > { %v3945_v31 = vadd.f32 1e-05, %v3944_v57 }
 0x7df   : > { %5026 = vrsqrt.f32 %v3945_v31 }
 0x7e9   : > { %v5027_v51 = vpop.eup %5026 }
 0x7ea   : > { %v3947_v26 = vmul.f32 %v5027_v51, %v3940_v16 }
 0x7ec   : > { %v3954_v61 = vmul.f32 %v4380_v50, %v3947_v26 }
 0x7ee   : > { %v3961_v28 = vadd.f32 %v4381_v35, %v3954_v61 }
 0x851   : > { %v3876_v13 = vpop.f32.mrb[4].mxu1 }
 0x852   : > { %v3877_v8 = vadd.f32 %v4374_v43, %v3876_v13  ;;  %v4522_v0 = vpop.f32.mrb[5].mxu1 }
 0x854   : > { %v3962_v44 = vadd.f32 %v3961_v28, %v3877_v8 }
 0x856   : > { %3965 = vadd.xlane.f32.xlu0 %v3962_v44 }
 0x8e3   : > { %v3966_v9 = vpop.xlane.xlu0 %3965 }
 0x8e4   : > { %v3967_v2 = vmul.f32 0.0078125, %v3966_v9 }
 0x8e6   : > { %v3968_v14 = vsub.f32 %v3962_v44, %v3967_v2 }
 0x8e8   : > { %v3969_v32 = vmul.f32 %v3968_v14, %v3968_v14 }
 0x8ea   : > { %3970 = vadd.xlane.f32.xlu0 %v3969_v32 }
 0x977   : > { %v3971_v1 = vpop.xlane.xlu0 %3970 }
 0x978   : > { %v3972_v4 = vmul.f32 0.0078125, %v3971_v1 }
 0x97a   : > { %v3973_v56 = vadd.f32 1e-05, %v3972_v4 }
 0x97c   : > { %5028 = vrsqrt.f32 %v3973_v56 }
 0x986   : > { %v5029_v49 = vpop.eup %5028 }
 0x987   : > { %v3975_v34 = vmul.f32 %v5029_v49, %v3968_v14 }
 0x989   : > { %v3982_v40 = vmul.f32 %v4382_v22, %v3975_v34 }
 0x98b   : > { %v3989_v17 = vadd.f32 %v4383_v25, %v3982_v40 }
 0x98d   : > { %3990 = vst [vmem:[%s748_s15] sm:$0xff] %v3989_v17 }
 0x98e   : > { %5479 = shalt.err (!%p5476_p1)
}
 0x98f   : > { %s5480_s18 = scalar_lea.hbm %s8142_s13, 128  ;;  %s5484_s30 = scalar_lea.hbm %s8519_s2, 256 }
 0x990   : > { %p5481_p2 = scmp.ne.s32.totalorder %s8142_s13, %s5480_s18  ;;  %p5485_p9 = scmp.lt.u32.totalorder %s8142_s13, %s8519_s2 }
 0x991   : > { %p5486_p0 = scmp.lt.u32.totalorder %s5484_s30, %s5480_s18  ;;  %p5488_p5 = scmp.lt.u32.totalorder %s5480_s18, %s8142_s13 }
 0x992   : > { %p5482_p4 = pnand %p5481_p2, %p8520_p7 }
 0x993   : > { %p5487_p12 = por %p5486_p0, %p5485_p9 }
 0x994   : > { %p5483_p3 = pneg %p5482_p4 }
 0x995   : > { %p5489_p8 = por %p5488_p5, %p5487_p12 }
 0x997   : > { %p5490_p6 = pnand %p5489_p8, %p5483_p3 }
 0x999   : > { %5493 = shalt.err (!%p5490_p6)
}
 0x99a   : > { %4603 = dma.vmem_to_hbm [thread:$0]  (%p8520_p7), %s8144_s26, 128, %s8142_s13, %s3992_s16  }
 0x99b PF: > { %s4017_s3 = sand.u32 1, %s5562_s1   ;;  %p8521_p13 = scmp.ne.s32.totalorder %s8314_s29, 0 }
 0x99c   : > { %p8522_p10 = scmp.ge.s32.totalorder %s5586_s21, 2  ;;  %s4018_s7 = scalar_lea.sflag [#allocation7], %s4017_s3 }
 0x99e   : > { %p4655_p11 = pnand %p8522_p10, %p8521_p13 }
 0x9a0   : > { %5557 = dma.done.wait (!%p4655_p11), %s4018_s7, 128  }
 0x9a1   : > { %5559 = vsyncadd (!%p4655_p11), %s4018_s7, 4294967168  ;;  %s8523_s21 = sld [smem:[#allocation46_spill]]  ;;  %s8524_s8 = sld [smem:[#allocation47_spill]] }
 0x9a2   : > { %s8525_s18 = sld [smem:[#allocation43_spill]]  ;;  %s8526_s5 = sld [smem:[#allocation44_spill]] }
 0x9a3   : > { %s8527_s15 = smov %s6149_s19  ;;  %s8528_s1 = smov %s5566_s0 }
 0x9a4   : > { %s8529_s0 = smov %s5570_s17  ;;  %s8532_s20 = smov %s8527_s15 }
 0x9a7   : > { %p42_p7 = scmp.ge.s32.totalorder %s8523_s21, 4   ;;  %s8530_s17 = smov %s8524_s8 }
 0x9a8   : > { %s8531_s19 = smov %s8526_s5 }
 0x9a9   :  { %44 = sbr.rel (!%p42_p7) target bundleno = 39 (0x27), region = 197 }
 0x9b0   :  { %4023 = vsyncpa [#allocation6], 1 }
 0x9b1   :  { %4025 = vsyncpa [#allocation6 + $0x1], 1 }
 0x9b2   :  { %4026 = vsyncpa [#allocation9], 1 }
 0x9b3   :  { %4027 = vsyncpa [#allocation12], 1 }
 0x9b4   :  { %4029 = vsyncpa [#allocation12 + $0x1], 1 }
 0x9b5   :  { %4030 = vsyncpa [#allocation15], 1 }
 0x9b6   :  { %4031 = vsyncpa [#allocation18], 1 }
 0x9b7   :  { %4032 = vsyncpa [#allocation21], 1 }
 0x9b8   :  { %4033 = vsyncpa [#allocation24], 1 }
 0x9b9   :  { %4034 = vsyncpa [#allocation27], 1 }
 0x9ba   :  { %4035 = vsyncpa [#allocation7], 1 }
 0x9bb   :  { %4037 = vsyncpa [#allocation7 + $0x1], 1 }

</bundles_post_ra>
